<compile_context>
chip_gen: v7x
topology: tpu7x:2x2x1
jax: 0.10.0
libtpu: 0.0.40
codegen_flags: <defaults>
</compile_context>

<pallas_src>
import functools
import math

import jax
import jax.numpy as jnp
from jax.experimental import pallas as pl
from jax.experimental.pallas import tpu as pltpu


LOCATIONS = ["shake"]                       # single location -> multi_location_flag = False
LOC_MODALITIES = {"shake": ["audio", "seismic"]}

_VMEM_LIMIT = 16 * 1024 * 1024              # explicit budget; safe headroom on v5e/v6e/v7x


def _vmem():
    return pl.BlockSpec(memory_space=pltpu.MemorySpace.VMEM)


# ----------------------------- in-kernel ConvBlock compute -----------------------------

def _convblock_compute(x, w_refs, xpad_ref, hpad_ref, *, k, s, n, cin, cout, n_blocks):
    """One ConvBlock (in-conv + n_blocks residual blocks + spectrum mean), VMEM resident.

    x        : (n, s, cin) f32 value (channels last)
    w_refs   : [w_in (k,cin,cout), b_in (1,cout), (w1,b1,w2,b2) * n_blocks]
    xpad_ref : VMEM scratch (n, s+k-1, cin)   'same'-padding buffer for the input conv
    hpad_ref : VMEM scratch (n, s+k-1, cout)  'same'-padding buffer for inner convs
    returns  : (n, cout) f32 spectrum-mean features
    """
    pad_l = k // 2

    def conv_same(pad_ref, h3d, c_in, w_ref, b_ref, residual=None):
        # write the current activation into the centre of the padded scratch,
        # then accumulate K shifted-window matmuls on the MXU.
        pad_ref[:, pad_l:pad_l + s, :] = h3d
        acc = jnp.dot(pad_ref[:, 0:s, :].reshape(n * s, c_in), w_ref[0],
                      preferred_element_type=jnp.float32)
        for t in range(1, k):
            acc += jnp.dot(pad_ref[:, t:t + s, :].reshape(n * s, c_in), w_ref[t],
                           preferred_element_type=jnp.float32)
        acc = acc + b_ref[...]
        if residual is not None:
            acc = acc + residual                # residual stays flat (n*s, cout), no reshape
        return jnp.maximum(acc, 0.0)            # (n*s, cout)

    # zero the padding halos once; centre rows are overwritten every layer.
    xpad_ref[...] = jnp.zeros_like(xpad_ref)
    hpad_ref[...] = jnp.zeros_like(hpad_ref)

    h = conv_same(xpad_ref, x, cin, w_refs[0], w_refs[1])            # input conv
    for bi in range(n_blocks):                                       # residual inner blocks
        w1, b1, w2, b2 = w_refs[2 + 4 * bi: 6 + 4 * bi]
        t1 = conv_same(hpad_ref, h.reshape(n, s, cout), cout, w1, b1)
        h = conv_same(hpad_ref, t1.reshape(n, s, cout), cout, w2, b2, residual=h)

    return jnp.mean(h.reshape(n, s, cout), axis=1)                   # spectrum mean (n, cout)


# ----------------------------- Pallas kernels -----------------------------

def _mod_convblock_kernel(*refs, k, s, n, cin, cout, n_blocks, b, interval_num, group):
    """One grid step = one modality's full ConvBlock."""
    n_w = 2 + 4 * n_blocks
    x_ref = refs[0]                               # (n, s, cin)
    w_refs = refs[1:1 + n_w]
    o_ref = refs[1 + n_w]                         # (b*interval_num, cout)
    xpad_ref, hpad_ref = refs[2 + n_w], refs[3 + n_w]

    feat = _convblock_compute(x_ref[...], w_refs, xpad_ref, hpad_ref,
                              k=k, s=s, n=n, cin=cin, cout=cout, n_blocks=n_blocks)
    if group > 1:                                 # interval pooling I -> interval_num
        feat = jnp.mean(feat.reshape(b * interval_num, group, cout), axis=1)
    o_ref[...] = feat


def _tail_kernel(*refs, m, k, s, n, cout, n_blocks, b, group):
    """MeanFusion + location ConvBlock + flatten + Linear/ReLU/Linear/Softmax."""
    n_w = 2 + 4 * n_blocks
    x_ref = refs[0]                               # (m, n, s, 1) stacked modality features
    w_refs = refs[1:1 + n_w]
    w1_ref, b1_ref, w2_ref, b2_ref = refs[1 + n_w: 5 + n_w]
    o_ref = refs[5 + n_w]                         # (b, num_classes)
    xpad_ref, hpad_ref = refs[6 + n_w], refs[7 + n_w]

    # MeanFusionBlock: mean over the torch.stack(dim=3) modality axis.
    fused = x_ref[0]
    for mm in range(1, m):
        fused = fused + x_ref[mm]
    fused = fused * (1.0 / m)                     # (n, s, 1)

    # location ConvBlock (in_channels=1, interval_num=1).
    feat = _convblock_compute(fused, w_refs, xpad_ref, hpad_ref,
                              k=k, s=s, n=n, cin=1, cout=cout, n_blocks=n_blocks)
    if group > 1:                                 # pool all intervals -> interval_num = 1
        feat = jnp.mean(feat.reshape(b, group, cout), axis=1)
    final = feat                                  # (b, cout) == torch.flatten(start_dim=1)

    # class_layer: Linear -> ReLU -> Linear -> Softmax(dim=1)
    h = jnp.dot(final, w1_ref[...], preferred_element_type=jnp.float32) + b1_ref[...]
    h = jnp.maximum(h, 0.0)
    z = jnp.dot(h, w2_ref[...], preferred_element_type=jnp.float32) + b2_ref[...]
    z = z - jnp.max(z, axis=-1, keepdims=True)
    e = jnp.exp(z)
    o_ref[...] = e / jnp.sum(e, axis=-1, keepdims=True)


# ----------------------------- wrappers (staging + pallas_call) -----------------------------

def _flat_convblock_params(p):
    ws = [p["in"]["w"], p["in"]["b"]]
    for blk in p["blocks"]:
        ws += [blk["c1"]["w"], blk["c1"]["b"], blk["c2"]["w"], blk["c2"]["b"]]
    return ws


def modality_convblocks(xs, mod_params, conv_len, interval_num):
    """All per-modality ConvBlocks in ONE pallas_call (grid over modalities, parallel).

    xs         : list of (B, Cin_m, I, S) arrays (PyTorch b,c,i,s layout)
    mod_params : matching list of ConvBlock param pytrees
    returns    : (M, B*interval_num, Cout) features (rows batch-major)
    """
    B, _, I, S = (int(d) for d in xs[0].shape)
    M = len(xs)
    k = int(conv_len)
    cout = int(mod_params[0]["in"]["w"].shape[-1])
    n_blocks = len(mod_params[0]["blocks"])
    cin_max = max(int(x.shape[1]) for x in xs)
    N = B * I
    group = I // interval_num

    # One-time staging: channels-last, modality-stacked, Cin zero-padded to a common
    # width (zero input channels contribute nothing to the conv).
    x_list, w_lists = [], None
    for x, p in zip(xs, mod_params):
        cin = int(x.shape[1])
        h = jnp.transpose(x, (0, 2, 3, 1)).reshape(N, S, cin)
        if cin < cin_max:
            h = jnp.pad(h, ((0, 0), (0, 0), (0, cin_max - cin)))
        x_list.append(h)
        ws = _flat_convblock_params(p)
        if int(ws[0].shape[1]) < cin_max:
            ws[0] = jnp.pad(ws[0], ((0, 0), (0, cin_max - int(ws[0].shape[1])), (0, 0)))
        if w_lists is None:
            w_lists = [[w] for w in ws]
        else:
            for lst, w in zip(w_lists, ws):
                lst.append(w)
    x_stk = jnp.stack(x_list)                       # (M, N, S, cin_max)
    w_stk = [jnp.stack(lst) for lst in w_lists]     # each (M, ...)

    def spec_for(a):
        rest = tuple(int(d) for d in a.shape[1:])
        return pl.BlockSpec((None,) + rest,
                            lambda mi, _r=len(rest): (mi,) + (0,) * _r)

    kernel = functools.partial(
        _mod_convblock_kernel, k=k, s=S, n=N, cin=cin_max, cout=cout,
        n_blocks=n_blocks, b=B, interval_num=interval_num, group=group)

    grid_spec = pltpu.PrefetchScalarGridSpec(
        num_scalar_prefetch=0,
        grid=(M,),
        in_specs=[spec_for(x_stk)] + [spec_for(w) for w in w_stk],
        out_specs=pl.BlockSpec((None, B * interval_num, cout), lambda mi: (mi, 0, 0)),
        scratch_shapes=[pltpu.VMEM((N, S + k - 1, cin_max), jnp.float32),
                        pltpu.VMEM((N, S + k - 1, cout), jnp.float32)],
    )
    return pl.pallas_call(
        kernel,
        out_shape=jax.ShapeDtypeStruct((M, B * interval_num, cout), jnp.float32),
        grid_spec=grid_spec,
        compiler_params=pltpu.CompilerParams(
            dimension_semantics=("parallel",),      # one modality per TensorCore on v7x
            vmem_limit_bytes=_VMEM_LIMIT),
    )(x_stk, *w_stk)


def classification_tail(feats, loc_p, head_p, conv_len, batch, num_classes):
    """MeanFusion + loc ConvBlock + flatten + MLP head + softmax in one pallas_call."""
    M, N, S = (int(d) for d in feats.shape)         # N = batch * interval_num_mod
    k = int(conv_len)
    cout = int(loc_p["in"]["w"].shape[-1])
    n_blocks = len(loc_p["blocks"])
    group = N // batch                              # loc ConvBlock has interval_num = 1

    # previous channel axis becomes the loc-block spectrum axis; Cin = 1
    x = feats.reshape(M, N, S, 1)
    ws = _flat_convblock_params(loc_p)
    head = [head_p["w1"], head_p["b1"], head_p["w2"], head_p["b2"]]
    inputs = [x] + ws + head

    kernel = functools.partial(
        _tail_kernel, m=M, k=k, s=S, n=N, cout=cout, n_blocks=n_blocks,
        b=batch, group=group)

    return pl.pallas_call(
        kernel,
        out_shape=jax.ShapeDtypeStruct((batch, num_classes), jnp.float32),
        in_specs=[_vmem() for _ in inputs],
        out_specs=_vmem(),
        scratch_shapes=[pltpu.VMEM((N, S + k - 1, 1), jnp.float32),
                        pltpu.VMEM((N, S + k - 1, cout), jnp.float32)],
        compiler_params=pltpu.CompilerParams(vmem_limit_bytes=_VMEM_LIMIT),
    )(*inputs)


def resnet_forward(x, params, cfg):
    loc = LOCATIONS[0]                              # single location -> no loc fusion stage
    mods = LOC_MODALITIES[loc]
    xs = [x[loc][mod] for mod in mods]
    mod_ps = [params["loc_mod"][loc][mod] for mod in mods]

    # (1) per-modality ConvBlocks (== the torch.stack(..., dim=3) features)
    feats = modality_convblocks(xs, mod_ps, cfg["loc_mod_conv_lens"], cfg["interval_num"])

    # TODO(synk): miss_simulator (external) treated as identity; handler_loss = 0.
    # (2) MeanFusion + loc ConvBlock + flatten + class_layer
    B = int(xs[0].shape[0])
    logits = classification_forward_tail = classification_tail(
        feats, params["loc_ext"][loc], params["head"], cfg["loc_conv_lens"],
        B, cfg["num_classes"])
    handler_loss = jnp.float32(0.0)
    return logits, handler_loss


# ----------------------------- deterministic parameter init -----------------------------

def init_conv_block(key, in_ch, out_ch, conv_len, num_inter_layers):
    def conv_p(k, cin, cout):
        w = jax.random.normal(k, (conv_len, cin, cout), jnp.float32) / math.sqrt(cin * conv_len)
        return {"w": w, "b": jnp.zeros((1, cout), jnp.float32)}

    keys = jax.random.split(key, 1 + 2 * num_inter_layers)
    return {
        "in": conv_p(keys[0], in_ch, out_ch),
        "blocks": [{"c1": conv_p(keys[1 + 2 * i], out_ch, out_ch),
                    "c2": conv_p(keys[2 + 2 * i], out_ch, out_ch)}
                   for i in range(num_inter_layers)],
    }


def init_mlp(key, in_dim, fc_dim, num_classes):
    k1, k2 = jax.random.split(key)
    return {
        "w1": jax.random.normal(k1, (in_dim, fc_dim), jnp.float32) / math.sqrt(in_dim),
        "b1": jnp.zeros((1, fc_dim), jnp.float32),
        "w2": jax.random.normal(k2, (fc_dim, num_classes), jnp.float32) / math.sqrt(fc_dim),
        "b2": jnp.zeros((1, num_classes), jnp.float32),
    }


def init_resnet(key, cfg):
    k_lm, k_le, k_head = jax.random.split(key, 3)
    loc_mod = {}
    mod_keys = iter(jax.random.split(k_lm, sum(len(LOC_MODALITIES[l]) for l in LOCATIONS)))
    for loc in LOCATIONS:
        loc_mod[loc] = {}
        for mod in LOC_MODALITIES[loc]:
            loc_mod[loc][mod] = init_conv_block(
                next(mod_keys),
                cfg["loc_mod_in_channels"][loc][mod],
                cfg["loc_mod_out_channels"],
                cfg["loc_mod_conv_lens"],
                cfg["loc_mod_conv_inter_layers"])
    loc_ext = {
        loc: init_conv_block(k, 1, cfg["loc_out_channels"],
                             cfg["loc_conv_lens"], cfg["loc_conv_inter_layers"])
        for loc, k in zip(LOCATIONS, jax.random.split(k_le, len(LOCATIONS)))
    }
    head = init_mlp(k_head, cfg["loc_out_channels"], cfg["fc_dim"], cfg["num_classes"])
    return {"loc_mod": loc_mod, "loc_ext": loc_ext, "head": head}


# ----------------------------- main -----------------------------

if __name__ == "__main__":
    cfg = {
        "loc_mod_in_channels": {"shake": {"audio": 2, "seismic": 1}},
        "loc_mod_spectrum_len": {"shake": {"audio": 16, "seismic": 16}},
        "loc_mod_out_channels": 32,
        "loc_mod_conv_lens": 3,           # int -> in_stride = 1
        "loc_mod_conv_inter_layers": 2,
        "interval_num": 8,
        "loc_out_channels": 32,
        "loc_conv_lens": 3,
        "loc_conv_inter_layers": 2,
        "fc_dim": 32,
        "num_classes": 5,
        "dropout_ratio": 0.0,             # eval mode: dropout is a no-op
    }

    key = jax.random.PRNGKey(0)
    k_params, k_audio, k_seismic = jax.random.split(key, 3)

    B = 2
    x = {"shake": {
        "audio":   jax.random.normal(k_audio,   (B, 2, cfg["interval_num"], 16), jnp.float32),
        "seismic": jax.random.normal(k_seismic, (B, 1, cfg["interval_num"], 16), jnp.float32),
    }}

    params = init_resnet(k_params, cfg)

    logits, handler_loss = resnet_forward(x, params, cfg)
    logits = jax.block_until_ready(logits)
    handler_loss = jax.block_until_ready(handler_loss)

    assert logits.shape == (B, cfg["num_classes"])
    assert bool(jnp.all(jnp.isfinite(logits)))
    print("KERNEL_OK")
</pallas_src>

<mosaic_0001>
module attributes {stable_mosaic.version = 11 : i64} {
  func.func @_mod_convblock_kernel(%arg0: i32, %arg1: memref<1x16x16x2xf32, #tpu.memory_space<vmem>>, %arg2: memref<1x3x2x32xf32, #tpu.memory_space<vmem>>, %arg3: memref<1x1x32xf32, #tpu.memory_space<vmem>>, %arg4: memref<1x3x32x32xf32, #tpu.memory_space<vmem>>, %arg5: memref<1x1x32xf32, #tpu.memory_space<vmem>>, %arg6: memref<1x3x32x32xf32, #tpu.memory_space<vmem>>, %arg7: memref<1x1x32xf32, #tpu.memory_space<vmem>>, %arg8: memref<1x3x32x32xf32, #tpu.memory_space<vmem>>, %arg9: memref<1x1x32xf32, #tpu.memory_space<vmem>>, %arg10: memref<1x3x32x32xf32, #tpu.memory_space<vmem>>, %arg11: memref<1x1x32xf32, #tpu.memory_space<vmem>>, %arg12: memref<1x16x32xf32, #tpu.memory_space<vmem>>, %arg13: memref<16x18x2xf32, #tpu.memory_space<vmem>>, %arg14: memref<16x18x32xf32, #tpu.memory_space<vmem>>) attributes {dimension_semantics = [#tpu.dimension_semantics<parallel>], iteration_bounds = array<i64: 2>, scalar_prefetch = 0 : i64, scratch_operands = 2 : i64, tpu.core_type = #tpu.core_type<tc>, window_params = [{transform_indices = @transform_0, window_bounds = array<i64: 1, 16, 16, 2>}, {transform_indices = @transform_1, window_bounds = array<i64: 1, 3, 2, 32>}, {transform_indices = @transform_2, window_bounds = array<i64: 1, 1, 32>}, {transform_indices = @transform_3, window_bounds = array<i64: 1, 3, 32, 32>}, {transform_indices = @transform_4, window_bounds = array<i64: 1, 1, 32>}, {transform_indices = @transform_5, window_bounds = array<i64: 1, 3, 32, 32>}, {transform_indices = @transform_6, window_bounds = array<i64: 1, 1, 32>}, {transform_indices = @transform_7, window_bounds = array<i64: 1, 3, 32, 32>}, {transform_indices = @transform_8, window_bounds = array<i64: 1, 1, 32>}, {transform_indices = @transform_9, window_bounds = array<i64: 1, 3, 32, 32>}, {transform_indices = @transform_10, window_bounds = array<i64: 1, 1, 32>}, {transform_indices = @transform_11, window_bounds = array<i64: 1, 16, 32>}]} {
    %c0 = arith.constant 0 : index
    %c0_0 = arith.constant 0 : index
    %c0_1 = arith.constant 0 : index
    %c0_2 = arith.constant 0 : index
    %0 = vector.load %arg1[%c0, %c0_0, %c0_1, %c0_2] : memref<1x16x16x2xf32, #tpu.memory_space<vmem>>, vector<1x16x16x2xf32>
    %1 = vector.shape_cast %0 : vector<1x16x16x2xf32> to vector<16x16x2xf32>
    %cst = arith.constant 0.000000e+00 : f32
    %2 = vector.broadcast %cst : f32 to vector<16x18x2xf32>
    %c0_3 = arith.constant 0 : index
    %c0_4 = arith.constant 0 : index
    %c0_5 = arith.constant 0 : index
    %3 = vector.load %arg13[%c0_3, %c0_4, %c0_5] : memref<16x18x2xf32, #tpu.memory_space<vmem>>, vector<16x18x2xf32>
    tpu.vector_store %arg13[%c0_3, %c0_4, %c0_5], %2 {strides = array<i32>} : memref<16x18x2xf32, #tpu.memory_space<vmem>>, vector<16x18x2xf32>,
    %cst_6 = arith.constant 0.000000e+00 : f32
    %4 = vector.broadcast %cst_6 : f32 to vector<16x18x32xf32>
    %c0_7 = arith.constant 0 : index
    %c0_8 = arith.constant 0 : index
    %c0_9 = arith.constant 0 : index
    %5 = vector.load %arg14[%c0_7, %c0_8, %c0_9] : memref<16x18x32xf32, #tpu.memory_space<vmem>>, vector<16x18x32xf32>
    tpu.vector_store %arg14[%c0_7, %c0_8, %c0_9], %4 {strides = array<i32>} : memref<16x18x32xf32, #tpu.memory_space<vmem>>, vector<16x18x32xf32>,
    %c0_10 = arith.constant 0 : index
    %c1 = arith.constant 1 : index
    %c0_11 = arith.constant 0 : index
    %6 = vector.load %arg13[%c0_10, %c1, %c0_11] : memref<16x18x2xf32, #tpu.memory_space<vmem>>, vector<16x16x2xf32>
    tpu.vector_store %arg13[%c0_10, %c1, %c0_11], %1 {strides = array<i32>} : memref<16x18x2xf32, #tpu.memory_space<vmem>>, vector<16x16x2xf32>,
    %c0_12 = arith.constant 0 : index
    %c0_13 = arith.constant 0 : index
    %c0_14 = arith.constant 0 : index
    %7 = vector.load %arg13[%c0_12, %c0_13, %c0_14] : memref<16x18x2xf32, #tpu.memory_space<vmem>>, vector<16x16x2xf32>
    %8 = vector.shape_cast %7 : vector<16x16x2xf32> to vector<256x2xf32>
    %c0_15 = arith.constant 0 : index
    %c0_16 = arith.constant 0 : index
    %c0_17 = arith.constant 0 : index
    %c0_18 = arith.constant 0 : index
    %9 = vector.load %arg2[%c0_15, %c0_16, %c0_17, %c0_18] : memref<1x3x2x32xf32, #tpu.memory_space<vmem>>, vector<1x1x2x32xf32>
    %10 = vector.shape_cast %9 : vector<1x1x2x32xf32> to vector<2x32xf32>
    %cst_19 = arith.constant dense<0.000000e+00> : vector<256x32xf32>
    %11 = tpu.matmul %8, %10, %cst_19 {dimension_numbers = #tpu.dot_dimension_numbers<[1], [0], [0], [1], [0, 0, 1, 1], [], []>} : vector<256x2xf32>, vector<2x32xf32>, vector<256x32xf32> -> vector<256x32xf32>
    %c0_20 = arith.constant 0 : index
    %c1_21 = arith.constant 1 : index
    %c0_22 = arith.constant 0 : index
    %12 = vector.load %arg13[%c0_20, %c1_21, %c0_22] : memref<16x18x2xf32, #tpu.memory_space<vmem>>, vector<16x16x2xf32>
    %13 = vector.shape_cast %12 : vector<16x16x2xf32> to vector<256x2xf32>
    %c0_23 = arith.constant 0 : index
    %c1_24 = arith.constant 1 : index
    %c0_25 = arith.constant 0 : index
    %c0_26 = arith.constant 0 : index
    %14 = vector.load %arg2[%c0_23, %c1_24, %c0_25, %c0_26] : memref<1x3x2x32xf32, #tpu.memory_space<vmem>>, vector<1x1x2x32xf32>
    %15 = vector.shape_cast %14 : vector<1x1x2x32xf32> to vector<2x32xf32>
    %cst_27 = arith.constant dense<0.000000e+00> : vector<256x32xf32>
    %16 = tpu.matmul %13, %15, %cst_27 {dimension_numbers = #tpu.dot_dimension_numbers<[1], [0], [0], [1], [0, 0, 1, 1], [], []>} : vector<256x2xf32>, vector<2x32xf32>, vector<256x32xf32> -> vector<256x32xf32>
    %17 = arith.addf %11, %16 : vector<256x32xf32>
    %c0_28 = arith.constant 0 : index
    %c2 = arith.constant 2 : index
    %c0_29 = arith.constant 0 : index
    %18 = vector.load %arg13[%c0_28, %c2, %c0_29] : memref<16x18x2xf32, #tpu.memory_space<vmem>>, vector<16x16x2xf32>
    %19 = vector.shape_cast %18 : vector<16x16x2xf32> to vector<256x2xf32>
    %c0_30 = arith.constant 0 : index
    %c2_31 = arith.constant 2 : index
    %c0_32 = arith.constant 0 : index
    %c0_33 = arith.constant 0 : index
    %20 = vector.load %arg2[%c0_30, %c2_31, %c0_32, %c0_33] : memref<1x3x2x32xf32, #tpu.memory_space<vmem>>, vector<1x1x2x32xf32>
    %21 = vector.shape_cast %20 : vector<1x1x2x32xf32> to vector<2x32xf32>
    %cst_34 = arith.constant dense<0.000000e+00> : vector<256x32xf32>
    %22 = tpu.matmul %19, %21, %cst_34 {dimension_numbers = #tpu.dot_dimension_numbers<[1], [0], [0], [1], [0, 0, 1, 1], [], []>} : vector<256x2xf32>, vector<2x32xf32>, vector<256x32xf32> -> vector<256x32xf32>
    %23 = arith.addf %17, %22 : vector<256x32xf32>
    %c0_35 = arith.constant 0 : index
    %c0_36 = arith.constant 0 : index
    %c0_37 = arith.constant 0 : index
    %24 = vector.load %arg3[%c0_35, %c0_36, %c0_37] : memref<1x1x32xf32, #tpu.memory_space<vmem>>, vector<1x1x32xf32>
    %25 = vector.shape_cast %24 : vector<1x1x32xf32> to vector<1x32xf32>
    %26 = vector.broadcast %25 : vector<1x32xf32> to vector<256x32xf32>
    %27 = arith.addf %23, %26 : vector<256x32xf32>
    %cst_38 = arith.constant 0.000000e+00 : f32
    %28 = vector.broadcast %cst_38 : f32 to vector<256x32xf32>
    %29 = arith.maximumf %27, %28 : vector<256x32xf32>
    %30 = vector.shape_cast %29 : vector<256x32xf32> to vector<16x16x32xf32>
    %c0_39 = arith.constant 0 : index
    %c1_40 = arith.constant 1 : index
    %c0_41 = arith.constant 0 : index
    %31 = vector.load %arg14[%c0_39, %c1_40, %c0_41] : memref<16x18x32xf32, #tpu.memory_space<vmem>>, vector<16x16x32xf32>
    tpu.vector_store %arg14[%c0_39, %c1_40, %c0_41], %30 {strides = array<i32>} : memref<16x18x32xf32, #tpu.memory_space<vmem>>, vector<16x16x32xf32>,
    %c0_42 = arith.constant 0 : index
    %c0_43 = arith.constant 0 : index
    %c0_44 = arith.constant 0 : index
    %32 = vector.load %arg14[%c0_42, %c0_43, %c0_44] : memref<16x18x32xf32, #tpu.memory_space<vmem>>, vector<16x16x32xf32>
    %33 = vector.shape_cast %32 : vector<16x16x32xf32> to vector<256x32xf32>
    %c0_45 = arith.constant 0 : index
    %c0_46 = arith.constant 0 : index
    %c0_47 = arith.constant 0 : index
    %c0_48 = arith.constant 0 : index
    %34 = vector.load %arg4[%c0_45, %c0_46, %c0_47, %c0_48] : memref<1x3x32x32xf32, #tpu.memory_space<vmem>>, vector<1x1x32x32xf32>
    %35 = vector.shape_cast %34 : vector<1x1x32x32xf32> to vector<32x32xf32>
    %cst_49 = arith.constant dense<0.000000e+00> : vector<256x32xf32>
    %36 = tpu.matmul %33, %35, %cst_49 {dimension_numbers = #tpu.dot_dimension_numbers<[1], [0], [0], [1], [0, 0, 1, 1], [], []>} : vector<256x32xf32>, vector<32x32xf32>, vector<256x32xf32> -> vector<256x32xf32>
    %c0_50 = arith.constant 0 : index
    %c1_51 = arith.constant 1 : index
    %c0_52 = arith.constant 0 : index
    %37 = vector.load %arg14[%c0_50, %c1_51, %c0_52] : memref<16x18x32xf32, #tpu.memory_space<vmem>>, vector<16x16x32xf32>
    %38 = vector.shape_cast %37 : vector<16x16x32xf32> to vector<256x32xf32>
    %c0_53 = arith.constant 0 : index
    %c1_54 = arith.constant 1 : index
    %c0_55 = arith.constant 0 : index
    %c0_56 = arith.constant 0 : index
    %39 = vector.load %arg4[%c0_53, %c1_54, %c0_55, %c0_56] : memref<1x3x32x32xf32, #tpu.memory_space<vmem>>, vector<1x1x32x32xf32>
    %40 = vector.shape_cast %39 : vector<1x1x32x32xf32> to vector<32x32xf32>
    %cst_57 = arith.constant dense<0.000000e+00> : vector<256x32xf32>
    %41 = tpu.matmul %38, %40, %cst_57 {dimension_numbers = #tpu.dot_dimension_numbers<[1], [0], [0], [1], [0, 0, 1, 1], [], []>} : vector<256x32xf32>, vector<32x32xf32>, vector<256x32xf32> -> vector<256x32xf32>
    %42 = arith.addf %36, %41 : vector<256x32xf32>
    %c0_58 = arith.constant 0 : index
    %c2_59 = arith.constant 2 : index
    %c0_60 = arith.constant 0 : index
    %43 = vector.load %arg14[%c0_58, %c2_59, %c0_60] : memref<16x18x32xf32, #tpu.memory_space<vmem>>, vector<16x16x32xf32>
    %44 = vector.shape_cast %43 : vector<16x16x32xf32> to vector<256x32xf32>
    %c0_61 = arith.constant 0 : index
    %c2_62 = arith.constant 2 : index
    %c0_63 = arith.constant 0 : index
    %c0_64 = arith.constant 0 : index
    %45 = vector.load %arg4[%c0_61, %c2_62, %c0_63, %c0_64] : memref<1x3x32x32xf32, #tpu.memory_space<vmem>>, vector<1x1x32x32xf32>
    %46 = vector.shape_cast %45 : vector<1x1x32x32xf32> to vector<32x32xf32>
    %cst_65 = arith.constant dense<0.000000e+00> : vector<256x32xf32>
    %47 = tpu.matmul %44, %46, %cst_65 {dimension_numbers = #tpu.dot_dimension_numbers<[1], [0], [0], [1], [0, 0, 1, 1], [], []>} : vector<256x32xf32>, vector<32x32xf32>, vector<256x32xf32> -> vector<256x32xf32>
    %48 = arith.addf %42, %47 : vector<256x32xf32>
    %c0_66 = arith.constant 0 : index
    %c0_67 = arith.constant 0 : index
    %c0_68 = arith.constant 0 : index
    %49 = vector.load %arg5[%c0_66, %c0_67, %c0_68] : memref<1x1x32xf32, #tpu.memory_space<vmem>>, vector<1x1x32xf32>
    %50 = vector.shape_cast %49 : vector<1x1x32xf32> to vector<1x32xf32>
    %51 = vector.broadcast %50 : vector<1x32xf32> to vector<256x32xf32>
    %52 = arith.addf %48, %51 : vector<256x32xf32>
    %cst_69 = arith.constant 0.000000e+00 : f32
    %53 = vector.broadcast %cst_69 : f32 to vector<256x32xf32>
    %54 = arith.maximumf %52, %53 : vector<256x32xf32>
    %55 = vector.shape_cast %54 : vector<256x32xf32> to vector<16x16x32xf32>
    %c0_70 = arith.constant 0 : index
    %c1_71 = arith.constant 1 : index
    %c0_72 = arith.constant 0 : index
    %56 = vector.load %arg14[%c0_70, %c1_71, %c0_72] : memref<16x18x32xf32, #tpu.memory_space<vmem>>, vector<16x16x32xf32>
    tpu.vector_store %arg14[%c0_70, %c1_71, %c0_72], %55 {strides = array<i32>} : memref<16x18x32xf32, #tpu.memory_space<vmem>>, vector<16x16x32xf32>,
    %c0_73 = arith.constant 0 : index
    %c0_74 = arith.constant 0 : index
    %c0_75 = arith.constant 0 : index
    %57 = vector.load %arg14[%c0_73, %c0_74, %c0_75] : memref<16x18x32xf32, #tpu.memory_space<vmem>>, vector<16x16x32xf32>
    %58 = vector.shape_cast %57 : vector<16x16x32xf32> to vector<256x32xf32>
    %c0_76 = arith.constant 0 : index
    %c0_77 = arith.constant 0 : index
    %c0_78 = arith.constant 0 : index
    %c0_79 = arith.constant 0 : index
    %59 = vector.load %arg6[%c0_76, %c0_77, %c0_78, %c0_79] : memref<1x3x32x32xf32, #tpu.memory_space<vmem>>, vector<1x1x32x32xf32>
    %60 = vector.shape_cast %59 : vector<1x1x32x32xf32> to vector<32x32xf32>
    %cst_80 = arith.constant dense<0.000000e+00> : vector<256x32xf32>
    %61 = tpu.matmul %58, %60, %cst_80 {dimension_numbers = #tpu.dot_dimension_numbers<[1], [0], [0], [1], [0, 0, 1, 1], [], []>} : vector<256x32xf32>, vector<32x32xf32>, vector<256x32xf32> -> vector<256x32xf32>
    %c0_81 = arith.constant 0 : index
    %c1_82 = arith.constant 1 : index
    %c0_83 = arith.constant 0 : index
    %62 = vector.load %arg14[%c0_81, %c1_82, %c0_83] : memref<16x18x32xf32, #tpu.memory_space<vmem>>, vector<16x16x32xf32>
    %63 = vector.shape_cast %62 : vector<16x16x32xf32> to vector<256x32xf32>
    %c0_84 = arith.constant 0 : index
    %c1_85 = arith.constant 1 : index
    %c0_86 = arith.constant 0 : index
    %c0_87 = arith.constant 0 : index
    %64 = vector.load %arg6[%c0_84, %c1_85, %c0_86, %c0_87] : memref<1x3x32x32xf32, #tpu.memory_space<vmem>>, vector<1x1x32x32xf32>
    %65 = vector.shape_cast %64 : vector<1x1x32x32xf32> to vector<32x32xf32>
    %cst_88 = arith.constant dense<0.000000e+00> : vector<256x32xf32>
    %66 = tpu.matmul %63, %65, %cst_88 {dimension_numbers = #tpu.dot_dimension_numbers<[1], [0], [0], [1], [0, 0, 1, 1], [], []>} : vector<256x32xf32>, vector<32x32xf32>, vector<256x32xf32> -> vector<256x32xf32>
    %67 = arith.addf %61, %66 : vector<256x32xf32>
    %c0_89 = arith.constant 0 : index
    %c2_90 = arith.constant 2 : index
    %c0_91 = arith.constant 0 : index
    %68 = vector.load %arg14[%c0_89, %c2_90, %c0_91] : memref<16x18x32xf32, #tpu.memory_space<vmem>>, vector<16x16x32xf32>
    %69 = vector.shape_cast %68 : vector<16x16x32xf32> to vector<256x32xf32>
    %c0_92 = arith.constant 0 : index
    %c2_93 = arith.constant 2 : index
    %c0_94 = arith.constant 0 : index
    %c0_95 = arith.constant 0 : index
    %70 = vector.load %arg6[%c0_92, %c2_93, %c0_94, %c0_95] : memref<1x3x32x32xf32, #tpu.memory_space<vmem>>, vector<1x1x32x32xf32>
    %71 = vector.shape_cast %70 : vector<1x1x32x32xf32> to vector<32x32xf32>
    %cst_96 = arith.constant dense<0.000000e+00> : vector<256x32xf32>
    %72 = tpu.matmul %69, %71, %cst_96 {dimension_numbers = #tpu.dot_dimension_numbers<[1], [0], [0], [1], [0, 0, 1, 1], [], []>} : vector<256x32xf32>, vector<32x32xf32>, vector<256x32xf32> -> vector<256x32xf32>
    %73 = arith.addf %67, %72 : vector<256x32xf32>
    %c0_97 = arith.constant 0 : index
    %c0_98 = arith.constant 0 : index
    %c0_99 = arith.constant 0 : index
    %74 = vector.load %arg7[%c0_97, %c0_98, %c0_99] : memref<1x1x32xf32, #tpu.memory_space<vmem>>, vector<1x1x32xf32>
    %75 = vector.shape_cast %74 : vector<1x1x32xf32> to vector<1x32xf32>
    %76 = vector.broadcast %75 : vector<1x32xf32> to vector<256x32xf32>
    %77 = arith.addf %73, %76 : vector<256x32xf32>
    %78 = arith.addf %77, %29 : vector<256x32xf32>
    %cst_100 = arith.constant 0.000000e+00 : f32
    %79 = vector.broadcast %cst_100 : f32 to vector<256x32xf32>
    %80 = arith.maximumf %78, %79 : vector<256x32xf32>
    %81 = vector.shape_cast %80 : vector<256x32xf32> to vector<16x16x32xf32>
    %c0_101 = arith.constant 0 : index
    %c1_102 = arith.constant 1 : index
    %c0_103 = arith.constant 0 : index
    %82 = vector.load %arg14[%c0_101, %c1_102, %c0_103] : memref<16x18x32xf32, #tpu.memory_space<vmem>>, vector<16x16x32xf32>
    tpu.vector_store %arg14[%c0_101, %c1_102, %c0_103], %81 {strides = array<i32>} : memref<16x18x32xf32, #tpu.memory_space<vmem>>, vector<16x16x32xf32>,
    %c0_104 = arith.constant 0 : index
    %c0_105 = arith.constant 0 : index
    %c0_106 = arith.constant 0 : index
    %83 = vector.load %arg14[%c0_104, %c0_105, %c0_106] : memref<16x18x32xf32, #tpu.memory_space<vmem>>, vector<16x16x32xf32>
    %84 = vector.shape_cast %83 : vector<16x16x32xf32> to vector<256x32xf32>
    %c0_107 = arith.constant 0 : index
    %c0_108 = arith.constant 0 : index
    %c0_109 = arith.constant 0 : index
    %c0_110 = arith.constant 0 : index
    %85 = vector.load %arg8[%c0_107, %c0_108, %c0_109, %c0_110] : memref<1x3x32x32xf32, #tpu.memory_space<vmem>>, vector<1x1x32x32xf32>
    %86 = vector.shape_cast %85 : vector<1x1x32x32xf32> to vector<32x32xf32>
    %cst_111 = arith.constant dense<0.000000e+00> : vector<256x32xf32>
    %87 = tpu.matmul %84, %86, %cst_111 {dimension_numbers = #tpu.dot_dimension_numbers<[1], [0], [0], [1], [0, 0, 1, 1], [], []>} : vector<256x32xf32>, vector<32x32xf32>, vector<256x32xf32> -> vector<256x32xf32>
    %c0_112 = arith.constant 0 : index
    %c1_113 = arith.constant 1 : index
    %c0_114 = arith.constant 0 : index
    %88 = vector.load %arg14[%c0_112, %c1_113, %c0_114] : memref<16x18x32xf32, #tpu.memory_space<vmem>>, vector<16x16x32xf32>
    %89 = vector.shape_cast %88 : vector<16x16x32xf32> to vector<256x32xf32>
    %c0_115 = arith.constant 0 : index
    %c1_116 = arith.constant 1 : index
    %c0_117 = arith.constant 0 : index
    %c0_118 = arith.constant 0 : index
    %90 = vector.load %arg8[%c0_115, %c1_116, %c0_117, %c0_118] : memref<1x3x32x32xf32, #tpu.memory_space<vmem>>, vector<1x1x32x32xf32>
    %91 = vector.shape_cast %90 : vector<1x1x32x32xf32> to vector<32x32xf32>
    %cst_119 = arith.constant dense<0.000000e+00> : vector<256x32xf32>
    %92 = tpu.matmul %89, %91, %cst_119 {dimension_numbers = #tpu.dot_dimension_numbers<[1], [0], [0], [1], [0, 0, 1, 1], [], []>} : vector<256x32xf32>, vector<32x32xf32>, vector<256x32xf32> -> vector<256x32xf32>
    %93 = arith.addf %87, %92 : vector<256x32xf32>
    %c0_120 = arith.constant 0 : index
    %c2_121 = arith.constant 2 : index
    %c0_122 = arith.constant 0 : index
    %94 = vector.load %arg14[%c0_120, %c2_121, %c0_122] : memref<16x18x32xf32, #tpu.memory_space<vmem>>, vector<16x16x32xf32>
    %95 = vector.shape_cast %94 : vector<16x16x32xf32> to vector<256x32xf32>
    %c0_123 = arith.constant 0 : index
    %c2_124 = arith.constant 2 : index
    %c0_125 = arith.constant 0 : index
    %c0_126 = arith.constant 0 : index
    %96 = vector.load %arg8[%c0_123, %c2_124, %c0_125, %c0_126] : memref<1x3x32x32xf32, #tpu.memory_space<vmem>>, vector<1x1x32x32xf32>
    %97 = vector.shape_cast %96 : vector<1x1x32x32xf32> to vector<32x32xf32>
    %cst_127 = arith.constant dense<0.000000e+00> : vector<256x32xf32>
    %98 = tpu.matmul %95, %97, %cst_127 {dimension_numbers = #tpu.dot_dimension_numbers<[1], [0], [0], [1], [0, 0, 1, 1], [], []>} : vector<256x32xf32>, vector<32x32xf32>, vector<256x32xf32> -> vector<256x32xf32>
    %99 = arith.addf %93, %98 : vector<256x32xf32>
    %c0_128 = arith.constant 0 : index
    %c0_129 = arith.constant 0 : index
    %c0_130 = arith.constant 0 : index
    %100 = vector.load %arg9[%c0_128, %c0_129, %c0_130] : memref<1x1x32xf32, #tpu.memory_space<vmem>>, vector<1x1x32xf32>
    %101 = vector.shape_cast %100 : vector<1x1x32xf32> to vector<1x32xf32>
    %102 = vector.broadcast %101 : vector<1x32xf32> to vector<256x32xf32>
    %103 = arith.addf %99, %102 : vector<256x32xf32>
    %cst_131 = arith.constant 0.000000e+00 : f32
    %104 = vector.broadcast %cst_131 : f32 to vector<256x32xf32>
    %105 = arith.maximumf %103, %104 : vector<256x32xf32>
    %106 = vector.shape_cast %105 : vector<256x32xf32> to vector<16x16x32xf32>
    %c0_132 = arith.constant 0 : index
    %c1_133 = arith.constant 1 : index
    %c0_134 = arith.constant 0 : index
    %107 = vector.load %arg14[%c0_132, %c1_133, %c0_134] : memref<16x18x32xf32, #tpu.memory_space<vmem>>, vector<16x16x32xf32>
    tpu.vector_store %arg14[%c0_132, %c1_133, %c0_134], %106 {strides = array<i32>} : memref<16x18x32xf32, #tpu.memory_space<vmem>>, vector<16x16x32xf32>,
    %c0_135 = arith.constant 0 : index
    %c0_136 = arith.constant 0 : index
    %c0_137 = arith.constant 0 : index
    %108 = vector.load %arg14[%c0_135, %c0_136, %c0_137] : memref<16x18x32xf32, #tpu.memory_space<vmem>>, vector<16x16x32xf32>
    %109 = vector.shape_cast %108 : vector<16x16x32xf32> to vector<256x32xf32>
    %c0_138 = arith.constant 0 : index
    %c0_139 = arith.constant 0 : index
    %c0_140 = arith.constant 0 : index
    %c0_141 = arith.constant 0 : index
    %110 = vector.load %arg10[%c0_138, %c0_139, %c0_140, %c0_141] : memref<1x3x32x32xf32, #tpu.memory_space<vmem>>, vector<1x1x32x32xf32>
    %111 = vector.shape_cast %110 : vector<1x1x32x32xf32> to vector<32x32xf32>
    %cst_142 = arith.constant dense<0.000000e+00> : vector<256x32xf32>
    %112 = tpu.matmul %109, %111, %cst_142 {dimension_numbers = #tpu.dot_dimension_numbers<[1], [0], [0], [1], [0, 0, 1, 1], [], []>} : vector<256x32xf32>, vector<32x32xf32>, vector<256x32xf32> -> vector<256x32xf32>
    %c0_143 = arith.constant 0 : index
    %c1_144 = arith.constant 1 : index
    %c0_145 = arith.constant 0 : index
    %113 = vector.load %arg14[%c0_143, %c1_144, %c0_145] : memref<16x18x32xf32, #tpu.memory_space<vmem>>, vector<16x16x32xf32>
    %114 = vector.shape_cast %113 : vector<16x16x32xf32> to vector<256x32xf32>
    %c0_146 = arith.constant 0 : index
    %c1_147 = arith.constant 1 : index
    %c0_148 = arith.constant 0 : index
    %c0_149 = arith.constant 0 : index
    %115 = vector.load %arg10[%c0_146, %c1_147, %c0_148, %c0_149] : memref<1x3x32x32xf32, #tpu.memory_space<vmem>>, vector<1x1x32x32xf32>
    %116 = vector.shape_cast %115 : vector<1x1x32x32xf32> to vector<32x32xf32>
    %cst_150 = arith.constant dense<0.000000e+00> : vector<256x32xf32>
    %117 = tpu.matmul %114, %116, %cst_150 {dimension_numbers = #tpu.dot_dimension_numbers<[1], [0], [0], [1], [0, 0, 1, 1], [], []>} : vector<256x32xf32>, vector<32x32xf32>, vector<256x32xf32> -> vector<256x32xf32>
    %118 = arith.addf %112, %117 : vector<256x32xf32>
    %c0_151 = arith.constant 0 : index
    %c2_152 = arith.constant 2 : index
    %c0_153 = arith.constant 0 : index
    %119 = vector.load %arg14[%c0_151, %c2_152, %c0_153] : memref<16x18x32xf32, #tpu.memory_space<vmem>>, vector<16x16x32xf32>
    %120 = vector.shape_cast %119 : vector<16x16x32xf32> to vector<256x32xf32>
    %c0_154 = arith.constant 0 : index
    %c2_155 = arith.constant 2 : index
    %c0_156 = arith.constant 0 : index
    %c0_157 = arith.constant 0 : index
    %121 = vector.load %arg10[%c0_154, %c2_155, %c0_156, %c0_157] : memref<1x3x32x32xf32, #tpu.memory_space<vmem>>, vector<1x1x32x32xf32>
    %122 = vector.shape_cast %121 : vector<1x1x32x32xf32> to vector<32x32xf32>
    %cst_158 = arith.constant dense<0.000000e+00> : vector<256x32xf32>
    %123 = tpu.matmul %120, %122, %cst_158 {dimension_numbers = #tpu.dot_dimension_numbers<[1], [0], [0], [1], [0, 0, 1, 1], [], []>} : vector<256x32xf32>, vector<32x32xf32>, vector<256x32xf32> -> vector<256x32xf32>
    %124 = arith.addf %118, %123 : vector<256x32xf32>
    %c0_159 = arith.constant 0 : index
    %c0_160 = arith.constant 0 : index
    %c0_161 = arith.constant 0 : index
    %125 = vector.load %arg11[%c0_159, %c0_160, %c0_161] : memref<1x1x32xf32, #tpu.memory_space<vmem>>, vector<1x1x32xf32>
    %126 = vector.shape_cast %125 : vector<1x1x32xf32> to vector<1x32xf32>
    %127 = vector.broadcast %126 : vector<1x32xf32> to vector<256x32xf32>
    %128 = arith.addf %124, %127 : vector<256x32xf32>
    %129 = arith.addf %128, %80 : vector<256x32xf32>
    %cst_162 = arith.constant 0.000000e+00 : f32
    %130 = vector.broadcast %cst_162 : f32 to vector<256x32xf32>
    %131 = arith.maximumf %129, %130 : vector<256x32xf32>
    %132 = vector.shape_cast %131 : vector<256x32xf32> to vector<16x16x32xf32>
    %cst_163 = arith.constant dense<0.000000e+00> : vector<16x32xf32>
    %133 = vector.multi_reduction <add>, %132, %cst_163 [1] : vector<16x16x32xf32> to vector<16x32xf32>
    %cst_164 = arith.constant 1.600000e+01 : f32
    %134 = vector.broadcast %cst_164 : f32 to vector<16x32xf32>
    %135 = arith.divf %133, %134 : vector<16x32xf32>
    %c0_165 = arith.constant 0 : index
    %c0_166 = arith.constant 0 : index
    %c0_167 = arith.constant 0 : index
    %136 = vector.load %arg12[%c0_165, %c0_166, %c0_167] : memref<1x16x32xf32, #tpu.memory_space<vmem>>, vector<1x16x32xf32>
    %137 = vector.shape_cast %136 : vector<1x16x32xf32> to vector<16x32xf32>
    %138 = vector.shape_cast %135 : vector<16x32xf32> to vector<1x16x32xf32>
    tpu.vector_store %arg12[%c0_165, %c0_166, %c0_167], %138 {strides = array<i32>} : memref<1x16x32xf32, #tpu.memory_space<vmem>>, vector<1x16x32xf32>,
    return
  }
  func.func @transform_0(%arg0: i32) -> (i32, i32, i32, i32) {
    %c0_i32 = arith.constant 0 : i32
    %c0_i32_0 = arith.constant 0 : i32
    %c0_i32_1 = arith.constant 0 : i32
    %c0_i32_2 = arith.constant 0 : i32
    return %arg0, %c0_i32, %c0_i32_0, %c0_i32_1 : i32, i32, i32, i32
  }
  func.func @transform_1(%arg0: i32) -> (i32, i32, i32, i32) {
    %c0_i32 = arith.constant 0 : i32
    %c0_i32_0 = arith.constant 0 : i32
    %c0_i32_1 = arith.constant 0 : i32
    %c0_i32_2 = arith.constant 0 : i32
    return %arg0, %c0_i32, %c0_i32_0, %c0_i32_1 : i32, i32, i32, i32
  }
  func.func @transform_2(%arg0: i32) -> (i32, i32, i32) {
    %c0_i32 = arith.constant 0 : i32
    %c0_i32_0 = arith.constant 0 : i32
    %c0_i32_1 = arith.constant 0 : i32
    return %arg0, %c0_i32, %c0_i32_0 : i32, i32, i32
  }
  func.func @transform_3(%arg0: i32) -> (i32, i32, i32, i32) {
    %c0_i32 = arith.constant 0 : i32
    %c0_i32_0 = arith.constant 0 : i32
    %c0_i32_1 = arith.constant 0 : i32
    %c0_i32_2 = arith.constant 0 : i32
    return %arg0, %c0_i32, %c0_i32_0, %c0_i32_1 : i32, i32, i32, i32
  }
  func.func @transform_4(%arg0: i32) -> (i32, i32, i32) {
    %c0_i32 = arith.constant 0 : i32
    %c0_i32_0 = arith.constant 0 : i32
    %c0_i32_1 = arith.constant 0 : i32
    return %arg0, %c0_i32, %c0_i32_0 : i32, i32, i32
  }
  func.func @transform_5(%arg0: i32) -> (i32, i32, i32, i32) {
    %c0_i32 = arith.constant 0 : i32
    %c0_i32_0 = arith.constant 0 : i32
    %c0_i32_1 = arith.constant 0 : i32
    %c0_i32_2 = arith.constant 0 : i32
    return %arg0, %c0_i32, %c0_i32_0, %c0_i32_1 : i32, i32, i32, i32
  }
  func.func @transform_6(%arg0: i32) -> (i32, i32, i32) {
    %c0_i32 = arith.constant 0 : i32
    %c0_i32_0 = arith.constant 0 : i32
    %c0_i32_1 = arith.constant 0 : i32
    return %arg0, %c0_i32, %c0_i32_0 : i32, i32, i32
  }
  func.func @transform_7(%arg0: i32) -> (i32, i32, i32, i32) {
    %c0_i32 = arith.constant 0 : i32
    %c0_i32_0 = arith.constant 0 : i32
    %c0_i32_1 = arith.constant 0 : i32
    %c0_i32_2 = arith.constant 0 : i32
    return %arg0, %c0_i32, %c0_i32_0, %c0_i32_1 : i32, i32, i32, i32
  }
  func.func @transform_8(%arg0: i32) -> (i32, i32, i32) {
    %c0_i32 = arith.constant 0 : i32
    %c0_i32_0 = arith.constant 0 : i32
    %c0_i32_1 = arith.constant 0 : i32
    return %arg0, %c0_i32, %c0_i32_0 : i32, i32, i32
  }
  func.func @transform_9(%arg0: i32) -> (i32, i32, i32, i32) {
    %c0_i32 = arith.constant 0 : i32
    %c0_i32_0 = arith.constant 0 : i32
    %c0_i32_1 = arith.constant 0 : i32
    %c0_i32_2 = arith.constant 0 : i32
    return %arg0, %c0_i32, %c0_i32_0, %c0_i32_1 : i32, i32, i32, i32
  }
  func.func @transform_10(%arg0: i32) -> (i32, i32, i32) {
    %c0_i32 = arith.constant 0 : i32
    %c0_i32_0 = arith.constant 0 : i32
    %c0_i32_1 = arith.constant 0 : i32
    return %arg0, %c0_i32, %c0_i32_0 : i32, i32, i32
  }
  func.func @transform_11(%arg0: i32) -> (i32, i32, i32) {
    %c0_i32 = arith.constant 0 : i32
    %c0_i32_0 = arith.constant 0 : i32
    %c0_i32_1 = arith.constant 0 : i32
    return %arg0, %c0_i32, %c0_i32_0 : i32, i32, i32
  }
}

</mosaic_0001>

<bundles_post_ra>
// kernel: tpu_custom_call.1
= control target key start
LH: loop header
LB: loop body
LE: loop exit
PB: predicated region body
PF: predicated region fallthrough
CT: control target
= control target key end

     0   :  { %s11712_s0 = inlined_call_operand.vmem [shape: f32[2,16,16,2], index: 0, kind: input, shape index: {}]   ;;  %s11713_s1 = inlined_call_operand.hbm [shape: f32[2,3,2,32], index: 1, kind: input, shape index: {}]   ;;  %s11714_s2 = inlined_call_operand.vmem [shape: f32[2,1,32], index: 2, kind: input, shape index: {}]   ;;  %s11715_s3 = inlined_call_operand.vmem [shape: f32[2,3,32,32], index: 3, kind: input, shape index: {}]   ;;  %s11716_s4 = inlined_call_operand.vmem [shape: f32[2,1,32], index: 4, kind: input, shape index: {}]   ;;  %s11717_s5 = inlined_call_operand.vmem [shape: f32[2,3,32,32], index: 5, kind: input, shape index: {}]   ;;  %s11718_s6 = inlined_call_operand.vmem [shape: f32[2,1,32], index: 6, kind: input, shape index: {}]   ;;  %s11719_s7 = inlined_call_operand.vmem [shape: f32[2,3,32,32], index: 7, kind: input, shape index: {}]   ;;  %s11720_s8 = inlined_call_operand.vmem [shape: f32[2,1,32], index: 8, kind: input, shape index: {}]   ;;  %s11721_s9 = inlined_call_operand.hbm [shape: f32[2,3,32,32], index: 9, kind: input, shape index: {}]   ;;  %s11722_s10 = inlined_call_operand.vmem [shape: f32[2,1,32], index: 10, kind: input, shape index: {}]   ;;  %s11723_s11 = inlined_call_operand.hbm [shape: f32[2,16,32], index: 11, kind: output, shape index: {}]  }
   0x1   :  { %11767 = sst [smem:[#allocation18_spill]] %s11713_s1 }
   0x2   :  { %16 = vsyncpa [#allocation5], 0 }
   0x3   :  { %18 = vsyncpa [#allocation5 + $0x1], 0 }
   0x4   :  { %19 = vsyncpa [#allocation8], 0 }
   0x5   :  { %21 = vsyncpa [#allocation8 + $0x1], 0 }
   0x6   :  { %22 = vsyncpa [#allocation6], 0 }
   0x7   :  { %24 = vsyncpa [#allocation6 + $0x1], 0  ;;  %s9816_s17 = smov 0   ;;  %s9818_s18 = smov 0  }
   0x8   :  { %s9820_s19 = smov 0   ;;  %s9822_s20 = smov 0  }
   0x9 LB: > { %11768 = sst [smem:[#allocation13_spill]] %s9732_s17  ;;  %s9837_s21 = sadd.s32 4294967295, %s9744_s20   ;;  %s9744_s20 = sphi %s9822_s20, %s11821_s20   ;;  %s9740_s19 = sphi %s9820_s19, %s11823_s19   ;;  %s9736_s18 = sphi %s9818_s18, %s11825_s18   ;;  %s9732_s17 = sphi %s9816_s17, %s11824_s17  }
   0xa   : > { %11769 = sst [smem:[#allocation14_spill]] %s9740_s19  ;;  %s7237_s22 = sadd.s32 4294967294, %s9744_s20  }
   0xb   : > { %s9841_s23 = sadd.s32 1, %s9744_s20   ;;  %s63_s24 = sadd.s32 1, %s9740_s19 }
   0xc   : > { %11770 = sst [smem:[#allocation15_spill]] %s9841_s23  ;;  %s60_s25 = ssub.s32 %s9744_s20, %s9841_s23 }
   0xd   : > { %p70_p0 = scmp.ne.s32.totalorder %s9740_s19, %s9736_s18  ;;  %p61_p1 = scmp.eq.s32.totalorder %s60_s25, 0 }
   0xe   : > { %p71_p2 = scmp.eq.s32.totalorder %s9744_s20, 0  ;;  %p76_p3 = scmp.ne.s32.totalorder %s9736_s18, %s9732_s17 }
   0xf   : > { %p77_p4 = scmp.eq.s32.totalorder %s9837_s21, 0  ;;  %p334_p7 = scmp.eq.s32.totalorder %s9837_s21, 1 }
  0x10   : > { %s9853_s26 = scalar_select %p61_p1, %s9740_s19, %s63_s24  }
  0x11   : > { %p72_p5 = por %p71_p2, %p70_p0  ;;  %p9855_p6 = por %p77_p4, %p76_p3 }
  0x12   : > { %11771 = sst [smem:[#allocation16_spill]] %s9853_s26  ;;  %p340_p8 = scmp.eq.s32.totalorder %s7237_s22, 1 }
  0x13   : > { %s11772_s27 = scalar_select %p9855_p6, 1, 0 }
  0x14   : > { %p9573_p10 = scmp.lt.s32.totalorder %s9744_s20, 2  ;;  %p9862_p11 = por %p334_p7, %p70_p0 }
  0x15   : > { %p9866_p12 = por %p340_p8, %p76_p3  ;;  %s9871_s30 = sand.u32 1, %s9740_s19  }
  0x16   : > { %s11773_s28 = scalar_select %p9862_p11, 1, 0 }
  0x17   : > { %s11774_s29 = scalar_select %p9866_p12, 1, 0 }
  0x18   : > { %s9550_s12 = smul.u32 96, %s9744_s20  ;;  %s11776_s1 = sld [smem:[#allocation18_spill]] }
  0x19   : > { %11775 = sst [smem:[#allocation17_spill]] %s11774_s29  ;;  %s9549_s13 = smul.u32 6, %s9871_s30 }
  0x1a   : > { %p9880_p13 = pnand %p9573_p10, %p72_p5  ;;  %s369_s26 = scalar_lea.sflag [#allocation5], %s9871_s30 }
  0x1b   : > { %s372_s24 = scalar_lea.vmem [#allocation4], %s9549_s13 }
  0x1c   : > { %s379_s25 = sshll.u32 %s372_s24, 4  ;;  %p9616_p1 = pneg %p9880_p13  ;;  %s9884_s25 = int_to_ptr.vmem [resolvable:$true] %s379_s25 }
  0x1e   : > { %s9878_s16 = scalar_lea.hbm %s11776_s1, %s9550_s12  ;;  %s9619_s15 = scalar_lea.hbm %s11776_s1, 192 }
  0x1f   : > { %s9614_s19 = scalar_lea.hbm %s9878_s16, 96  ;;  %p9620_p4 = scmp.lt.u32.totalorder %s9878_s16, %s11776_s1 }
  0x20   : > { %p9615_p0 = scmp.ne.s32.totalorder %s9878_s16, %s9614_s19  ;;  %p9621_p5 = scmp.lt.u32.totalorder %s9619_s15, %s9614_s19 }
  0x21   : > { %p9623_p8 = scmp.lt.u32.totalorder %s9614_s19, %s9878_s16 }
  0x22   : > { %p9617_p2 = pnand %p9616_p1, %p9615_p0  ;;  %p9622_p7 = por %p9621_p5, %p9620_p4 }
  0x24   : > { %p9618_p3 = pneg %p9617_p2  ;;  %p9624_p10 = por %p9623_p8, %p9622_p7 }
  0x26   : > { %p9625_p9 = pnand %p9624_p10, %p9618_p3 }
  0x28   : > { %9628 = shalt.err (!%p9625_p9)
}
  0x29   : > { %s9629_s13 = scalar_lea.vmem %s9884_s25, 96  ;;  %s9746_s24 = smov [#allocation4]  }
  0x2a   : > { %p9630_p0 = scmp.ne.s32.totalorder %s9884_s25, %s9629_s13  ;;  %s9634_s12 = sshll.u32 %s9746_s24, 4  ;;  %s9635_s12 = int_to_ptr.vmem [resolvable:$false] %s9634_s12 }
  0x2b   : > { %s9636_s23 = scalar_lea.vmem %s9635_s12, 192  ;;  %p9637_p11 = scmp.lt.s32.totalorder %s9884_s25, %s9635_s12 }
  0x2c   : > { %p9632_p2 = pnand %p9630_p0, %p9616_p1  ;;  %p9638_p4 = scmp.lt.s32.totalorder %s9636_s23, %s9629_s13 }
  0x2e   : > { %p9633_p12 = pneg %p9632_p2  ;;  %p9639_p5 = por %p9638_p4, %p9637_p11 }
  0x30   : > { %p9640_p7 = pnand %p9639_p5, %p9633_p12 }
  0x32   : > { %9643 = shalt.err (!%p9640_p7)
}
  0x33   : > { %s9747_s19 = smov 32   ;;  %s9748_s29 = smov 2  }
  0x34   : > { %9565 = dma.hbm_to_vmem [thread:$0]  (!%p9880_p13), %s9878_s16, 96, %s9884_s25, %s369_s26, %s9747_s19, %s9747_s19, %s9748_s29  }
  0x35   : > { %p7242_p9 = scmp.ge.s32.totalorder %s9744_s20, 1  ;;  %p462_p3 = scmp.lt.s32.totalorder %s9744_s20, 3 }
  0x36   : > { %s9551_s14 = smul.u32 96, %s9871_s30  ;;  %s438_s26 = scalar_lea.sflag [#allocation8], %s9871_s30 }
  0x37   : > { %p9917_p11 = pnand %p7242_p9, %p462_p3  ;;  %s9552_s13 = smul.u32 1536, %s9744_s20 }
  0x38   : > { %s441_s1 = scalar_lea.vmem [#allocation7], %s9551_s14  ;;  %s9649_s29 = scalar_lea.hbm %s11721_s9, 3072 }
  0x39   : > { %s9925_s23 = scalar_lea.hbm %s11721_s9, %s9552_s13  ;;  %s448_s17 = sshll.u32 %s441_s1, 4  ;;  %s9927_s17 = int_to_ptr.vmem [resolvable:$true] %s448_s17 }
  0x3a   : > { %s9644_s16 = scalar_lea.hbm %s9925_s23, 1536  ;;  %p9650_p0 = scmp.lt.u32.totalorder %s9925_s23, %s11721_s9 }
  0x3b   : > { %p9645_p12 = scmp.ne.s32.totalorder %s9925_s23, %s9644_s16  ;;  %p9651_p2 = scmp.lt.u32.totalorder %s9649_s29, %s9644_s16 }
  0x3c   : > { %p9653_p5 = scmp.lt.u32.totalorder %s9644_s16, %s9925_s23 }
  0x3d   : > { %p9647_p8 = pnand %p9645_p12, %p9616_p1  ;;  %p9652_p4 = por %p9651_p2, %p9650_p0 }
  0x3f   : > { %p9648_p10 = pneg %p9647_p8  ;;  %p9654_p7 = por %p9653_p5, %p9652_p4 }
  0x41   : > { %p9655_p9 = pnand %p9654_p7, %p9648_p10 }
  0x43   : > { %9658 = shalt.err (!%p9655_p9)
}
  0x44   : > { %s9659_s1 = scalar_lea.vmem %s9927_s17, 1536  ;;  %s9749_s14 = smov [#allocation7]  }
  0x45   : > { %p9660_p3 = scmp.ne.s32.totalorder %s9927_s17, %s9659_s1  ;;  %s9664_s12 = sshll.u32 %s9749_s14, 4  ;;  %s9665_s12 = int_to_ptr.vmem [resolvable:$false] %s9664_s12 }
  0x46   : > { %s9666_s25 = scalar_lea.vmem %s9665_s12, 3072  ;;  %p9667_p6 = scmp.lt.s32.totalorder %s9927_s17, %s9665_s12 }
  0x47   : > { %p9662_p12 = pnand %p9660_p3, %p9616_p1  ;;  %p9668_p0 = scmp.lt.s32.totalorder %s9666_s25, %s9659_s1 }
  0x49   : > { %p9663_p8 = pneg %p9662_p12  ;;  %p9669_p2 = por %p9668_p0, %p9667_p6 }
  0x4b   : > { %p9670_p4 = pnand %p9669_p2, %p9663_p8 }
  0x4d   : > { %9673 = shalt.err (!%p9670_p4)
}
  0x4e   : > { %s9750_s16 = smov 128   ;;  %s9751_s19 = smov 8  }
  0x4f   : > { %9568 = dma.hbm_to_vmem [thread:$0]  (!%p9880_p13), %s9925_s23, 1536, %s9927_s17, %s438_s26, %s9750_s16, %s9750_s16, %s9751_s19  }
  0x50   : > { %466 = sbr.rel (%p9917_p11) target bundleno = 1899 (0x76b), region = 64  ;;  %s9958_s29 = sand.u32 (!%p9917_p11), 1, %s9736_s18  }
  0x51   : > { %s9553_s13 = smul.u32 (!%p9917_p11), 6, %s9958_s29  ;;  %s469_s24 = scalar_lea.sflag (!%p9917_p11), [#allocation5], %s9958_s29 }
  0x52   : > { %p11779_p6 = scmp.ne.s32.totalorder (!%p9917_p11), %s11772_s27, 0 }
  0x53   : > { %s9962_s1 = scalar_lea.vmem (!%p9917_p11), [#allocation4], %s9553_s13 }
  0x57   : > { %9719 = dma.done.wait (%p11779_p6), %s469_s24, 96  }
  0x58   : > { %9721 = vsyncadd (%p11779_p6), %s469_s24, 4294967200  ;;  %s9554_s17 = smul.u32 96, %s9958_s29  ;;  %s478_s30 = scalar_lea.sflag [#allocation8], %s9958_s29 }
  0x5a   : > { %s9970_s22 = scalar_lea.vmem [#allocation7], %s9554_s17 }
  0x5b   : > { %9723 = dma.done.wait (%p11779_p6), %s478_s30, 1536  }
  0x5c   : > { %9725 = vsyncadd (%p11779_p6), %s478_s30, 4294965760  ;;  %p560_p13 = scmp.lt.s32.totalorder %s9837_s21, 1  ;;  %vm627_vm0 = vcmask 15360   ;;  %vm630_vm1 = vcmask 9216   ;;  %v9752_v0 = vmov 0.0   ;;  %vm922_vm2 = vcmask 1041408  }
  0x5d   : > { %628 = vst.msk [vmem:[#allocation2] sm:$0xff] %vm627_vm0, %v9752_v0  ;;  %629 = vst.msk [vmem:[#allocation2 + $0x8] sm:$0xff] %vm627_vm0, %v9752_v0  ;;  %v7249_v1 = vld [vmem:[%s9962_s1 + $0x2] sm:$0x3]  ;;  %v791_v2 = vld [vmem:[%s9962_s1] sm:$0x3] }
  0x5e   : > { %632 = vst.msk [vmem:[#allocation2 + $0x18] sm:$0xff] %vm627_vm0, %v9752_v0  ;;  %633 = vst.msk [vmem:[#allocation2 + $0x20] sm:$0xff] %vm627_vm0, %v9752_v0  ;;  %s10076_s27 = scalar_select %p560_p13, %s9837_s21, 1  ;;  %8309 = vmatprep.subr.msk.mxu1 %vm922_vm2, %v7249_v1  ;;  %8359 = vmatprep.subr.msk.mxu0 %vm922_vm2, %v791_v2  ;;  %v7316_v4 = vld [vmem:[%s9962_s1 + $0x4] sm:$0x3]  ;;  %vm677_vm3 = vcmask 261120  }
  0x5f   : > { %635 = vst.msk [vmem:[#allocation2 + $0x30] sm:$0xff] %vm627_vm0, %v9752_v0  ;;  %636 = vst.msk [vmem:[#allocation2 + $0x38] sm:$0xff] %vm627_vm0, %v9752_v0  ;;  %8310 = vmatpush3.msk.msra.mxu1 %vm922_vm2, %v7249_v1  ;;  %8360 = vmatpush3.msk.msra.mxu0 %vm922_vm2, %v791_v2  ;;  %vm680_vm4 = vcmask 254976   ;;  %vm7009_vm5 = vcmask 1041409   ;;  %vm7011_vm6 = vcmask 1042434   ;;  %vm7013_vm7 = vcmask 1043459  }
  0x60   : > { %638 = vst.msk [vmem:[#allocation2 + $0x48] sm:$0xff] %vm627_vm0, %v9752_v0  ;;  %639 = vst.msk [vmem:[#allocation2 + $0x50] sm:$0xff] %vm627_vm0, %v9752_v0  ;;  %s7776_s15 = sshll.u32 %s10076_s27, 8  ;;  %9227 = vmatprep.subr.msk.mxu1 %vm922_vm2, %v791_v2  ;;  %8409 = vmatprep.subr.msk.mxu0 %vm922_vm2, %v7316_v4  ;;  %s10256_s12 = smul.u32 96, %s10076_s27  ;;  %vm7015_vm8 = vcmask 1044484   ;;  %vm7017_vm9 = vcmask 1045509  }
  0x61   : > { %641 = vst.msk [vmem:[#allocation2 + $0x60] sm:$0xff] %vm627_vm0, %v9752_v0  ;;  %642 = vst.msk [vmem:[#allocation2 + $0x68] sm:$0xff] %vm627_vm0, %v9752_v0  ;;  %s10082_s14 = scalar_lea.vmem %s11712_s0, %s7776_s15  ;;  %s567_s1 = scalar_lea.vmem %s11714_s2, %s10076_s27  ;;  %vm7019_vm10 = vcmask 1046534   ;;  %vm7021_vm11 = vcmask 1047559  }
  0x62   : > { %644 = vst.msk [vmem:[#allocation2 + $0x78] sm:$0xff] %vm627_vm0, %v9752_v0  ;;  %645 = vst.msk [vmem:[#allocation2 + $0x80] sm:$0xff] %vm627_vm0, %v9752_v0  ;;  %v595_v3 = vld [vmem:[%s10082_s14] sm:$0xff]  ;;  %v596_v5 = vld [vmem:[%s10082_s14 + $0x8] sm:$0xff]  ;;  %s10262_s19 = scalar_lea.vmem %s11715_s3, %s10256_s12  ;;  %s10663_s15 = scalar_lea.vmem %s11717_s5, %s10256_s12 }
  0x63   : > { %647 = vst.msk [vmem:[#allocation2 + $0x90] sm:$0xff] %vm627_vm0, %v9752_v0  ;;  %648 = vst.msk [vmem:[#allocation2 + $0x98] sm:$0xff] %vm627_vm0, %v9752_v0  ;;  %v597_v6 = vld [vmem:[%s10082_s14 + $0x10] sm:$0xff]  ;;  %v598_v7 = vld [vmem:[%s10082_s14 + $0x18] sm:$0xff]  ;;  %s583_s24 = scalar_lea.vmem %s11718_s6, %s10076_s27  ;;  %s591_s30 = scalar_lea.vmem %s11720_s8, %s10076_s27 }
  0x64   : > { %650 = vst.msk [vmem:[#allocation2 + $0xa8] sm:$0xff] %vm627_vm0, %v9752_v0  ;;  %651 = vst.msk [vmem:[#allocation2 + $0xb0] sm:$0xff] %vm627_vm0, %v9752_v0  ;;  %v599_v8 = vld [vmem:[%s10082_s14 + $0x20] sm:$0xff]  ;;  %v600_v9 = vld [vmem:[%s10082_s14 + $0x28] sm:$0xff]  ;;  %s594_s23 = scalar_lea.vmem %s11722_s10, %s10076_s27  ;;  %s7035_s13 = scalar_lea.sflag [#allocation6], %s9958_s29 }
  0x65   : > { %653 = vst.msk [vmem:[#allocation2 + $0xc0] sm:$0xff] %vm627_vm0, %v9752_v0  ;;  %654 = vst.msk [vmem:[#allocation2 + $0xc8] sm:$0xff] %vm627_vm0, %v9752_v0  ;;  %v601_v10 = vld [vmem:[%s10082_s14 + $0x30] sm:$0xff]  ;;  %v602_v11 = vld [vmem:[%s10082_s14 + $0x38] sm:$0xff]  ;;  %p11816_p11 = scmp.ne.s32.totalorder %s11773_s28, 0 }
  0x66   : > { %656 = vst.msk [vmem:[#allocation2 + $0xd8] sm:$0xff] %vm627_vm0, %v9752_v0  ;;  %657 = vst.msk [vmem:[#allocation2 + $0xe0] sm:$0xff] %vm627_vm0, %v9752_v0  ;;  %v603_v12 = vld [vmem:[%s10082_s14 + $0x40] sm:$0xff]  ;;  %v604_v13 = vld [vmem:[%s10082_s14 + $0x48] sm:$0xff] }
  0x67   : > { %659 = vst.msk [vmem:[#allocation2 + $0xf0] sm:$0xff] %vm627_vm0, %v9752_v0  ;;  %660 = vst.msk [vmem:[#allocation2 + $0xf8] sm:$0xff] %vm627_vm0, %v9752_v0  ;;  %v605_v14 = vld [vmem:[%s10082_s14 + $0x50] sm:$0xff]  ;;  %v606_v15 = vld [vmem:[%s10082_s14 + $0x58] sm:$0xff] }
  0x68   : > { %662 = vst.msk [vmem:[#allocation2 + $0x108] sm:$0xff] %vm627_vm0, %v9752_v0  ;;  %663 = vst.msk [vmem:[#allocation2 + $0x110] sm:$0xff] %vm627_vm0, %v9752_v0  ;;  %v607_v16 = vld [vmem:[%s10082_s14 + $0x60] sm:$0xff]  ;;  %v608_v17 = vld [vmem:[%s10082_s14 + $0x68] sm:$0xff] }
  0x69   : > { %665 = vst.msk [vmem:[#allocation2 + $0x120] sm:$0xff] %vm627_vm0, %v9752_v0  ;;  %666 = vst.msk [vmem:[#allocation2 + $0x128] sm:$0xff] %vm627_vm0, %v9752_v0  ;;  %v609_v18 = vld [vmem:[%s10082_s14 + $0x70] sm:$0xff]  ;;  %v610_v19 = vld [vmem:[%s10082_s14 + $0x78] sm:$0xff] }
  0x6a   : > { %668 = vst.msk [vmem:[#allocation2 + $0x138] sm:$0xff] %vm627_vm0, %v9752_v0  ;;  %669 = vst.msk [vmem:[#allocation2 + $0x140] sm:$0xff] %vm627_vm0, %v9752_v0  ;;  %v611_v20 = vld [vmem:[%s10082_s14 + $0x80] sm:$0xff]  ;;  %v612_v21 = vld [vmem:[%s10082_s14 + $0x88] sm:$0xff] }
  0x6b   : > { %671 = vst.msk [vmem:[#allocation2 + $0x150] sm:$0xff] %vm627_vm0, %v9752_v0  ;;  %672 = vst.msk [vmem:[#allocation2 + $0x158] sm:$0xff] %vm627_vm0, %v9752_v0  ;;  %v613_v22 = vld [vmem:[%s10082_s14 + $0x90] sm:$0xff]  ;;  %v614_v23 = vld [vmem:[%s10082_s14 + $0x98] sm:$0xff] }
  0x6c   : > { %674 = vst.msk [vmem:[#allocation2 + $0x168] sm:$0xff] %vm627_vm0, %v9752_v0  ;;  %675 = vst.msk [vmem:[#allocation2 + $0x170] sm:$0xff] %vm627_vm0, %v9752_v0  ;;  %v615_v24 = vld [vmem:[%s10082_s14 + $0xa0] sm:$0xff]  ;;  %v616_v27 = vld [vmem:[%s10082_s14 + $0xa8] sm:$0xff] }
  0x6d   : > { %631 = vst.msk [vmem:[#allocation2 + $0x10] sm:$0x3] %vm630_vm1, %v9752_v0  ;;  %634 = vst.msk [vmem:[#allocation2 + $0x28] sm:$0x3] %vm630_vm1, %v9752_v0  ;;  %v617_v46 = vld [vmem:[%s10082_s14 + $0xb0] sm:$0xff]  ;;  %v618_v47 = vld [vmem:[%s10082_s14 + $0xb8] sm:$0xff] }
  0x6e   : > { %637 = vst.msk [vmem:[#allocation2 + $0x40] sm:$0x3] %vm630_vm1, %v9752_v0  ;;  %640 = vst.msk [vmem:[#allocation2 + $0x58] sm:$0x3] %vm630_vm1, %v9752_v0  ;;  %v619_v50 = vld [vmem:[%s10082_s14 + $0xc0] sm:$0xff]  ;;  %v620_v51 = vld [vmem:[%s10082_s14 + $0xc8] sm:$0xff] }
  0x6f   : > { %643 = vst.msk [vmem:[#allocation2 + $0x70] sm:$0x3] %vm630_vm1, %v9752_v0  ;;  %646 = vst.msk [vmem:[#allocation2 + $0x88] sm:$0x3] %vm630_vm1, %v9752_v0  ;;  %v621_v52 = vld [vmem:[%s10082_s14 + $0xd0] sm:$0xff]  ;;  %v622_v54 = vld [vmem:[%s10082_s14 + $0xd8] sm:$0xff] }
  0x70   : > { %649 = vst.msk [vmem:[#allocation2 + $0xa0] sm:$0x3] %vm630_vm1, %v9752_v0  ;;  %652 = vst.msk [vmem:[#allocation2 + $0xb8] sm:$0x3] %vm630_vm1, %v9752_v0  ;;  %v623_v56 = vld [vmem:[%s10082_s14 + $0xe0] sm:$0xff]  ;;  %v624_v57 = vld [vmem:[%s10082_s14 + $0xe8] sm:$0xff] }
  0x71   : > { %655 = vst.msk [vmem:[#allocation2 + $0xd0] sm:$0x3] %vm630_vm1, %v9752_v0  ;;  %658 = vst.msk [vmem:[#allocation2 + $0xe8] sm:$0x3] %vm630_vm1, %v9752_v0  ;;  %v625_v60 = vld [vmem:[%s10082_s14 + $0xf0] sm:$0xff]  ;;  %v626_v61 = vld [vmem:[%s10082_s14 + $0xf8] sm:$0xff]  ;;  %s575_s14 = scalar_lea.vmem %s11716_s4, %s10076_s27 }
  0x72   : > { %661 = vst.msk [vmem:[#allocation2 + $0x100] sm:$0x3] %vm630_vm1, %v9752_v0  ;;  %664 = vst.msk [vmem:[#allocation2 + $0x118] sm:$0x3] %vm630_vm1, %v9752_v0  ;;  %s7243_s27 = sshll.u32 %s9958_s29, 4 }
  0x73   : > { %667 = vst.msk [vmem:[#allocation2 + $0x130] sm:$0x3] %vm630_vm1, %v9752_v0  ;;  %670 = vst.msk [vmem:[#allocation2 + $0x148] sm:$0x3] %vm630_vm1, %v9752_v0  ;;  %s11625_s26 = scalar_lea.vmem [#allocation9], %s7243_s27 }
  0x74   : > { %673 = vst.msk [vmem:[#allocation2 + $0x160] sm:$0x3] %vm630_vm1, %v9752_v0  ;;  %676 = vst.msk [vmem:[#allocation2 + $0x178] sm:$0x3] %vm630_vm1, %v9752_v0  ;;  %s7048_s25 = sshll.u32 %s11625_s26, 4  ;;  %s11665_s25 = int_to_ptr.vmem [resolvable:$true] %s7048_s25 }
  0x75   : > { %727 = vst.msk [vmem:[#allocation2 + $0x1] sm:$0xff] %vm627_vm0, %v595_v3  ;;  %728 = vst.msk [vmem:[#allocation2 + $0x9] sm:$0xff] %vm627_vm0, %v596_v5 }
  0x76   : > { %729 = vst.msk [vmem:[#allocation2 + $0x19] sm:$0xff] %vm627_vm0, %v597_v6  ;;  %730 = vst.msk [vmem:[#allocation2 + $0x21] sm:$0xff] %vm627_vm0, %v598_v7 }
  0x77   : > { %731 = vst.msk [vmem:[#allocation2 + $0x31] sm:$0xff] %vm627_vm0, %v599_v8  ;;  %732 = vst.msk [vmem:[#allocation2 + $0x39] sm:$0xff] %vm627_vm0, %v600_v9 }
  0x78   : > { %733 = vst.msk [vmem:[#allocation2 + $0x49] sm:$0xff] %vm627_vm0, %v601_v10  ;;  %734 = vst.msk [vmem:[#allocation2 + $0x51] sm:$0xff] %vm627_vm0, %v602_v11 }
  0x79   : > { %735 = vst.msk [vmem:[#allocation2 + $0x61] sm:$0xff] %vm627_vm0, %v603_v12  ;;  %736 = vst.msk [vmem:[#allocation2 + $0x69] sm:$0xff] %vm627_vm0, %v604_v13 }
  0x7a   : > { %737 = vst.msk [vmem:[#allocation2 + $0x79] sm:$0xff] %vm627_vm0, %v605_v14  ;;  %738 = vst.msk [vmem:[#allocation2 + $0x81] sm:$0xff] %vm627_vm0, %v606_v15 }
  0x7b   : > { %739 = vst.msk [vmem:[#allocation2 + $0x91] sm:$0xff] %vm627_vm0, %v607_v16  ;;  %740 = vst.msk [vmem:[#allocation2 + $0x99] sm:$0xff] %vm627_vm0, %v608_v17 }
  0x7c   : > { %741 = vst.msk [vmem:[#allocation2 + $0xa9] sm:$0xff] %vm627_vm0, %v609_v18  ;;  %742 = vst.msk [vmem:[#allocation2 + $0xb1] sm:$0xff] %vm627_vm0, %v610_v19  ;;  %v792_v25 = vld [vmem:[#allocation2 + $0x1] sm:$0xff]  ;;  %v793_v28 = vld [vmem:[#allocation2 + $0x9] sm:$0xff] }
  0x7d   : > { %743 = vst.msk [vmem:[#allocation2 + $0xc1] sm:$0xff] %vm627_vm0, %v611_v20  ;;  %744 = vst.msk [vmem:[#allocation2 + $0xc9] sm:$0xff] %vm627_vm0, %v612_v21  ;;  %v759_v26 = vld [vmem:[#allocation2] sm:$0xff]  ;;  %8311 = vmatprep.mubr.msk.f32.mxu1 %vm627_vm0, %v792_v25  ;;  %v760_v29 = vld [vmem:[#allocation2 + $0x8] sm:$0xff] }
  0x7e   : > { %745 = vst.msk [vmem:[#allocation2 + $0xd9] sm:$0xff] %vm627_vm0, %v613_v22  ;;  %746 = vst.msk [vmem:[#allocation2 + $0xe1] sm:$0xff] %vm627_vm0, %v614_v23  ;;  %8361 = vmatprep.mubr.msk.f32.mxu0 %vm627_vm0, %v759_v26  ;;  %v794_v30 = vld [vmem:[#allocation2 + $0x19] sm:$0xff]  ;;  %8312 = vmatmul.mubr.msk.f32.vlgmr.msra.gmra.mrb[0].mxu1 %vm627_vm0, %v793_v28  ;;  %v795_v32 = vld [vmem:[#allocation2 + $0x21] sm:$0xff] }
  0x7f   : > { %747 = vst.msk [vmem:[#allocation2 + $0xf1] sm:$0xff] %vm627_vm0, %v615_v24  ;;  %748 = vst.msk [vmem:[#allocation2 + $0xf9] sm:$0xff] %vm627_vm0, %v616_v27  ;;  %8362 = vmatmul.mubr.msk.f32.vlgmr.msra.gmra.mrb[0].mxu0 %vm627_vm0, %v760_v29  ;;  %v761_v31 = vld [vmem:[#allocation2 + $0x18] sm:$0xff]  ;;  %9228 = vmatpush3.msk.msra.mxu1 %vm922_vm2, %v791_v2  ;;  %v762_v33 = vld [vmem:[#allocation2 + $0x20] sm:$0xff] }
  0x80   : > { %8410 = vmatpush3.msk.msra.mxu0 %vm922_vm2, %v7316_v4  ;;  %8314 = vmatprep.mubr.msk.f32.mxu1 %vm627_vm0, %v794_v30  ;;  %v796_v34 = vld [vmem:[#allocation2 + $0x31] sm:$0xff]  ;;  %v797_v36 = vld [vmem:[#allocation2 + $0x39] sm:$0xff]  ;;  %v798_v38 = vld [vmem:[#allocation2 + $0x49] sm:$0xff]  ;;  %749 = vst.msk [vmem:[#allocation2 + $0x109] sm:$0xff] %vm627_vm0, %v617_v46 }
  0x81   : > { %8364 = vmatprep.mubr.msk.f32.mxu0 %vm627_vm0, %v761_v31  ;;  %v763_v35 = vld [vmem:[#allocation2 + $0x30] sm:$0xff]  ;;  %v764_v37 = vld [vmem:[#allocation2 + $0x38] sm:$0xff]  ;;  %v765_v39 = vld [vmem:[#allocation2 + $0x48] sm:$0xff]  ;;  %750 = vst.msk [vmem:[#allocation2 + $0x111] sm:$0xff] %vm627_vm0, %v618_v47 }
  0x82   : > { %8315 = vmatmul.mubr.msk.f32.gmra.mrb[2].mxu1 %vm627_vm0, %v795_v32  ;;  %v799_v40 = vld [vmem:[#allocation2 + $0x51] sm:$0xff]  ;;  %v800_v42 = vld [vmem:[#allocation2 + $0x61] sm:$0xff]  ;;  %v801_v44 = vld [vmem:[#allocation2 + $0x69] sm:$0xff]  ;;  %751 = vst.msk [vmem:[#allocation2 + $0x121] sm:$0xff] %vm627_vm0, %v619_v50 }
  0x83   : > { %8365 = vmatmul.mubr.msk.f32.gmra.mrb[2].mxu0 %vm627_vm0, %v762_v33  ;;  %8317 = vmatprep.mubr.msk.f32.mxu1 %vm627_vm0, %v796_v34  ;;  %v766_v41 = vld [vmem:[#allocation2 + $0x50] sm:$0xff]  ;;  %v767_v43 = vld [vmem:[#allocation2 + $0x60] sm:$0xff]  ;;  %v768_v45 = vld [vmem:[#allocation2 + $0x68] sm:$0xff]  ;;  %752 = vst.msk [vmem:[#allocation2 + $0x129] sm:$0xff] %vm627_vm0, %v620_v51 }
  0x84   : > { %8367 = vmatprep.mubr.msk.f32.mxu0 %vm627_vm0, %v763_v35  ;;  %v802_v48 = vld [vmem:[#allocation2 + $0x79] sm:$0xff]  ;;  %v803_v53 = vld [vmem:[#allocation2 + $0x81] sm:$0xff]  ;;  %753 = vst.msk [vmem:[#allocation2 + $0x139] sm:$0xff] %vm627_vm0, %v621_v52  ;;  %754 = vst.msk [vmem:[#allocation2 + $0x141] sm:$0xff] %vm627_vm0, %v622_v54 }
  0x85   : > { %v769_v49 = vld [vmem:[#allocation2 + $0x78] sm:$0xff]  ;;  %v770_v55 = vld [vmem:[#allocation2 + $0x80] sm:$0xff]  ;;  %v771_v59 = vld [vmem:[#allocation2 + $0x90] sm:$0xff]  ;;  %755 = vst.msk [vmem:[#allocation2 + $0x151] sm:$0xff] %vm627_vm0, %v623_v56 }
  0x86   : > { %8318 = vmatmul.mubr.msk.f32.gmra.mrb[4].mxu1 %vm627_vm0, %v797_v36  ;;  %v804_v58 = vld [vmem:[#allocation2 + $0x91] sm:$0xff]  ;;  %756 = vst.msk [vmem:[#allocation2 + $0x159] sm:$0xff] %vm627_vm0, %v624_v57  ;;  %757 = vst.msk [vmem:[#allocation2 + $0x169] sm:$0xff] %vm627_vm0, %v625_v60  ;;  %v805_v62 = vld [vmem:[#allocation2 + $0x99] sm:$0xff] }
  0x87   : > { %8368 = vmatmul.mubr.msk.f32.gmra.mrb[4].mxu0 %vm627_vm0, %v764_v37  ;;  %8320 = vmatprep.mubr.msk.f32.mxu1 %vm627_vm0, %v798_v38  ;;  %758 = vst.msk [vmem:[#allocation2 + $0x171] sm:$0xff] %vm627_vm0, %v626_v61  ;;  %v772_v63 = vld [vmem:[#allocation2 + $0x98] sm:$0xff]  ;;  %v806_v1 = vld [vmem:[#allocation2 + $0xa9] sm:$0xff]  ;;  %v808_v5 = vld [vmem:[#allocation2 + $0xc1] sm:$0xff] }
  0x88   : > { %8370 = vmatprep.mubr.msk.f32.mxu0 %vm627_vm0, %v765_v39  ;;  %v773_v2 = vld [vmem:[#allocation2 + $0xa8] sm:$0xff]  ;;  %v807_v3 = vld [vmem:[#allocation2 + $0xb1] sm:$0xff]  ;;  %v810_v9 = vld [vmem:[#allocation2 + $0xd9] sm:$0xff]  ;;  %679 = vst.msk [vmem:[#allocation3 + $0x8] sm:$0xff] %vm677_vm3, %v9752_v0 }
  0x89   : > { %v774_v4 = vld [vmem:[#allocation2 + $0xb0] sm:$0xff]  ;;  %v1475_v6 = vld [vmem:[#allocation2 + $0x2] sm:$0xff]  ;;  %v1477_v10 = vld [vmem:[#allocation2 + $0x1a] sm:$0xff]  ;;  %681 = vst.msk [vmem:[#allocation3 + $0x10] sm:$0x3] %vm680_vm4, %v9752_v0 }
  0x8a   : > { %8321 = vmatmul.mubr.msk.f32.gmra.mrb[6].mxu1 %vm627_vm0, %v799_v40  ;;  %v809_v7 = vld [vmem:[#allocation2 + $0xc9] sm:$0xff]  ;;  %v811_v11 = vld [vmem:[#allocation2 + $0xe1] sm:$0xff]  ;;  %v812_v13 = vld [vmem:[#allocation2 + $0xf1] sm:$0xff]  ;;  %678 = vst.msk [vmem:[#allocation3] sm:$0xff] %vm677_vm3, %v9752_v0 }
  0x8b   : > { %8371 = vmatmul.mubr.msk.f32.gmra.mrb[6].mxu0 %vm627_vm0, %v766_v41  ;;  %8323 = vmatprep.mubr.msk.f32.mxu1 %vm627_vm0, %v800_v42  ;;  %v1476_v8 = vld [vmem:[#allocation2 + $0xa] sm:$0xff]  ;;  %v1478_v12 = vld [vmem:[#allocation2 + $0x22] sm:$0xff]  ;;  %v1479_v14 = vld [vmem:[#allocation2 + $0x32] sm:$0xff]  ;;  %682 = vst.msk [vmem:[#allocation3 + $0x18] sm:$0xff] %vm677_vm3, %v9752_v0 }
  0x8c   : > { %8373 = vmatprep.mubr.msk.f32.mxu0 %vm627_vm0, %v767_v43  ;;  %v813_v15 = vld [vmem:[#allocation2 + $0xf9] sm:$0xff]  ;;  %v814_v17 = vld [vmem:[#allocation2 + $0x109] sm:$0xff]  ;;  %v815_v19 = vld [vmem:[#allocation2 + $0x111] sm:$0xff]  ;;  %683 = vst.msk [vmem:[#allocation3 + $0x20] sm:$0xff] %vm677_vm3, %v9752_v0 }
  0x8d   : > { %v1480_v16 = vld [vmem:[#allocation2 + $0x3a] sm:$0xff]  ;;  %v1481_v18 = vld [vmem:[#allocation2 + $0x4a] sm:$0xff]  ;;  %v1482_v20 = vld [vmem:[#allocation2 + $0x52] sm:$0xff]  ;;  %684 = vst.msk [vmem:[#allocation3 + $0x28] sm:$0x3] %vm680_vm4, %v9752_v0 }
  0x8e   : > { %8324 = vmatmul.mubr.msk.f32.gmra.mrb[8].mxu1 %vm627_vm0, %v801_v44  ;;  %v816_v21 = vld [vmem:[#allocation2 + $0x121] sm:$0xff]  ;;  %v817_v23 = vld [vmem:[#allocation2 + $0x129] sm:$0xff]  ;;  %v818_v25 = vld [vmem:[#allocation2 + $0x139] sm:$0xff]  ;;  %685 = vst.msk [vmem:[#allocation3 + $0x30] sm:$0xff] %vm677_vm3, %v9752_v0 }
  0x8f   : > { %8374 = vmatmul.mubr.msk.f32.gmra.mrb[8].mxu0 %vm627_vm0, %v768_v45  ;;  %8326 = vmatprep.mubr.msk.f32.mxu1 %vm627_vm0, %v802_v48  ;;  %v1483_v22 = vld [vmem:[#allocation2 + $0x62] sm:$0xff]  ;;  %v1484_v24 = vld [vmem:[#allocation2 + $0x6a] sm:$0xff]  ;;  %v1485_v26 = vld [vmem:[#allocation2 + $0x7a] sm:$0xff]  ;;  %686 = vst.msk [vmem:[#allocation3 + $0x38] sm:$0xff] %vm677_vm3, %v9752_v0 }
  0x90   : > { %8376 = vmatprep.mubr.msk.f32.mxu0 %vm627_vm0, %v769_v49  ;;  %v819_v27 = vld [vmem:[#allocation2 + $0x141] sm:$0xff]  ;;  %v820_v29 = vld [vmem:[#allocation2 + $0x151] sm:$0xff]  ;;  %v821_v31 = vld [vmem:[#allocation2 + $0x159] sm:$0xff]  ;;  %687 = vst.msk [vmem:[#allocation3 + $0x40] sm:$0x3] %vm680_vm4, %v9752_v0 }
  0x91   : > { %v1486_v28 = vld [vmem:[#allocation2 + $0x82] sm:$0xff]  ;;  %v1487_v30 = vld [vmem:[#allocation2 + $0x92] sm:$0xff]  ;;  %v1488_v32 = vld [vmem:[#allocation2 + $0x9a] sm:$0xff]  ;;  %688 = vst.msk [vmem:[#allocation3 + $0x48] sm:$0xff] %vm677_vm3, %v9752_v0 }
  0x92   : > { %8327 = vmatmul.mubr.msk.f32.gmra.mrb[10].mxu1 %vm627_vm0, %v803_v53  ;;  %v822_v33 = vld [vmem:[#allocation2 + $0x169] sm:$0xff]  ;;  %v823_v35 = vld [vmem:[#allocation2 + $0x171] sm:$0xff]  ;;  %v775_v37 = vld [vmem:[#allocation2 + $0xc0] sm:$0xff]  ;;  %689 = vst.msk [vmem:[#allocation3 + $0x50] sm:$0xff] %vm677_vm3, %v9752_v0 }
  0x93   : > { %8377 = vmatmul.mubr.msk.f32.gmra.mrb[10].mxu0 %vm627_vm0, %v770_v55  ;;  %8329 = vmatprep.mubr.msk.f32.mxu1 %vm627_vm0, %v804_v58  ;;  %v1489_v34 = vld [vmem:[#allocation2 + $0xaa] sm:$0xff]  ;;  %v1490_v36 = vld [vmem:[#allocation2 + $0xb2] sm:$0xff]  ;;  %v1491_v38 = vld [vmem:[#allocation2 + $0xc2] sm:$0xff]  ;;  %690 = vst.msk [vmem:[#allocation3 + $0x58] sm:$0x3] %vm680_vm4, %v9752_v0 }
  0x94   : > { %8379 = vmatprep.mubr.msk.f32.mxu0 %vm627_vm0, %v771_v59  ;;  %v776_v39 = vld [vmem:[#allocation2 + $0xc8] sm:$0xff]  ;;  %v777_v41 = vld [vmem:[#allocation2 + $0xd8] sm:$0xff]  ;;  %v778_v43 = vld [vmem:[#allocation2 + $0xe0] sm:$0xff]  ;;  %691 = vst.msk [vmem:[#allocation3 + $0x60] sm:$0xff] %vm677_vm3, %v9752_v0 }
  0x95   : > { %v1492_v40 = vld [vmem:[#allocation2 + $0xca] sm:$0xff]  ;;  %v1493_v42 = vld [vmem:[#allocation2 + $0xda] sm:$0xff]  ;;  %v1494_v44 = vld [vmem:[#allocation2 + $0xe2] sm:$0xff]  ;;  %692 = vst.msk [vmem:[#allocation3 + $0x68] sm:$0xff] %vm677_vm3, %v9752_v0 }
  0x96   : > { %8330 = vmatmul.mubr.msk.f32.gmra.mrb[12].mxu1 %vm627_vm0, %v805_v62  ;;  %v779_v45 = vld [vmem:[#allocation2 + $0xf0] sm:$0xff]  ;;  %v780_v47 = vld [vmem:[#allocation2 + $0xf8] sm:$0xff]  ;;  %v781_v49 = vld [vmem:[#allocation2 + $0x108] sm:$0xff]  ;;  %693 = vst.msk [vmem:[#allocation3 + $0x70] sm:$0x3] %vm680_vm4, %v9752_v0 }
  0x97   : > { %8380 = vmatmul.mubr.msk.f32.gmra.mrb[12].mxu0 %vm627_vm0, %v772_v63  ;;  %8332 = vmatprep.mubr.msk.f32.mxu1 %vm627_vm0, %v806_v1  ;;  %v1495_v46 = vld [vmem:[#allocation2 + $0xf2] sm:$0xff]  ;;  %v1496_v48 = vld [vmem:[#allocation2 + $0xfa] sm:$0xff]  ;;  %v1497_v50 = vld [vmem:[#allocation2 + $0x10a] sm:$0xff]  ;;  %694 = vst.msk [vmem:[#allocation3 + $0x78] sm:$0xff] %vm677_vm3, %v9752_v0 }
  0x98   : > { %8382 = vmatprep.mubr.msk.f32.mxu0 %vm627_vm0, %v773_v2  ;;  %v782_v51 = vld [vmem:[#allocation2 + $0x110] sm:$0xff]  ;;  %v783_v53 = vld [vmem:[#allocation2 + $0x120] sm:$0xff]  ;;  %v784_v55 = vld [vmem:[#allocation2 + $0x128] sm:$0xff]  ;;  %695 = vst.msk [vmem:[#allocation3 + $0x80] sm:$0xff] %vm677_vm3, %v9752_v0 }
  0x99   : > { %v1498_v52 = vld [vmem:[#allocation2 + $0x112] sm:$0xff]  ;;  %v1499_v54 = vld [vmem:[#allocation2 + $0x122] sm:$0xff]  ;;  %v1500_v56 = vld [vmem:[#allocation2 + $0x12a] sm:$0xff]  ;;  %696 = vst.msk [vmem:[#allocation3 + $0x88] sm:$0x3] %vm680_vm4, %v9752_v0 }
  0x9a   : > { %8333 = vmatmul.mubr.msk.f32.gmra.mrb[14].mxu1 %vm627_vm0, %v807_v3  ;;  %v785_v57 = vld [vmem:[#allocation2 + $0x138] sm:$0xff]  ;;  %v786_v59 = vld [vmem:[#allocation2 + $0x140] sm:$0xff]  ;;  %v787_v61 = vld [vmem:[#allocation2 + $0x150] sm:$0xff]  ;;  %697 = vst.msk [vmem:[#allocation3 + $0x90] sm:$0xff] %vm677_vm3, %v9752_v0 }
  0x9b   : > { %8383 = vmatmul.mubr.msk.f32.gmra.mrb[14].mxu0 %vm627_vm0, %v774_v4  ;;  %8335 = vmatprep.mubr.msk.f32.mxu1 %vm627_vm0, %v808_v5  ;;  %v1501_v58 = vld [vmem:[#allocation2 + $0x13a] sm:$0xff]  ;;  %v1502_v60 = vld [vmem:[#allocation2 + $0x142] sm:$0xff]  ;;  %v1503_v62 = vld [vmem:[#allocation2 + $0x152] sm:$0xff]  ;;  %698 = vst.msk [vmem:[#allocation3 + $0x98] sm:$0xff] %vm677_vm3, %v9752_v0 }
  0x9c   : > { %8411 = vmatprep.mubr.msk.f32.mxu0 %vm627_vm0, %v1475_v6  ;;  %v788_v63 = vld [vmem:[#allocation2 + $0x158] sm:$0xff]  ;;  %v789_v2 = vld [vmem:[#allocation2 + $0x168] sm:$0xff]  ;;  %v790_v4 = vld [vmem:[#allocation2 + $0x170] sm:$0xff]  ;;  %699 = vst.msk [vmem:[#allocation3 + $0xa0] sm:$0x3] %vm680_vm4, %v9752_v0 }
  0x9d   : > { %v1504_v1 = vld [vmem:[#allocation2 + $0x15a] sm:$0xff]  ;;  %v1505_v3 = vld [vmem:[#allocation2 + $0x16a] sm:$0xff]  ;;  %v1506_v5 = vld [vmem:[#allocation2 + $0x172] sm:$0xff]  ;;  %700 = vst.msk [vmem:[#allocation3 + $0xa8] sm:$0xff] %vm677_vm3, %v9752_v0 }
  0x9e   : > { %8336 = vmatmul.mubr.msk.f32.gmra.mrb[16].mxu1 %vm627_vm0, %v809_v7  ;;  %v7351_v6 = vld [vmem:[%s10262_s19 + $0x20] sm:$0xff]  ;;  %v7352_v7 = vld [vmem:[%s10262_s19 + $0x28] sm:$0xff]  ;;  %701 = vst.msk [vmem:[#allocation3 + $0xb0] sm:$0xff] %vm677_vm3, %v9752_v0  ;;  %703 = vst.msk [vmem:[#allocation3 + $0xc0] sm:$0xff] %vm677_vm3, %v9752_v0 }
  0x9f   : > { %8412 = vmatmul.mubr.msk.f32.vlgmr.msra.gmra.mrb[0].mxu0 %vm627_vm0, %v1476_v8  ;;  %8338 = vmatprep.mubr.msk.f32.mxu1 %vm627_vm0, %v810_v9  ;;  %v9131_v8 = vpack.c.bf16 %v7352_v7, %v7351_v6  ;;  %702 = vst.msk [vmem:[#allocation3 + $0xb8] sm:$0x3] %vm680_vm4, %v9752_v0  ;;  %705 = vst.msk [vmem:[#allocation3 + $0xd0] sm:$0x3] %vm680_vm4, %v9752_v0  ;;  %v7353_v9 = vld [vmem:[%s10262_s19 + $0x30] sm:$0xff] }
  0xa0   : > { %8414 = vmatprep.mubr.msk.f32.mxu0 %vm627_vm0, %v1477_v10  ;;  %704 = vst.msk [vmem:[#allocation3 + $0xc8] sm:$0xff] %vm677_vm3, %v9752_v0  ;;  %706 = vst.msk [vmem:[#allocation3 + $0xd8] sm:$0xff] %vm677_vm3, %v9752_v0  ;;  %v7354_v10 = vld [vmem:[%s10262_s19 + $0x38] sm:$0xff] }
  0xa1   : > { %9132 = vmatprep.subr.bf16.mxu1 %v9131_v8  ;;  %707 = vst.msk [vmem:[#allocation3 + $0xe0] sm:$0xff] %vm677_vm3, %v9752_v0  ;;  %709 = vst.msk [vmem:[#allocation3 + $0xf0] sm:$0xff] %vm677_vm3, %v9752_v0 }
  0xa2   : > { %8339 = vmatmul.mubr.msk.f32.gmra.mrb[18].mxu1 %vm627_vm0, %v811_v11  ;;  %708 = vst.msk [vmem:[#allocation3 + $0xe8] sm:$0x3] %vm680_vm4, %v9752_v0  ;;  %711 = vst.msk [vmem:[#allocation3 + $0x100] sm:$0x3] %vm680_vm4, %v9752_v0  ;;  %v9135_v11 = vpack.c.bf16 %v7354_v10, %v7353_v9 }
  0xa3   : > { %8415 = vmatmul.mubr.msk.f32.gmra.mrb[2].mxu0 %vm627_vm0, %v1478_v12  ;;  %8341 = vmatprep.mubr.msk.f32.mxu1 %vm627_vm0, %v812_v13  ;;  %710 = vst.msk [vmem:[#allocation3 + $0xf8] sm:$0xff] %vm677_vm3, %v9752_v0  ;;  %712 = vst.msk [vmem:[#allocation3 + $0x108] sm:$0xff] %vm677_vm3, %v9752_v0  ;;  %v2000_v12 = vld [vmem:[%s10262_s19] sm:$0xff]  ;;  %v2001_v13 = vld [vmem:[%s10262_s19 + $0x8] sm:$0xff] }
  0xa4   : > { %8417 = vmatprep.mubr.msk.f32.mxu0 %vm627_vm0, %v1479_v14  ;;  %713 = vst.msk [vmem:[#allocation3 + $0x110] sm:$0xff] %vm677_vm3, %v9752_v0  ;;  %715 = vst.msk [vmem:[#allocation3 + $0x120] sm:$0xff] %vm677_vm3, %v9752_v0  ;;  %v10366_v14 = vpack.c.bf16 %v2001_v13, %v2000_v12 }
  0xa5   : > { %714 = vst.msk [vmem:[#allocation3 + $0x118] sm:$0x3] %vm680_vm4, %v9752_v0  ;;  %717 = vst.msk [vmem:[#allocation3 + $0x130] sm:$0x3] %vm680_vm4, %v9752_v0 }
  0xa6   : > { %8342 = vmatmul.mubr.msk.f32.gmra.mrb[20].mxu1 %vm627_vm0, %v813_v15  ;;  %716 = vst.msk [vmem:[#allocation3 + $0x128] sm:$0xff] %vm677_vm3, %v9752_v0  ;;  %718 = vst.msk [vmem:[#allocation3 + $0x138] sm:$0xff] %vm677_vm3, %v9752_v0 }
  0xa7   : > { %8418 = vmatmul.mubr.msk.f32.gmra.mrb[4].mxu0 %vm627_vm0, %v1480_v16  ;;  %8344 = vmatprep.mubr.msk.f32.mxu1 %vm627_vm0, %v814_v17  ;;  %719 = vst.msk [vmem:[#allocation3 + $0x140] sm:$0xff] %vm677_vm3, %v9752_v0  ;;  %721 = vst.msk [vmem:[#allocation3 + $0x150] sm:$0xff] %vm677_vm3, %v9752_v0 }
  0xa8   : > { %8420 = vmatprep.mubr.msk.f32.mxu0 %vm627_vm0, %v1481_v18  ;;  %720 = vst.msk [vmem:[#allocation3 + $0x148] sm:$0x3] %vm680_vm4, %v9752_v0  ;;  %723 = vst.msk [vmem:[#allocation3 + $0x160] sm:$0x3] %vm680_vm4, %v9752_v0 }
  0xa9   : > { %722 = vst.msk [vmem:[#allocation3 + $0x158] sm:$0xff] %vm677_vm3, %v9752_v0  ;;  %724 = vst.msk [vmem:[#allocation3 + $0x168] sm:$0xff] %vm677_vm3, %v9752_v0 }
  0xaa   : > { %8345 = vmatmul.mubr.msk.f32.gmra.mrb[22].mxu1 %vm627_vm0, %v815_v19  ;;  %725 = vst.msk [vmem:[#allocation3 + $0x170] sm:$0xff] %vm677_vm3, %v9752_v0 }
  0xab   : > { %8421 = vmatmul.mubr.msk.f32.gmra.mrb[6].mxu0 %vm627_vm0, %v1482_v20  ;;  %8347 = vmatprep.mubr.msk.f32.mxu1 %vm627_vm0, %v816_v21  ;;  %726 = vst.msk [vmem:[#allocation3 + $0x178] sm:$0x3] %vm680_vm4, %v9752_v0 }
  0xac   : > { %8423 = vmatprep.mubr.msk.f32.mxu0 %vm627_vm0, %v1483_v22 }
  0xae   : > { %8348 = vmatmul.mubr.msk.f32.gmra.mrb[24].mxu1 %vm627_vm0, %v817_v23 }
  0xaf   : > { %8424 = vmatmul.mubr.msk.f32.gmra.mrb[8].mxu0 %vm627_vm0, %v1484_v24  ;;  %8350 = vmatprep.mubr.msk.f32.mxu1 %vm627_vm0, %v818_v25 }
  0xb0   : > { %8426 = vmatprep.mubr.msk.f32.mxu0 %vm627_vm0, %v1485_v26 }
  0xb2   : > { %8351 = vmatmul.mubr.msk.f32.gmra.mrb[26].mxu1 %vm627_vm0, %v819_v27 }
  0xb3   : > { %8427 = vmatmul.mubr.msk.f32.gmra.mrb[10].mxu0 %vm627_vm0, %v1486_v28  ;;  %8353 = vmatprep.mubr.msk.f32.mxu1 %vm627_vm0, %v820_v29 }
  0xb4   : > { %8429 = vmatprep.mubr.msk.f32.mxu0 %vm627_vm0, %v1487_v30 }
  0xb6   : > { %8354 = vmatmul.mubr.msk.f32.gmra.mrb[28].mxu1 %vm627_vm0, %v821_v31  ;;  %v10385_v31 = vld [vmem:[%s567_s1] ss:$0 sm:$0xff] }
  0xb7   : > { %8430 = vmatmul.mubr.msk.f32.gmra.mrb[12].mxu0 %vm627_vm0, %v1488_v32  ;;  %8356 = vmatprep.mubr.msk.f32.mxu1 %vm627_vm0, %v822_v33 }
  0xb8   : > { %8432 = vmatprep.mubr.msk.f32.mxu0 %vm627_vm0, %v1489_v34 }
  0xba   : > { %8357 = vmatmul.mubr.msk.f32.gmra.mrb[30].mxu1 %vm627_vm0, %v823_v35 }
  0xbb   : > { %8433 = vmatmul.mubr.msk.f32.gmra.mrb[14].mxu0 %vm627_vm0, %v1490_v36  ;;  %8385 = vmatprep.mubr.msk.f32.mxu1 %vm627_vm0, %v775_v37 }
  0xbc   : > { %8435 = vmatprep.mubr.msk.f32.mxu0 %vm627_vm0, %v1491_v38 }
  0xbe   : > { %8386 = vmatmul.mubr.msk.f32.vlgmr.msra.gmra.mrb[16].mxu1 %vm627_vm0, %v776_v39 }
  0xbf   : > { %8436 = vmatmul.mubr.msk.f32.gmra.mrb[16].mxu0 %vm627_vm0, %v1492_v40  ;;  %8388 = vmatprep.mubr.msk.f32.mxu1 %vm627_vm0, %v777_v41 }
  0xc0   : > { %8438 = vmatprep.mubr.msk.f32.mxu0 %vm627_vm0, %v1493_v42  ;;  %9134 = vmatpush3.bf16.msra.mxu1 %v9131_v8 }
  0xc1   : > { %9136 = vmatprep.subr.bf16.mxu1 %v9135_v11 }
  0xc2   : > { %8389 = vmatmul.mubr.msk.f32.gmra.mrb[18].mxu1 %vm627_vm0, %v778_v43 }
  0xc3   : > { %8439 = vmatmul.mubr.msk.f32.gmra.mrb[18].mxu0 %vm627_vm0, %v1494_v44  ;;  %8391 = vmatprep.mubr.msk.f32.mxu1 %vm627_vm0, %v779_v45 }
  0xc4   : > { %8441 = vmatprep.mubr.msk.f32.mxu0 %vm627_vm0, %v1495_v46  ;;  %9138 = vmatpush3.bf16.msra.mxu1 %v9135_v11 }
  0xc5   : > { %9140 = vmatprep.subr.bf16.mxu1 %v10366_v14 }
  0xc6   : > { %8392 = vmatmul.mubr.msk.f32.gmra.mrb[20].mxu1 %vm627_vm0, %v780_v47 }
  0xc7   : > { %8442 = vmatmul.mubr.msk.f32.gmra.mrb[20].mxu0 %vm627_vm0, %v1496_v48  ;;  %8394 = vmatprep.mubr.msk.f32.mxu1 %vm627_vm0, %v781_v49 }
  0xc8   : > { %8444 = vmatprep.mubr.msk.f32.mxu0 %vm627_vm0, %v1497_v50 }
  0xca   : > { %8395 = vmatmul.mubr.msk.f32.gmra.mrb[22].mxu1 %vm627_vm0, %v782_v51 }
  0xcb   : > { %8445 = vmatmul.mubr.msk.f32.gmra.mrb[22].mxu0 %vm627_vm0, %v1498_v52  ;;  %8397 = vmatprep.mubr.msk.f32.mxu1 %vm627_vm0, %v783_v53 }
  0xcc   : > { %8447 = vmatprep.mubr.msk.f32.mxu0 %vm627_vm0, %v1499_v54  ;;  %v2002_v54 = vld [vmem:[%s10262_s19 + $0x10] sm:$0xff] }
  0xce   : > { %8398 = vmatmul.mubr.msk.f32.gmra.mrb[24].mxu1 %vm627_vm0, %v784_v55  ;;  %v2003_v55 = vld [vmem:[%s10262_s19 + $0x18] sm:$0xff] }
  0xcf   : > { %8448 = vmatmul.mubr.msk.f32.gmra.mrb[24].mxu0 %vm627_vm0, %v1500_v56  ;;  %8400 = vmatprep.mubr.msk.f32.mxu1 %vm627_vm0, %v785_v57 }
  0xd0   : > { %8450 = vmatprep.mubr.msk.f32.mxu0 %vm627_vm0, %v1501_v58 }
  0xd2   : > { %8401 = vmatmul.mubr.msk.f32.gmra.mrb[26].mxu1 %vm627_vm0, %v786_v59 }
  0xd3   : > { %8451 = vmatmul.mubr.msk.f32.gmra.mrb[26].mxu0 %vm627_vm0, %v1502_v60  ;;  %8403 = vmatprep.mubr.msk.f32.mxu1 %vm627_vm0, %v787_v61 }
  0xd4   : > { %8453 = vmatprep.mubr.msk.f32.mxu0 %vm627_vm0, %v1503_v62 }
  0xd6   : > { %8404 = vmatmul.mubr.msk.f32.gmra.mrb[28].mxu1 %vm627_vm0, %v788_v63  ;;  %v9143_v63 = vpack.c.bf16 %v2003_v55, %v2002_v54 }
  0xd7   : > { %8454 = vmatmul.mubr.msk.f32.gmra.mrb[28].mxu0 %vm627_vm0, %v1504_v1  ;;  %8406 = vmatprep.mubr.msk.f32.mxu1 %vm627_vm0, %v789_v2 }
  0xd8   : > { %8456 = vmatprep.mubr.msk.f32.mxu0 %vm627_vm0, %v1505_v3 }
  0xda   : > { %8407 = vmatmul.mubr.msk.f32.gmra.mrb[30].mxu1 %vm627_vm0, %v790_v4  ;;  %v7419_v4 = vld [vmem:[%s10262_s19 + $0x40] sm:$0xff] }
  0xdb   : > { %8457 = vmatmul.mubr.msk.f32.gmra.mrb[30].mxu0 %vm627_vm0, %v1506_v5  ;;  %v7420_v5 = vld [vmem:[%s10262_s19 + $0x48] sm:$0xff] }
  0xdc   : > { %v10450_v13 = vpack.c.bf16 %v7420_v5, %v7419_v4 }
 0x151   : > { %v8313_v15 = vpop.f32.mrb[0].mxu1 }
 0x152   : > { %v992_v16 = vpop.f32.mrb[1].mxu1 }
 0x155   : > { %v8316_v17 = vpop.f32.mrb[2].mxu1 }
 0x156   : > { %v1002_v18 = vpop.f32.mrb[3].mxu1 }
 0x159   : > { %v8319_v19 = vpop.f32.mrb[4].mxu1 }
 0x15a   : > { %v1012_v20 = vpop.f32.mrb[5].mxu1 }
 0x15d   : > { %v8322_v21 = vpop.f32.mrb[6].mxu1 }
 0x15e   : > { %v1022_v0 = vpop.f32.mrb[7].mxu1 }
 0x161   : > { %v8325_v22 = vpop.f32.mrb[8].mxu1 }
 0x162   : > { %v1032_v23 = vpop.f32.mrb[9].mxu1 }
 0x165   : > { %v10369_v24 = vpop.f32.mrb[10].mxu1 }
 0x166   : > { %v10371_v25 = vpop.f32.mrb[11].mxu1 }
 0x169   : > { %v10373_v26 = vpop.f32.mrb[12].mxu1 }
 0x16a   : > { %v10375_v27 = vpop.f32.mrb[13].mxu1 }
 0x16d   : > { %v10377_v28 = vpop.f32.mrb[14].mxu1 }
 0x16e   : > { %v10379_v29 = vpop.f32.mrb[15].mxu1 }
 0x172   : > { %v8413_v30 = vpop.f32.mrb[0].mxu0 }
 0x173   : > { %v9229_v32 = vadd.f32 %v8413_v30, %v8313_v15  ;;  %v1674_v33 = vpop.f32.mrb[1].mxu0 }
 0x174   : > { %v9230_v34 = vadd.f32 %v1674_v33, %v992_v16 }
 0x175   : > { %v10388_v35 = vadd.f32 %v9229_v32, %v10385_v31 }
 0x176   : > { %v10391_v36 = vadd.f32 %v9230_v34, %v10385_v31  ;;  %v8416_v37 = vpop.f32.mrb[2].mxu0 }
 0x177   : > { %v1905_v38 = vmax.f32 %v10388_v35, 0.0  ;;  %v9231_v39 = vadd.f32 %v8416_v37, %v8316_v17  ;;  %v1684_v40 = vpop.f32.mrb[3].mxu0 }
 0x178   : > { %v1904_v41 = vmax.f32 %v10391_v36, 0.0  ;;  %v9232_v42 = vadd.f32 %v1684_v40, %v1002_v18 }
 0x179   : > { %1937 = vst.msk [vmem:[#allocation3 + $0x9] sm:$0xff] %vm677_vm3, %v1905_v38  ;;  %v10399_v43 = vadd.f32 %v9231_v39, %v10385_v31 }
 0x17a   : > { %1936 = vst.msk [vmem:[#allocation3 + $0x1] sm:$0xff] %vm677_vm3, %v1904_v41  ;;  %v10405_v44 = vadd.f32 %v9232_v42, %v10385_v31  ;;  %v8419_v45 = vpop.f32.mrb[4].mxu0 }
 0x17b   : > { %v1907_v46 = vmax.f32 %v10399_v43, 0.0  ;;  %v9233_v47 = vadd.f32 %v8419_v45, %v8319_v19  ;;  %v1694_v48 = vpop.f32.mrb[5].mxu0 }
 0x17c   : > { %v1906_v49 = vmax.f32 %v10405_v44, 0.0  ;;  %v9234_v50 = vadd.f32 %v1694_v48, %v1012_v20 }
 0x17d   : > { %1939 = vst.msk [vmem:[#allocation3 + $0x21] sm:$0xff] %vm677_vm3, %v1907_v46  ;;  %v10413_v51 = vadd.f32 %v9233_v47, %v10385_v31 }
 0x17e   : > { %1938 = vst.msk [vmem:[#allocation3 + $0x19] sm:$0xff] %vm677_vm3, %v1906_v49  ;;  %v10419_v52 = vadd.f32 %v9234_v50, %v10385_v31  ;;  %v8422_v53 = vpop.f32.mrb[6].mxu0 }
 0x17f   : > { %v1909_v56 = vmax.f32 %v10413_v51, 0.0  ;;  %v9235_v57 = vadd.f32 %v8422_v53, %v8322_v21  ;;  %v1704_v58 = vpop.f32.mrb[7].mxu0 }
 0x180   : > { %v1908_v59 = vmax.f32 %v10419_v52, 0.0  ;;  %v9236_v60 = vadd.f32 %v1704_v58, %v1022_v0  ;;  %v2005_v3 = vld [vmem:[#allocation3 + $0x9] sm:$0xff] }
 0x181   : > { %1941 = vst.msk [vmem:[#allocation3 + $0x39] sm:$0xff] %vm677_vm3, %v1909_v56  ;;  %v10429_v61 = vadd.f32 %v9235_v57, %v10385_v31  ;;  %v2004_v62 = vld [vmem:[#allocation3 + $0x1] sm:$0xff] }
 0x182   : > { %1940 = vst.msk [vmem:[#allocation3 + $0x31] sm:$0xff] %vm677_vm3, %v1908_v59  ;;  %v10435_v1 = vadd.f32 %v9236_v60, %v10385_v31  ;;  %v8425_v2 = vpop.f32.mrb[8].mxu0  ;;  %8467 = vmatprep.mubr.msk.f32.mxu1 %vm677_vm3, %v2004_v62 }
 0x183   : > { %v1911_v6 = vmax.f32 %v10429_v61, 0.0  ;;  %v9237_v7 = vadd.f32 %v8425_v2, %v8325_v22  ;;  %v1714_v8 = vpop.f32.mrb[9].mxu0  ;;  %8468 = vmatmul.mubr.msk.f32.vlgmr.msra.gmra.mrb[32].mxu1 %vm677_vm3, %v2005_v3 }
 0x184   : > { %v1910_v9 = vmax.f32 %v10435_v1, 0.0  ;;  %v9238_v10 = vadd.f32 %v1714_v8, %v1032_v23  ;;  %9142 = vmatpush3.bf16.msra.mxu1 %v10366_v14  ;;  %v2007_v14 = vld [vmem:[#allocation3 + $0x21] sm:$0xff] }
 0x185   : > { %1943 = vst.msk [vmem:[#allocation3 + $0x51] sm:$0xff] %vm677_vm3, %v1911_v6  ;;  %v10448_v11 = vadd.f32 %v9237_v7, %v10385_v31  ;;  %v2006_v12 = vld [vmem:[#allocation3 + $0x19] sm:$0xff]  ;;  %9144 = vmatprep.subr.bf16.mxu1 %v9143_v63 }
 0x186   : > { %1942 = vst.msk [vmem:[#allocation3 + $0x49] sm:$0xff] %vm677_vm3, %v1910_v9  ;;  %v10456_v15 = vadd.f32 %v9238_v10, %v10385_v31  ;;  %v8428_v16 = vpop.f32.mrb[10].mxu0  ;;  %8470 = vmatprep.mubr.msk.f32.mxu1 %vm677_vm3, %v2006_v12 }
 0x187   : > { %v1913_v17 = vmax.f32 %v10448_v11, 0.0  ;;  %v9239_v18 = vadd.f32 %v8428_v16, %v10369_v24  ;;  %v1724_v19 = vpop.f32.mrb[11].mxu0  ;;  %8471 = vmatmul.mubr.msk.f32.gmra.mrb[34].mxu1 %vm677_vm3, %v2007_v14 }
 0x188   : > { %v1912_v20 = vmax.f32 %v10456_v15, 0.0  ;;  %v9240_v21 = vadd.f32 %v1724_v19, %v10371_v25  ;;  %9146 = vmatpush3.bf16.msra.mxu1 %v9143_v63  ;;  %v2009_v25 = vld [vmem:[#allocation3 + $0x39] sm:$0xff] }
 0x189   : > { %1945 = vst.msk [vmem:[#allocation3 + $0x69] sm:$0xff] %vm677_vm3, %v1913_v17  ;;  %v10468_v0 = vadd.f32 %v9239_v18, %v10385_v31  ;;  %v2008_v22 = vld [vmem:[#allocation3 + $0x31] sm:$0xff]  ;;  %9148 = vmatprep.subr.bf16.mxu1 %v10450_v13 }
 0x18a   : > { %1944 = vst.msk [vmem:[#allocation3 + $0x61] sm:$0xff] %vm677_vm3, %v1912_v20  ;;  %v10475_v23 = vadd.f32 %v9240_v21, %v10385_v31  ;;  %v8431_v24 = vpop.f32.mrb[12].mxu0  ;;  %8473 = vmatprep.mubr.msk.f32.mxu1 %vm677_vm3, %v2008_v22 }
 0x18b   : > { %v1915_v30 = vmax.f32 %v10468_v0, 0.0  ;;  %v9241_v32 = vadd.f32 %v8431_v24, %v10373_v26  ;;  %v1734_v33 = vpop.f32.mrb[13].mxu0  ;;  %8474 = vmatmul.mubr.msk.f32.gmra.mrb[36].mxu1 %vm677_vm3, %v2009_v25 }
 0x18c   : > { %v1914_v34 = vmax.f32 %v10475_v23, 0.0  ;;  %v9242_v37 = vadd.f32 %v1734_v33, %v10375_v27  ;;  %v2011_v45 = vld [vmem:[#allocation3 + $0x51] sm:$0xff] }
 0x18d   : > { %1947 = vst.msk [vmem:[#allocation3 + $0x81] sm:$0xff] %vm677_vm3, %v1915_v30  ;;  %v10487_v39 = vadd.f32 %v9241_v32, %v10385_v31  ;;  %v2010_v40 = vld [vmem:[#allocation3 + $0x49] sm:$0xff] }
 0x18e   : > { %1946 = vst.msk [vmem:[#allocation3 + $0x79] sm:$0xff] %vm677_vm3, %v1914_v34  ;;  %v10493_v26 = vadd.f32 %v9242_v37, %v10385_v31  ;;  %v8434_v42 = vpop.f32.mrb[14].mxu0  ;;  %8476 = vmatprep.mubr.msk.f32.mxu1 %vm677_vm3, %v2010_v40 }
 0x18f   : > { %v1917_v27 = vmax.f32 %v10487_v39, 0.0  ;;  %v9243_v47 = vadd.f32 %v8434_v42, %v10377_v28  ;;  %v1744_v48 = vpop.f32.mrb[15].mxu0  ;;  %8477 = vmatmul.mubr.msk.f32.gmra.mrb[38].mxu1 %vm677_vm3, %v2011_v45 }
 0x190   : > { %v1916_v50 = vmax.f32 %v10493_v26, 0.0  ;;  %v9244_v53 = vadd.f32 %v1744_v48, %v10379_v29  ;;  %v2013_v29 = vld [vmem:[#allocation3 + $0x69] sm:$0xff] }
 0x191   : > { %1949 = vst.msk [vmem:[#allocation3 + $0x99] sm:$0xff] %vm677_vm3, %v1917_v27  ;;  %v10505_v54 = vadd.f32 %v9243_v47, %v10385_v31  ;;  %v2012_v55 = vld [vmem:[#allocation3 + $0x61] sm:$0xff]  ;;  %v8387_v57 = vpop.f32.mrb[16].mxu1 }
 0x192   : > { %1948 = vst.msk [vmem:[#allocation3 + $0x91] sm:$0xff] %vm677_vm3, %v1916_v50  ;;  %v10511_v28 = vadd.f32 %v9244_v53, %v10385_v31  ;;  %v8437_v58 = vpop.f32.mrb[16].mxu0  ;;  %8479 = vmatprep.mubr.msk.f32.mxu1 %vm677_vm3, %v2012_v55  ;;  %v1396_v63 = vpop.f32.mrb[17].mxu1 }
 0x193   : > { %v11748_v60 = vmax.f32 %v10505_v54, 0.0  ;;  %v9245_v62 = vadd.f32 %v8437_v58, %v8387_v57  ;;  %v1754_v2 = vpop.f32.mrb[17].mxu0  ;;  %8480 = vmatmul.mubr.msk.f32.gmra.mrb[40].mxu1 %vm677_vm3, %v2013_v29  ;;  %v11780_v26 = vmax.f32 %v10505_v54, 0.0 }
 0x194   : > { %v11747_v3 = vmax.f32 %v10511_v28, 0.0  ;;  %v9246_v4 = vadd.f32 %v1754_v2, %v1396_v63  ;;  %v2015_v16 = vld [vmem:[#allocation3 + $0x81] sm:$0xff] }
 0x195   : > { %1951 = vst.msk [vmem:[#allocation3 + $0xb1] sm:$0xff] %vm677_vm3, %v11748_v60  ;;  %v10521_v5 = vadd.f32 %v9245_v62, %v10385_v31  ;;  %v2014_v7 = vld [vmem:[#allocation3 + $0x79] sm:$0xff]  ;;  %v8390_v10 = vpop.f32.mrb[18].mxu1 }
 0x196   : > { %1950 = vst.msk [vmem:[#allocation3 + $0xa9] sm:$0xff] %vm677_vm3, %v11747_v3  ;;  %v10527_v8 = vadd.f32 %v9246_v4, %v10385_v31  ;;  %v8440_v12 = vpop.f32.mrb[18].mxu0  ;;  %8482 = vmatprep.mubr.msk.f32.mxu1 %vm677_vm3, %v2014_v7  ;;  %v1406_v19 = vpop.f32.mrb[19].mxu1  ;;  %v7525_v3 = vld [vmem:[%s10663_s15 + $0x48] sm:$0xff] }
 0x197   : > { %v11746_v14 = vmax.f32 %v10521_v5, 0.0  ;;  %v9247_v18 = vadd.f32 %v8440_v12, %v8390_v10  ;;  %v1764_v21 = vpop.f32.mrb[19].mxu0  ;;  %8483 = vmatmul.mubr.msk.f32.gmra.mrb[42].mxu1 %vm677_vm3, %v2015_v16 }
 0x198   : > { %v11745_v22 = vmax.f32 %v10527_v8, 0.0  ;;  %v9248_v24 = vadd.f32 %v1764_v21, %v1406_v19  ;;  %v2017_v42 = vld [vmem:[#allocation3 + $0x99] sm:$0xff] }
 0x199   : > { %1953 = vst.msk [vmem:[#allocation3 + $0xc9] sm:$0xff] %vm677_vm3, %v11746_v14  ;;  %v10537_v25 = vadd.f32 %v9247_v18, %v10385_v31  ;;  %v2016_v32 = vld [vmem:[#allocation3 + $0x91] sm:$0xff]  ;;  %v8393_v37 = vpop.f32.mrb[20].mxu1 }
 0x19a   : > { %1952 = vst.msk [vmem:[#allocation3 + $0xc1] sm:$0xff] %vm677_vm3, %v11745_v22  ;;  %v10543_v33 = vadd.f32 %v9248_v24, %v10385_v31  ;;  %v8443_v40 = vpop.f32.mrb[20].mxu0  ;;  %8485 = vmatprep.mubr.msk.f32.mxu1 %vm677_vm3, %v2016_v32  ;;  %v1416_v48 = vpop.f32.mrb[21].mxu1 }
 0x19b   : > { %v11744_v45 = vmax.f32 %v10537_v25, 0.0  ;;  %v9249_v47 = vadd.f32 %v8443_v40, %v8393_v37  ;;  %v1774_v53 = vpop.f32.mrb[21].mxu0  ;;  %8486 = vmatmul.mubr.msk.f32.gmra.mrb[44].mxu1 %vm677_vm3, %v2017_v42 }
 0x19c   : > { %v11743_v55 = vmax.f32 %v10543_v33, 0.0  ;;  %v9250_v57 = vadd.f32 %v1774_v53, %v1416_v48  ;;  %v2019_v4 = vld [vmem:[#allocation3 + $0xb1] sm:$0xff] }
 0x19d   : > { %1955 = vst.msk [vmem:[#allocation3 + $0xe1] sm:$0xff] %vm677_vm3, %v11744_v45  ;;  %v10553_v58 = vadd.f32 %v9249_v47, %v10385_v31  ;;  %v2018_v29 = vld [vmem:[#allocation3 + $0xa9] sm:$0xff]  ;;  %v8396_v63 = vpop.f32.mrb[22].mxu1  ;;  %v1971_v45 = vld [vmem:[#allocation3 + $0x20] sm:$0xff] }
 0x19e   : > { %1954 = vst.msk [vmem:[#allocation3 + $0xd9] sm:$0xff] %vm677_vm3, %v11743_v55  ;;  %v10559_v62 = vadd.f32 %v9250_v57, %v10385_v31  ;;  %v8446_v2 = vpop.f32.mrb[22].mxu0  ;;  %8488 = vmatprep.mubr.msk.f32.mxu1 %vm677_vm3, %v2018_v29  ;;  %v1426_v12 = vpop.f32.mrb[23].mxu1  ;;  %v1970_v55 = vld [vmem:[#allocation3 + $0x18] sm:$0xff] }
 0x19f   : > { %v11737_v7 = vmax.f32 %v10553_v58, 0.0  ;;  %v9251_v10 = vadd.f32 %v8446_v2, %v8396_v63  ;;  %v1784_v16 = vpop.f32.mrb[23].mxu0  ;;  %8489 = vmatmul.mubr.msk.f32.gmra.mrb[46].mxu1 %vm677_vm3, %v2019_v4 }
 0x1a0   : > { %v11736_v18 = vmax.f32 %v10559_v62, 0.0  ;;  %v9252_v19 = vadd.f32 %v1784_v16, %v1426_v12  ;;  %v2021_v42 = vld [vmem:[#allocation3 + $0xc9] sm:$0xff] }
 0x1a1   : > { %1957 = vst.msk [vmem:[#allocation3 + $0xf9] sm:$0xff] %vm677_vm3, %v11737_v7  ;;  %v10569_v21 = vadd.f32 %v9251_v10, %v10385_v31  ;;  %v2020_v24 = vld [vmem:[#allocation3 + $0xc1] sm:$0xff]  ;;  %v8399_v37 = vpop.f32.mrb[24].mxu1 }
 0x1a2   : > { %1956 = vst.msk [vmem:[#allocation3 + $0xf1] sm:$0xff] %vm677_vm3, %v11736_v18  ;;  %v10575_v32 = vadd.f32 %v9252_v19, %v10385_v31  ;;  %v8449_v40 = vpop.f32.mrb[24].mxu0  ;;  %8491 = vmatprep.mubr.msk.f32.mxu1 %vm677_vm3, %v2020_v24  ;;  %v1436_v53 = vpop.f32.mrb[25].mxu1 }
 0x1a3   : > { %v11733_v47 = vmax.f32 %v10569_v21, 0.0  ;;  %v9253_v48 = vadd.f32 %v8449_v40, %v8399_v37  ;;  %v1794_v57 = vpop.f32.mrb[25].mxu0  ;;  %8492 = vmatmul.mubr.msk.f32.gmra.mrb[48].mxu1 %vm677_vm3, %v2021_v42 }
 0x1a4   : > { %v11732_v29 = vmax.f32 %v10575_v32, 0.0  ;;  %v9254_v63 = vadd.f32 %v1794_v57, %v1436_v53  ;;  %v2023_v19 = vld [vmem:[#allocation3 + $0xe1] sm:$0xff] }
 0x1a5   : > { %1959 = vst.msk [vmem:[#allocation3 + $0x111] sm:$0xff] %vm677_vm3, %v11733_v47  ;;  %v10585_v2 = vadd.f32 %v9253_v48, %v10385_v31  ;;  %v2022_v4 = vld [vmem:[#allocation3 + $0xd9] sm:$0xff]  ;;  %v8402_v12 = vpop.f32.mrb[26].mxu1 }
 0x1a6   : > { %1958 = vst.msk [vmem:[#allocation3 + $0x109] sm:$0xff] %vm677_vm3, %v11732_v29  ;;  %v10591_v10 = vadd.f32 %v9254_v63, %v10385_v31  ;;  %v8452_v16 = vpop.f32.mrb[26].mxu0  ;;  %8494 = vmatprep.mubr.msk.f32.mxu1 %vm677_vm3, %v2022_v4  ;;  %v1446_v40 = vpop.f32.mrb[27].mxu1 }
 0x1a7   : > { %v11731_v24 = vmax.f32 %v10585_v2, 0.0  ;;  %v9255_v37 = vadd.f32 %v8452_v16, %v8402_v12  ;;  %v1804_v42 = vpop.f32.mrb[27].mxu0  ;;  %8495 = vmatmul.mubr.msk.f32.gmra.mrb[50].mxu1 %vm677_vm3, %v2023_v19 }
 0x1a8   : > { %v11734_v48 = vmax.f32 %v10591_v10, 0.0  ;;  %v9256_v53 = vadd.f32 %v1804_v42, %v1446_v40  ;;  %v2025_v19 = vld [vmem:[#allocation3 + $0xf9] sm:$0xff] }
 0x1a9   : > { %1961 = vst.msk [vmem:[#allocation3 + $0x129] sm:$0xff] %vm677_vm3, %v11731_v24  ;;  %v10601_v57 = vadd.f32 %v9255_v37, %v10385_v31  ;;  %v2024_v63 = vld [vmem:[#allocation3 + $0xf1] sm:$0xff]  ;;  %v8405_v12 = vpop.f32.mrb[28].mxu1 }
 0x1aa   : > { %1960 = vst.msk [vmem:[#allocation3 + $0x121] sm:$0xff] %vm677_vm3, %v11734_v48  ;;  %v10607_v4 = vadd.f32 %v9256_v53, %v10385_v31  ;;  %v8455_v16 = vpop.f32.mrb[28].mxu0  ;;  %8497 = vmatprep.mubr.msk.f32.mxu1 %vm677_vm3, %v2024_v63  ;;  %v1456_v24 = vpop.f32.mrb[29].mxu1 }
 0x1ab   : > { %v11735_v40 = vmax.f32 %v10601_v57, 0.0  ;;  %v9257_v42 = vadd.f32 %v8455_v16, %v8405_v12  ;;  %v1814_v29 = vpop.f32.mrb[29].mxu0  ;;  %8498 = vmatmul.mubr.msk.f32.gmra.mrb[52].mxu1 %vm677_vm3, %v2025_v19 }
 0x1ac   : > { %v11738_v37 = vmax.f32 %v10607_v4, 0.0  ;;  %v9258_v47 = vadd.f32 %v1814_v29, %v1456_v24  ;;  %v2027_v29 = vld [vmem:[#allocation3 + $0x111] sm:$0xff] }
 0x1ad   : > { %1963 = vst.msk [vmem:[#allocation3 + $0x141] sm:$0xff] %vm677_vm3, %v11735_v40  ;;  %v10617_v53 = vadd.f32 %v9257_v42, %v10385_v31  ;;  %v2026_v48 = vld [vmem:[#allocation3 + $0x109] sm:$0xff]  ;;  %v8408_v12 = vpop.f32.mrb[30].mxu1 }
 0x1ae   : > { %1962 = vst.msk [vmem:[#allocation3 + $0x139] sm:$0xff] %vm677_vm3, %v11738_v37  ;;  %v10623_v63 = vadd.f32 %v9258_v47, %v10385_v31  ;;  %v8458_v16 = vpop.f32.mrb[30].mxu0  ;;  %8500 = vmatprep.mubr.msk.f32.mxu1 %vm677_vm3, %v2026_v48  ;;  %v1466_v40 = vpop.f32.mrb[31].mxu1 }
 0x1af   : > { %v11742_v24 = vmax.f32 %v10617_v53, 0.0  ;;  %v9259_v19 = vadd.f32 %v8458_v16, %v8408_v12  ;;  %v1824_v18 = vpop.f32.mrb[31].mxu0  ;;  %8501 = vmatmul.mubr.msk.f32.gmra.mrb[54].mxu1 %vm677_vm3, %v2027_v29 }
 0x1b0   : > { %v11741_v42 = vmax.f32 %v10623_v63, 0.0  ;;  %v9260_v7 = vadd.f32 %v1824_v18, %v1466_v40  ;;  %v2029_v12 = vld [vmem:[#allocation3 + $0x129] sm:$0xff] }
 0x1b1   : > { %1965 = vst.msk [vmem:[#allocation3 + $0x159] sm:$0xff] %vm677_vm3, %v11742_v24  ;;  %v10633_v47 = vadd.f32 %v9259_v19, %v10385_v31  ;;  %v2028_v37 = vld [vmem:[#allocation3 + $0x121] sm:$0xff] }
 0x1b2   : > { %1964 = vst.msk [vmem:[#allocation3 + $0x151] sm:$0xff] %vm677_vm3, %v11741_v42  ;;  %v10639_v48 = vadd.f32 %v9260_v7, %v10385_v31  ;;  %8503 = vmatprep.mubr.msk.f32.mxu1 %vm677_vm3, %v2028_v37  ;;  %v7459_v42 = vld [vmem:[%s10663_s15 + $0x38] sm:$0xff]  ;;  %v1969_v24 = vld [vmem:[#allocation3 + $0x8] sm:$0xff] }
 0x1b3   : > { %v11739_v18 = vmax.f32 %v10633_v47, 0.0  ;;  %8504 = vmatmul.mubr.msk.f32.gmra.mrb[56].mxu1 %vm677_vm3, %v2029_v12  ;;  %v7421_v12 = vld [vmem:[%s10262_s19 + $0x50] sm:$0xff] }
 0x1b4   : > { %v11740_v40 = vmax.f32 %v10639_v48, 0.0  ;;  %v2031_v31 = vld [vmem:[#allocation3 + $0x141] sm:$0xff] }
 0x1b5   : > { %1967 = vst.msk [vmem:[#allocation3 + $0x171] sm:$0xff] %vm677_vm3, %v11739_v18  ;;  %v2030_v16 = vld [vmem:[#allocation3 + $0x139] sm:$0xff] }
 0x1b6   : > { %1966 = vst.msk [vmem:[#allocation3 + $0x169] sm:$0xff] %vm677_vm3, %v11740_v40  ;;  %8506 = vmatprep.mubr.msk.f32.mxu1 %vm677_vm3, %v2030_v16  ;;  %v7422_v18 = vld [vmem:[%s10262_s19 + $0x58] sm:$0xff]  ;;  %v1968_v40 = vld [vmem:[#allocation3] sm:$0xff]  ;;  %s10851_s19 = scalar_lea.vmem %s11719_s7, %s10256_s12 }
 0x1b7   : > { %8507 = vmatmul.mubr.msk.f32.gmra.mrb[58].mxu1 %vm677_vm3, %v2031_v31  ;;  %v7456_v16 = vld [vmem:[%s10663_s15 + $0x20] sm:$0xff]  ;;  %v7457_v31 = vld [vmem:[%s10663_s15 + $0x28] sm:$0xff] }
 0x1b8   : > { %v2033_v37 = vld [vmem:[#allocation3 + $0x159] sm:$0xff] }
 0x1b9   : > { %v2032_v7 = vld [vmem:[#allocation3 + $0x151] sm:$0xff] }
 0x1ba   : > { %8509 = vmatprep.mubr.msk.f32.mxu1 %vm677_vm3, %v2032_v7  ;;  %v7458_v7 = vld [vmem:[%s10663_s15 + $0x30] sm:$0xff] }
 0x1bb   : > { %8510 = vmatmul.mubr.msk.f32.gmra.mrb[60].mxu1 %vm677_vm3, %v2033_v37  ;;  %v9151_v37 = vpack.c.bf16 %v7422_v18, %v7421_v12  ;;  %v1977_v18 = vld [vmem:[#allocation3 + $0x68] sm:$0xff]  ;;  %v1979_v12 = vld [vmem:[#allocation3 + $0x80] sm:$0xff] }
 0x1bc   : > { %v2035_v19 = vld [vmem:[#allocation3 + $0x171] sm:$0xff] }
 0x1bd   : > { %v2034_v29 = vld [vmem:[#allocation3 + $0x169] sm:$0xff] }
 0x1be   : > { %8512 = vmatprep.mubr.msk.f32.mxu1 %vm677_vm3, %v2034_v29  ;;  %v9155_v29 = vpack.c.bf16 %v7457_v31, %v7456_v16  ;;  %v1980_v16 = vld [vmem:[#allocation3 + $0x90] sm:$0xff]  ;;  %v1981_v31 = vld [vmem:[#allocation3 + $0x98] sm:$0xff] }
 0x1bf   : > { %8513 = vmatmul.mubr.msk.f32.gmra.mrb[62].mxu1 %vm677_vm3, %v2035_v19  ;;  %v9159_v19 = vpack.c.bf16 %v7459_v42, %v7458_v7  ;;  %v1973_v42 = vld [vmem:[#allocation3 + $0x38] sm:$0xff]  ;;  %v1982_v7 = vld [vmem:[#allocation3 + $0xa8] sm:$0xff] }
 0x1c0   : > { %8523 = vmatprep.mubr.msk.f32.mxu1 %vm677_vm3, %v1968_v40  ;;  %9156 = vmatprep.subr.bf16.mxu0 %v9155_v29  ;;  %v1972_v40 = vld [vmem:[#allocation3 + $0x30] sm:$0xff] }
 0x1c1   : > { %9158 = vmatpush3.bf16.msra.mxu0 %v9155_v29  ;;  %v1984_v29 = vld [vmem:[#allocation3 + $0xc0] sm:$0xff] }
 0x1c2   : > { %9160 = vmatprep.subr.bf16.mxu0 %v9159_v19 }
 0x1c3   : > { %8524 = vmatmul.mubr.msk.f32.vlgmr.msra.gmra.mrb[32].mxu1 %vm677_vm3, %v1969_v24  ;;  %v1974_v24 = vld [vmem:[#allocation3 + $0x48] sm:$0xff] }
 0x1c4   : > { %9150 = vmatpush3.bf16.msra.mxu1 %v10450_v13  ;;  %8526 = vmatprep.mubr.msk.f32.mxu1 %vm677_vm3, %v1970_v55  ;;  %v1975_v13 = vld [vmem:[#allocation3 + $0x50] sm:$0xff]  ;;  %v1976_v55 = vld [vmem:[#allocation3 + $0x60] sm:$0xff] }
 0x1c5   : > { %9152 = vmatprep.subr.bf16.mxu1 %v9151_v37  ;;  %9162 = vmatpush3.bf16.msra.mxu0 %v9159_v19  ;;  %v1985_v19 = vld [vmem:[#allocation3 + $0xc8] sm:$0xff] }
 0x1c7   : > { %8527 = vmatmul.mubr.msk.f32.gmra.mrb[34].mxu1 %vm677_vm3, %v1971_v45  ;;  %v1978_v45 = vld [vmem:[#allocation3 + $0x78] sm:$0xff] }
 0x1c8   : > { %8529 = vmatprep.mubr.msk.f32.mxu1 %vm677_vm3, %v1972_v40  ;;  %9154 = vmatpush3.bf16.msra.mxu1 %v9151_v37  ;;  %v1983_v37 = vld [vmem:[#allocation3 + $0xb0] sm:$0xff]  ;;  %v1986_v40 = vld [vmem:[#allocation3 + $0xd8] sm:$0xff] }
 0x1cb   : > { %8530 = vmatmul.mubr.msk.f32.gmra.mrb[36].mxu1 %vm677_vm3, %v1973_v42  ;;  %v1987_v42 = vld [vmem:[#allocation3 + $0xe0] sm:$0xff] }
 0x1cc   : > { %8532 = vmatprep.mubr.msk.f32.mxu1 %vm677_vm3, %v1974_v24  ;;  %v1988_v24 = vld [vmem:[#allocation3 + $0xf0] sm:$0xff] }
 0x1cf   : > { %8533 = vmatmul.mubr.msk.f32.gmra.mrb[38].mxu1 %vm677_vm3, %v1975_v13  ;;  %v1989_v13 = vld [vmem:[#allocation3 + $0xf8] sm:$0xff] }
 0x1d0   : > { %8535 = vmatprep.mubr.msk.f32.mxu1 %vm677_vm3, %v1976_v55  ;;  %v1990_v55 = vld [vmem:[#allocation3 + $0x108] sm:$0xff] }
 0x1d3   : > { %8536 = vmatmul.mubr.msk.f32.gmra.mrb[40].mxu1 %vm677_vm3, %v1977_v18  ;;  %v1991_v18 = vld [vmem:[#allocation3 + $0x110] sm:$0xff] }
 0x1d4   : > { %8538 = vmatprep.mubr.msk.f32.mxu1 %vm677_vm3, %v1978_v45  ;;  %v1992_v45 = vld [vmem:[#allocation3 + $0x120] sm:$0xff] }
 0x1d7   : > { %8539 = vmatmul.mubr.msk.f32.gmra.mrb[42].mxu1 %vm677_vm3, %v1979_v12  ;;  %v1993_v12 = vld [vmem:[#allocation3 + $0x128] sm:$0xff] }
 0x1d8   : > { %8541 = vmatprep.mubr.msk.f32.mxu1 %vm677_vm3, %v1980_v16  ;;  %v1994_v16 = vld [vmem:[#allocation3 + $0x138] sm:$0xff] }
 0x1db   : > { %8542 = vmatmul.mubr.msk.f32.gmra.mrb[44].mxu1 %vm677_vm3, %v1981_v31  ;;  %v1995_v31 = vld [vmem:[#allocation3 + $0x140] sm:$0xff] }
 0x1dc   : > { %8544 = vmatprep.mubr.msk.f32.mxu1 %vm677_vm3, %v1982_v7  ;;  %v1996_v7 = vld [vmem:[#allocation3 + $0x150] sm:$0xff] }
 0x1df   : > { %8545 = vmatmul.mubr.msk.f32.gmra.mrb[46].mxu1 %vm677_vm3, %v1983_v37  ;;  %v1997_v37 = vld [vmem:[#allocation3 + $0x158] sm:$0xff] }
 0x1e0   : > { %8547 = vmatprep.mubr.msk.f32.mxu1 %vm677_vm3, %v1984_v29  ;;  %v1998_v29 = vld [vmem:[#allocation3 + $0x168] sm:$0xff] }
 0x1e3   : > { %8548 = vmatmul.mubr.msk.f32.gmra.mrb[48].mxu1 %vm677_vm3, %v1985_v19  ;;  %v1999_v19 = vld [vmem:[#allocation3 + $0x170] sm:$0xff] }
 0x1e4   : > { %8550 = vmatprep.mubr.msk.f32.mxu1 %vm677_vm3, %v1986_v40  ;;  %v2683_v40 = vld [vmem:[#allocation3 + $0x2] sm:$0xff] }
 0x1e7   : > { %8551 = vmatmul.mubr.msk.f32.gmra.mrb[50].mxu1 %vm677_vm3, %v1987_v42  ;;  %v2684_v42 = vld [vmem:[#allocation3 + $0xa] sm:$0xff] }
 0x1e8   : > { %8553 = vmatprep.mubr.msk.f32.mxu1 %vm677_vm3, %v1988_v24  ;;  %v2685_v24 = vld [vmem:[#allocation3 + $0x1a] sm:$0xff] }
 0x1eb   : > { %8554 = vmatmul.mubr.msk.f32.gmra.mrb[52].mxu1 %vm677_vm3, %v1989_v13  ;;  %v2686_v13 = vld [vmem:[#allocation3 + $0x22] sm:$0xff] }
 0x1ec   : > { %8556 = vmatprep.mubr.msk.f32.mxu1 %vm677_vm3, %v1990_v55  ;;  %v2687_v55 = vld [vmem:[#allocation3 + $0x32] sm:$0xff] }
 0x1ef   : > { %8557 = vmatmul.mubr.msk.f32.gmra.mrb[54].mxu1 %vm677_vm3, %v1991_v18  ;;  %v2688_v18 = vld [vmem:[#allocation3 + $0x3a] sm:$0xff] }
 0x1f0   : > { %8559 = vmatprep.mubr.msk.f32.mxu1 %vm677_vm3, %v1992_v45  ;;  %v2689_v45 = vld [vmem:[#allocation3 + $0x4a] sm:$0xff] }
 0x1f3   : > { %8560 = vmatmul.mubr.msk.f32.gmra.mrb[56].mxu1 %vm677_vm3, %v1993_v12  ;;  %v2690_v12 = vld [vmem:[#allocation3 + $0x52] sm:$0xff] }
 0x1f4   : > { %8562 = vmatprep.mubr.msk.f32.mxu1 %vm677_vm3, %v1994_v16  ;;  %v2691_v16 = vld [vmem:[#allocation3 + $0x62] sm:$0xff] }
 0x1f7   : > { %8563 = vmatmul.mubr.msk.f32.gmra.mrb[58].mxu1 %vm677_vm3, %v1995_v31  ;;  %v2692_v31 = vld [vmem:[#allocation3 + $0x6a] sm:$0xff] }
 0x1f8   : > { %8565 = vmatprep.mubr.msk.f32.mxu1 %vm677_vm3, %v1996_v7  ;;  %v2693_v7 = vld [vmem:[#allocation3 + $0x7a] sm:$0xff] }
 0x1fb   : > { %8566 = vmatmul.mubr.msk.f32.gmra.mrb[60].mxu1 %vm677_vm3, %v1997_v37  ;;  %v2694_v37 = vld [vmem:[#allocation3 + $0x82] sm:$0xff] }
 0x1fc   : > { %8568 = vmatprep.mubr.msk.f32.mxu1 %vm677_vm3, %v1998_v29  ;;  %v2695_v29 = vld [vmem:[#allocation3 + $0x92] sm:$0xff] }
 0x1ff   : > { %8569 = vmatmul.mubr.msk.f32.gmra.mrb[62].mxu1 %vm677_vm3, %v1999_v19  ;;  %v2696_v19 = vld [vmem:[#allocation3 + $0x9a] sm:$0xff] }
 0x200   : > { %8579 = vmatprep.mubr.msk.f32.mxu1 %vm677_vm3, %v2683_v40  ;;  %v2697_v40 = vld [vmem:[#allocation3 + $0xaa] sm:$0xff] }
 0x203   : > { %8580 = vmatmul.mubr.msk.f32.vlgmr.msra.gmra.mrb[32].mxu1 %vm677_vm3, %v2684_v42  ;;  %v2698_v42 = vld [vmem:[#allocation3 + $0xb2] sm:$0xff] }
 0x204   : > { %8582 = vmatprep.mubr.msk.f32.mxu1 %vm677_vm3, %v2685_v24  ;;  %v2699_v24 = vld [vmem:[#allocation3 + $0xc2] sm:$0xff] }
 0x207   : > { %8583 = vmatmul.mubr.msk.f32.gmra.mrb[34].mxu1 %vm677_vm3, %v2686_v13  ;;  %v2700_v13 = vld [vmem:[#allocation3 + $0xca] sm:$0xff] }
 0x208   : > { %8585 = vmatprep.mubr.msk.f32.mxu1 %vm677_vm3, %v2687_v55  ;;  %v2701_v55 = vld [vmem:[#allocation3 + $0xda] sm:$0xff] }
 0x20b   : > { %8586 = vmatmul.mubr.msk.f32.gmra.mrb[36].mxu1 %vm677_vm3, %v2688_v18  ;;  %v2702_v18 = vld [vmem:[#allocation3 + $0xe2] sm:$0xff] }
 0x20c   : > { %8588 = vmatprep.mubr.msk.f32.mxu1 %vm677_vm3, %v2689_v45  ;;  %v2703_v45 = vld [vmem:[#allocation3 + $0xf2] sm:$0xff] }
 0x20f   : > { %8589 = vmatmul.mubr.msk.f32.gmra.mrb[38].mxu1 %vm677_vm3, %v2690_v12  ;;  %v2704_v12 = vld [vmem:[#allocation3 + $0xfa] sm:$0xff] }
 0x210   : > { %8591 = vmatprep.mubr.msk.f32.mxu1 %vm677_vm3, %v2691_v16  ;;  %v2705_v16 = vld [vmem:[#allocation3 + $0x10a] sm:$0xff] }
 0x213   : > { %8592 = vmatmul.mubr.msk.f32.gmra.mrb[40].mxu1 %vm677_vm3, %v2692_v31  ;;  %v2706_v31 = vld [vmem:[#allocation3 + $0x112] sm:$0xff] }
 0x214   : > { %8594 = vmatprep.mubr.msk.f32.mxu1 %vm677_vm3, %v2693_v7  ;;  %v2707_v7 = vld [vmem:[#allocation3 + $0x122] sm:$0xff] }
 0x217   : > { %8595 = vmatmul.mubr.msk.f32.gmra.mrb[42].mxu1 %vm677_vm3, %v2694_v37  ;;  %v2708_v37 = vld [vmem:[#allocation3 + $0x12a] sm:$0xff] }
 0x218   : > { %8597 = vmatprep.mubr.msk.f32.mxu1 %vm677_vm3, %v2695_v29  ;;  %v2709_v29 = vld [vmem:[#allocation3 + $0x13a] sm:$0xff] }
 0x21b   : > { %8598 = vmatmul.mubr.msk.f32.gmra.mrb[44].mxu1 %vm677_vm3, %v2696_v19  ;;  %v2710_v19 = vld [vmem:[#allocation3 + $0x142] sm:$0xff] }
 0x21c   : > { %8600 = vmatprep.mubr.msk.f32.mxu1 %vm677_vm3, %v2697_v40  ;;  %v2711_v40 = vld [vmem:[#allocation3 + $0x152] sm:$0xff] }
 0x21f   : > { %8601 = vmatmul.mubr.msk.f32.gmra.mrb[46].mxu1 %vm677_vm3, %v2698_v42  ;;  %v2712_v42 = vld [vmem:[#allocation3 + $0x15a] sm:$0xff] }
 0x220   : > { %8603 = vmatprep.mubr.msk.f32.mxu1 %vm677_vm3, %v2699_v24  ;;  %v2713_v24 = vld [vmem:[#allocation3 + $0x16a] sm:$0xff] }
 0x223   : > { %8604 = vmatmul.mubr.msk.f32.gmra.mrb[48].mxu1 %vm677_vm3, %v2700_v13  ;;  %v2714_v13 = vld [vmem:[#allocation3 + $0x172] sm:$0xff] }
 0x224   : > { %8606 = vmatprep.mubr.msk.f32.mxu1 %vm677_vm3, %v2701_v55  ;;  %v3208_v55 = vld [vmem:[%s10663_s15] sm:$0xff] }
 0x227   : > { %8607 = vmatmul.mubr.msk.f32.gmra.mrb[50].mxu1 %vm677_vm3, %v2702_v18  ;;  %v3209_v18 = vld [vmem:[%s10663_s15 + $0x8] sm:$0xff] }
 0x228   : > { %8609 = vmatprep.mubr.msk.f32.mxu1 %vm677_vm3, %v2703_v45  ;;  %v9163_v45 = vpack.c.bf16 %v3209_v18, %v3208_v55 }
 0x22a   : > { %9164 = vmatprep.subr.bf16.mxu0 %v9163_v45 }
 0x22b   : > { %8610 = vmatmul.mubr.msk.f32.gmra.mrb[52].mxu1 %vm677_vm3, %v2704_v12  ;;  %v10740_v12 = vld [vmem:[%s575_s14] ss:$0 sm:$0xff]  ;;  %s7777_s14 = sshll.u32 %s9837_s21, 8  ;;  %s9753_s21 = smov [#allocation9]  }
 0x22c   : > { %8612 = vmatprep.mubr.msk.f32.mxu1 %vm677_vm3, %v2705_v16  ;;  %s11663_s12 = scalar_lea.hbm %s11723_s11, %s7777_s14  ;;  %s9678_s1 = sshll.u32 %s9753_s21, 4  ;;  %s9679_s1 = int_to_ptr.vmem [resolvable:$false] %s9678_s1 }
 0x22d   : > { %s9680_s17 = scalar_lea.vmem %s9679_s1, 512  ;;  %p9681_p7 = scmp.lt.s32.totalorder %s11665_s25, %s9679_s1 }
 0x22f   : > { %8613 = vmatmul.mubr.msk.f32.gmra.mrb[54].mxu1 %vm677_vm3, %v2706_v31 }
 0x230   : > { %8615 = vmatprep.mubr.msk.f32.mxu1 %vm677_vm3, %v2707_v7 }
 0x233   : > { %8616 = vmatmul.mubr.msk.f32.gmra.mrb[56].mxu1 %vm677_vm3, %v2708_v37 }
 0x234   : > { %8618 = vmatprep.mubr.msk.f32.mxu1 %vm677_vm3, %v2709_v29 }
 0x237   : > { %8619 = vmatmul.mubr.msk.f32.gmra.mrb[58].mxu1 %vm677_vm3, %v2710_v19 }
 0x238   : > { %8621 = vmatprep.mubr.msk.f32.mxu1 %vm677_vm3, %v2711_v40 }
 0x23b   : > { %8622 = vmatmul.mubr.msk.f32.gmra.mrb[60].mxu1 %vm677_vm3, %v2712_v42 }
 0x23c   : > { %8624 = vmatprep.mubr.msk.f32.mxu1 %vm677_vm3, %v2713_v24 }
 0x23f   : > { %8625 = vmatmul.mubr.msk.f32.gmra.mrb[62].mxu1 %vm677_vm3, %v2714_v13 }
 0x2d6   : > { %v8581_v16 = vpop.f32.mrb[32].mxu1 }
 0x2d7   : > { %v3081_v31 = vadd.f32 %v8581_v16, %v10740_v12  ;;  %v2882_v7 = vpop.f32.mrb[33].mxu1 }
 0x2d8   : > { %v3080_v37 = vadd.f32 %v10740_v12, %v2882_v7 }
 0x2d9   : > { %v3113_v29 = vmax.f32 %v3081_v31, 0.0 }
 0x2da   : > { %v3112_v19 = vmax.f32 %v3080_v37, 0.0  ;;  %v8584_v40 = vpop.f32.mrb[34].mxu1 }
 0x2db   : > { %3145 = vst.msk [vmem:[#allocation3 + $0x9] sm:$0xff] %vm677_vm3, %v3113_v29  ;;  %v3083_v42 = vadd.f32 %v8584_v40, %v10740_v12  ;;  %v2892_v24 = vpop.f32.mrb[35].mxu1  ;;  %v3210_v29 = vld [vmem:[%s10663_s15 + $0x10] sm:$0xff]  ;;  %v3211_v40 = vld [vmem:[%s10663_s15 + $0x18] sm:$0xff] }
 0x2dc   : > { %3144 = vst.msk [vmem:[#allocation3 + $0x1] sm:$0xff] %vm677_vm3, %v3112_v19  ;;  %v3082_v13 = vadd.f32 %v10740_v12, %v2892_v24 }
 0x2dd   : > { %v3115_v55 = vmax.f32 %v3083_v42, 0.0 }
 0x2de   : > { %v3114_v18 = vmax.f32 %v3082_v13, 0.0  ;;  %v8587_v16 = vpop.f32.mrb[36].mxu1 }
 0x2df   : > { %3147 = vst.msk [vmem:[#allocation3 + $0x21] sm:$0xff] %vm677_vm3, %v3115_v55  ;;  %v3085_v31 = vadd.f32 %v8587_v16, %v10740_v12  ;;  %v2902_v7 = vpop.f32.mrb[37].mxu1  ;;  %v9167_v55 = vpack.c.bf16 %v3211_v40, %v3210_v29 }
 0x2e0   : > { %3146 = vst.msk [vmem:[#allocation3 + $0x19] sm:$0xff] %vm677_vm3, %v3114_v18  ;;  %v3084_v37 = vadd.f32 %v10740_v12, %v2902_v7  ;;  %v7524_v7 = vld [vmem:[%s10663_s15 + $0x40] sm:$0xff] }
 0x2e1   : > { %v3117_v22 = vmax.f32 %v3085_v31, 0.0  ;;  %v10764_v40 = vpack.c.bf16 %v7525_v3, %v7524_v7 }
 0x2e2   : > { %v3116_v19 = vmax.f32 %v3084_v37, 0.0  ;;  %v8590_v14 = vpop.f32.mrb[38].mxu1  ;;  %v3213_v16 = vld [vmem:[#allocation3 + $0x9] sm:$0xff] }
 0x2e3   : > { %3149 = vst.msk [vmem:[#allocation3 + $0x39] sm:$0xff] %vm677_vm3, %v3117_v22  ;;  %v3087_v42 = vadd.f32 %v8590_v14, %v10740_v12  ;;  %v2912_v24 = vpop.f32.mrb[39].mxu1  ;;  %v3212_v13 = vld [vmem:[#allocation3 + $0x1] sm:$0xff] }
 0x2e4   : > { %3148 = vst.msk [vmem:[#allocation3 + $0x31] sm:$0xff] %vm677_vm3, %v3116_v19  ;;  %v3086_v18 = vadd.f32 %v10740_v12, %v2912_v24  ;;  %8635 = vmatprep.mubr.msk.f32.mxu0 %vm677_vm3, %v3212_v13 }
 0x2e5   : > { %v3119_v60 = vmax.f32 %v3087_v42, 0.0  ;;  %8636 = vmatmul.mubr.msk.f32.vlgmr.msra.gmra.mrb[32].mxu0 %vm677_vm3, %v3213_v16 }
 0x2e6   : > { %v3118_v31 = vmax.f32 %v3086_v18, 0.0  ;;  %9166 = vmatpush3.bf16.msra.mxu0 %v9163_v45  ;;  %v8593_v22 = vpop.f32.mrb[40].mxu1  ;;  %v3215_v42 = vld [vmem:[#allocation3 + $0x21] sm:$0xff] }
 0x2e7   : > { %3151 = vst.msk [vmem:[#allocation3 + $0x51] sm:$0xff] %vm677_vm3, %v3119_v60  ;;  %v3089_v14 = vadd.f32 %v8593_v22, %v10740_v12  ;;  %v2922_v37 = vpop.f32.mrb[41].mxu1  ;;  %v3214_v29 = vld [vmem:[#allocation3 + $0x19] sm:$0xff]  ;;  %9168 = vmatprep.subr.bf16.mxu0 %v9167_v55 }
 0x2e8   : > { %3150 = vst.msk [vmem:[#allocation3 + $0x49] sm:$0xff] %vm677_vm3, %v3118_v31  ;;  %v3088_v19 = vadd.f32 %v10740_v12, %v2922_v37  ;;  %8638 = vmatprep.mubr.msk.f32.mxu0 %vm677_vm3, %v3214_v29 }
 0x2e9   : > { %v3121_v24 = vmax.f32 %v3089_v14, 0.0  ;;  %8639 = vmatmul.mubr.msk.f32.gmra.mrb[34].mxu0 %vm677_vm3, %v3215_v42 }
 0x2ea   : > { %v3120_v45 = vmax.f32 %v3088_v19, 0.0  ;;  %v8596_v13 = vpop.f32.mrb[42].mxu1  ;;  %9170 = vmatpush3.bf16.msra.mxu0 %v9167_v55  ;;  %v3217_v7 = vld [vmem:[#allocation3 + $0x39] sm:$0xff] }
 0x2eb   : > { %3153 = vst.msk [vmem:[#allocation3 + $0x69] sm:$0xff] %vm677_vm3, %v3121_v24  ;;  %v3091_v60 = vadd.f32 %v8596_v13, %v10740_v12  ;;  %v2932_v18 = vpop.f32.mrb[43].mxu1  ;;  %v3216_v3 = vld [vmem:[#allocation3 + $0x31] sm:$0xff]  ;;  %9172 = vmatprep.subr.bf16.mxu0 %v10764_v40 }
 0x2ec   : > { %3152 = vst.msk [vmem:[#allocation3 + $0x61] sm:$0xff] %vm677_vm3, %v3120_v45  ;;  %v3090_v16 = vadd.f32 %v10740_v12, %v2932_v18  ;;  %8641 = vmatprep.mubr.msk.f32.mxu0 %vm677_vm3, %v3216_v3 }
 0x2ed   : > { %v3123_v31 = vmax.f32 %v3091_v60, 0.0  ;;  %8642 = vmatmul.mubr.msk.f32.gmra.mrb[36].mxu0 %vm677_vm3, %v3217_v7 }
 0x2ee   : > { %v3122_v22 = vmax.f32 %v3090_v16, 0.0  ;;  %v8599_v55 = vpop.f32.mrb[44].mxu1  ;;  %v3219_v42 = vld [vmem:[#allocation3 + $0x51] sm:$0xff] }
 0x2ef   : > { %3155 = vst.msk [vmem:[#allocation3 + $0x81] sm:$0xff] %vm677_vm3, %v3123_v31  ;;  %v3093_v14 = vadd.f32 %v8599_v55, %v10740_v12  ;;  %v2942_v37 = vpop.f32.mrb[45].mxu1  ;;  %v3218_v29 = vld [vmem:[#allocation3 + $0x49] sm:$0xff] }
 0x2f0   : > { %3154 = vst.msk [vmem:[#allocation3 + $0x79] sm:$0xff] %vm677_vm3, %v3122_v22  ;;  %v3092_v19 = vadd.f32 %v10740_v12, %v2942_v37  ;;  %8644 = vmatprep.mubr.msk.f32.mxu0 %vm677_vm3, %v3218_v29 }
 0x2f1   : > { %v3125_v24 = vmax.f32 %v3093_v14, 0.0  ;;  %8645 = vmatmul.mubr.msk.f32.gmra.mrb[38].mxu0 %vm677_vm3, %v3219_v42 }
 0x2f2   : > { %v3124_v45 = vmax.f32 %v3092_v19, 0.0  ;;  %v8602_v13 = vpop.f32.mrb[46].mxu1  ;;  %v3221_v7 = vld [vmem:[#allocation3 + $0x69] sm:$0xff] }
 0x2f3   : > { %3157 = vst.msk [vmem:[#allocation3 + $0x99] sm:$0xff] %vm677_vm3, %v3125_v24  ;;  %v3095_v60 = vadd.f32 %v8602_v13, %v10740_v12  ;;  %v2952_v18 = vpop.f32.mrb[47].mxu1  ;;  %v3220_v3 = vld [vmem:[#allocation3 + $0x61] sm:$0xff] }
 0x2f4   : > { %3156 = vst.msk [vmem:[#allocation3 + $0x91] sm:$0xff] %vm677_vm3, %v3124_v45  ;;  %v3094_v16 = vadd.f32 %v10740_v12, %v2952_v18  ;;  %8647 = vmatprep.mubr.msk.f32.mxu0 %vm677_vm3, %v3220_v3 }
 0x2f5   : > { %v3127_v31 = vmax.f32 %v3095_v60, 0.0  ;;  %8648 = vmatmul.mubr.msk.f32.gmra.mrb[40].mxu0 %vm677_vm3, %v3221_v7 }
 0x2f6   : > { %v3126_v22 = vmax.f32 %v3094_v16, 0.0  ;;  %v8605_v55 = vpop.f32.mrb[48].mxu1  ;;  %v3223_v42 = vld [vmem:[#allocation3 + $0x81] sm:$0xff] }
 0x2f7   : > { %3159 = vst.msk [vmem:[#allocation3 + $0xb1] sm:$0xff] %vm677_vm3, %v3127_v31  ;;  %v3097_v14 = vadd.f32 %v8605_v55, %v10740_v12  ;;  %v2962_v37 = vpop.f32.mrb[49].mxu1  ;;  %v3222_v29 = vld [vmem:[#allocation3 + $0x79] sm:$0xff] }
 0x2f8   : > { %3158 = vst.msk [vmem:[#allocation3 + $0xa9] sm:$0xff] %vm677_vm3, %v3126_v22  ;;  %v3096_v19 = vadd.f32 %v10740_v12, %v2962_v37  ;;  %8650 = vmatprep.mubr.msk.f32.mxu0 %vm677_vm3, %v3222_v29 }
 0x2f9   : > { %v3129_v24 = vmax.f32 %v3097_v14, 0.0  ;;  %8651 = vmatmul.mubr.msk.f32.gmra.mrb[42].mxu0 %vm677_vm3, %v3223_v42 }
 0x2fa   : > { %v3128_v45 = vmax.f32 %v3096_v19, 0.0  ;;  %v8608_v13 = vpop.f32.mrb[50].mxu1  ;;  %v3225_v7 = vld [vmem:[#allocation3 + $0x99] sm:$0xff] }
 0x2fb   : > { %3161 = vst.msk [vmem:[#allocation3 + $0xc9] sm:$0xff] %vm677_vm3, %v3129_v24  ;;  %v3099_v60 = vadd.f32 %v8608_v13, %v10740_v12  ;;  %v2972_v18 = vpop.f32.mrb[51].mxu1  ;;  %v3224_v3 = vld [vmem:[#allocation3 + $0x91] sm:$0xff] }
 0x2fc   : > { %3160 = vst.msk [vmem:[#allocation3 + $0xc1] sm:$0xff] %vm677_vm3, %v3128_v45  ;;  %v3098_v16 = vadd.f32 %v10740_v12, %v2972_v18  ;;  %8653 = vmatprep.mubr.msk.f32.mxu0 %vm677_vm3, %v3224_v3 }
 0x2fd   : > { %v3131_v31 = vmax.f32 %v3099_v60, 0.0  ;;  %8654 = vmatmul.mubr.msk.f32.gmra.mrb[44].mxu0 %vm677_vm3, %v3225_v7 }
 0x2fe   : > { %v3130_v22 = vmax.f32 %v3098_v16, 0.0  ;;  %v8611_v55 = vpop.f32.mrb[52].mxu1  ;;  %v3227_v42 = vld [vmem:[#allocation3 + $0xb1] sm:$0xff] }
 0x2ff   : > { %3163 = vst.msk [vmem:[#allocation3 + $0xe1] sm:$0xff] %vm677_vm3, %v3131_v31  ;;  %v3101_v14 = vadd.f32 %v8611_v55, %v10740_v12  ;;  %v2982_v37 = vpop.f32.mrb[53].mxu1  ;;  %v3226_v29 = vld [vmem:[#allocation3 + $0xa9] sm:$0xff] }
 0x300   : > { %3162 = vst.msk [vmem:[#allocation3 + $0xd9] sm:$0xff] %vm677_vm3, %v3130_v22  ;;  %v3100_v19 = vadd.f32 %v10740_v12, %v2982_v37  ;;  %8656 = vmatprep.mubr.msk.f32.mxu0 %vm677_vm3, %v3226_v29 }
 0x301   : > { %v3133_v24 = vmax.f32 %v3101_v14, 0.0  ;;  %8657 = vmatmul.mubr.msk.f32.gmra.mrb[46].mxu0 %vm677_vm3, %v3227_v42 }
 0x302   : > { %v3132_v45 = vmax.f32 %v3100_v19, 0.0  ;;  %v8614_v13 = vpop.f32.mrb[54].mxu1  ;;  %v3229_v7 = vld [vmem:[#allocation3 + $0xc9] sm:$0xff] }
 0x303   : > { %3165 = vst.msk [vmem:[#allocation3 + $0xf9] sm:$0xff] %vm677_vm3, %v3133_v24  ;;  %v3103_v60 = vadd.f32 %v8614_v13, %v10740_v12  ;;  %v2992_v18 = vpop.f32.mrb[55].mxu1  ;;  %v3228_v3 = vld [vmem:[#allocation3 + $0xc1] sm:$0xff] }
 0x304   : > { %3164 = vst.msk [vmem:[#allocation3 + $0xf1] sm:$0xff] %vm677_vm3, %v3132_v45  ;;  %v3102_v16 = vadd.f32 %v10740_v12, %v2992_v18  ;;  %8659 = vmatprep.mubr.msk.f32.mxu0 %vm677_vm3, %v3228_v3 }
 0x305   : > { %v3135_v31 = vmax.f32 %v3103_v60, 0.0  ;;  %8660 = vmatmul.mubr.msk.f32.gmra.mrb[48].mxu0 %vm677_vm3, %v3229_v7 }
 0x306   : > { %v3134_v22 = vmax.f32 %v3102_v16, 0.0  ;;  %v8617_v55 = vpop.f32.mrb[56].mxu1  ;;  %v3231_v42 = vld [vmem:[#allocation3 + $0xe1] sm:$0xff] }
 0x307   : > { %3167 = vst.msk [vmem:[#allocation3 + $0x111] sm:$0xff] %vm677_vm3, %v3135_v31  ;;  %v3105_v14 = vadd.f32 %v8617_v55, %v10740_v12  ;;  %v3002_v37 = vpop.f32.mrb[57].mxu1  ;;  %v3230_v29 = vld [vmem:[#allocation3 + $0xd9] sm:$0xff] }
 0x308   : > { %3166 = vst.msk [vmem:[#allocation3 + $0x109] sm:$0xff] %vm677_vm3, %v3134_v22  ;;  %v3104_v19 = vadd.f32 %v10740_v12, %v3002_v37  ;;  %8662 = vmatprep.mubr.msk.f32.mxu0 %vm677_vm3, %v3230_v29 }
 0x309   : > { %v3137_v24 = vmax.f32 %v3105_v14, 0.0  ;;  %8663 = vmatmul.mubr.msk.f32.gmra.mrb[50].mxu0 %vm677_vm3, %v3231_v42 }
 0x30a   : > { %v3136_v45 = vmax.f32 %v3104_v19, 0.0  ;;  %v8620_v13 = vpop.f32.mrb[58].mxu1  ;;  %v3233_v7 = vld [vmem:[#allocation3 + $0xf9] sm:$0xff] }
 0x30b   : > { %3169 = vst.msk [vmem:[#allocation3 + $0x129] sm:$0xff] %vm677_vm3, %v3137_v24  ;;  %v3107_v60 = vadd.f32 %v8620_v13, %v10740_v12  ;;  %v3012_v18 = vpop.f32.mrb[59].mxu1  ;;  %v3232_v3 = vld [vmem:[#allocation3 + $0xf1] sm:$0xff] }
 0x30c   : > { %3168 = vst.msk [vmem:[#allocation3 + $0x121] sm:$0xff] %vm677_vm3, %v3136_v45  ;;  %v3106_v16 = vadd.f32 %v10740_v12, %v3012_v18  ;;  %8665 = vmatprep.mubr.msk.f32.mxu0 %vm677_vm3, %v3232_v3 }
 0x30d   : > { %v3139_v31 = vmax.f32 %v3107_v60, 0.0  ;;  %8666 = vmatmul.mubr.msk.f32.gmra.mrb[52].mxu0 %vm677_vm3, %v3233_v7 }
 0x30e   : > { %v3138_v22 = vmax.f32 %v3106_v16, 0.0  ;;  %v8623_v55 = vpop.f32.mrb[60].mxu1  ;;  %v3235_v42 = vld [vmem:[#allocation3 + $0x111] sm:$0xff] }
 0x30f   : > { %3171 = vst.msk [vmem:[#allocation3 + $0x141] sm:$0xff] %vm677_vm3, %v3139_v31  ;;  %v3109_v14 = vadd.f32 %v8623_v55, %v10740_v12  ;;  %v3022_v37 = vpop.f32.mrb[61].mxu1  ;;  %v3234_v29 = vld [vmem:[#allocation3 + $0x109] sm:$0xff] }
 0x310   : > { %3170 = vst.msk [vmem:[#allocation3 + $0x139] sm:$0xff] %vm677_vm3, %v3138_v22  ;;  %v3108_v19 = vadd.f32 %v10740_v12, %v3022_v37  ;;  %8668 = vmatprep.mubr.msk.f32.mxu0 %vm677_vm3, %v3234_v29 }
 0x311   : > { %v3141_v24 = vmax.f32 %v3109_v14, 0.0  ;;  %8669 = vmatmul.mubr.msk.f32.gmra.mrb[54].mxu0 %vm677_vm3, %v3235_v42  ;;  %v7526_v42 = vld [vmem:[%s10663_s15 + $0x50] sm:$0xff] }
 0x312   : > { %v3140_v45 = vmax.f32 %v3108_v19, 0.0  ;;  %v8626_v13 = vpop.f32.mrb[62].mxu1  ;;  %v3237_v7 = vld [vmem:[#allocation3 + $0x129] sm:$0xff] }
 0x313   : > { %3173 = vst.msk [vmem:[#allocation3 + $0x159] sm:$0xff] %vm677_vm3, %v3141_v24  ;;  %v3111_v60 = vadd.f32 %v8626_v13, %v10740_v12  ;;  %v3032_v18 = vpop.f32.mrb[63].mxu1  ;;  %v3236_v3 = vld [vmem:[#allocation3 + $0x121] sm:$0xff]  ;;  %v7527_v24 = vld [vmem:[%s10663_s15 + $0x58] sm:$0xff] }
 0x314   : > { %3172 = vst.msk [vmem:[#allocation3 + $0x151] sm:$0xff] %vm677_vm3, %v3140_v45  ;;  %v3110_v16 = vadd.f32 %v10740_v12, %v3032_v18  ;;  %8671 = vmatprep.mubr.msk.f32.mxu0 %vm677_vm3, %v3236_v3  ;;  %v3176_v45 = vld [vmem:[#allocation3] sm:$0xff]  ;;  %v7563_v18 = vld [vmem:[%s10851_s19 + $0x30] sm:$0xff]  ;;  %v9175_v3 = vpack.c.bf16 %v7527_v24, %v7526_v42  ;;  %v3185_v42 = vld [vmem:[#allocation3 + $0x68] sm:$0xff] }
 0x315   : > { %v3143_v31 = vmax.f32 %v3111_v60, 0.0  ;;  %8672 = vmatmul.mubr.msk.f32.gmra.mrb[56].mxu0 %vm677_vm3, %v3237_v7  ;;  %v7561_v13 = vld [vmem:[%s10851_s19 + $0x20] sm:$0xff]  ;;  %v7562_v60 = vld [vmem:[%s10851_s19 + $0x28] sm:$0xff]  ;;  %v7564_v7 = vld [vmem:[%s10851_s19 + $0x38] sm:$0xff] }
 0x316   : > { %v3142_v22 = vmax.f32 %v3110_v16, 0.0  ;;  %v3239_v14 = vld [vmem:[#allocation3 + $0x141] sm:$0xff]  ;;  %v9179_v16 = vpack.c.bf16 %v7562_v60, %v7561_v13  ;;  %v3186_v24 = vld [vmem:[#allocation3 + $0x78] sm:$0xff]  ;;  %v3188_v13 = vld [vmem:[#allocation3 + $0x90] sm:$0xff] }
 0x317   : > { %3175 = vst.msk [vmem:[#allocation3 + $0x171] sm:$0xff] %vm677_vm3, %v3143_v31  ;;  %v3238_v55 = vld [vmem:[#allocation3 + $0x139] sm:$0xff]  ;;  %v3177_v31 = vld [vmem:[#allocation3 + $0x8] sm:$0xff] }
 0x318   : > { %3174 = vst.msk [vmem:[#allocation3 + $0x169] sm:$0xff] %vm677_vm3, %v3142_v22  ;;  %8674 = vmatprep.mubr.msk.f32.mxu0 %vm677_vm3, %v3238_v55  ;;  %v9183_v22 = vpack.c.bf16 %v7564_v7, %v7563_v18  ;;  %v3178_v55 = vld [vmem:[#allocation3 + $0x18] sm:$0xff]  ;;  %9180 = vmatprep.subr.bf16.mxu1 %v9179_v16  ;;  %v3190_v18 = vld [vmem:[#allocation3 + $0xa8] sm:$0xff] }
 0x319   : > { %8675 = vmatmul.mubr.msk.f32.gmra.mrb[58].mxu0 %vm677_vm3, %v3239_v14  ;;  %9182 = vmatpush3.bf16.msra.mxu1 %v9179_v16  ;;  %v3179_v14 = vld [vmem:[#allocation3 + $0x20] sm:$0xff]  ;;  %v3189_v60 = vld [vmem:[#allocation3 + $0x98] sm:$0xff]  ;;  %v3193_v7 = vld [vmem:[#allocation3 + $0xc8] sm:$0xff] }
 0x31a   : > { %v3241_v37 = vld [vmem:[#allocation3 + $0x159] sm:$0xff]  ;;  %9184 = vmatprep.subr.bf16.mxu1 %v9183_v22 }
 0x31b   : > { %v3240_v12 = vld [vmem:[#allocation3 + $0x151] sm:$0xff]  ;;  %v3192_v16 = vld [vmem:[#allocation3 + $0xc0] sm:$0xff] }
 0x31c   : > { %8677 = vmatprep.mubr.msk.f32.mxu0 %vm677_vm3, %v3240_v12  ;;  %v3180_v12 = vld [vmem:[#allocation3 + $0x30] sm:$0xff] }
 0x31d   : > { %8678 = vmatmul.mubr.msk.f32.gmra.mrb[60].mxu0 %vm677_vm3, %v3241_v37  ;;  %9186 = vmatpush3.bf16.msra.mxu1 %v9183_v22  ;;  %v3181_v37 = vld [vmem:[#allocation3 + $0x38] sm:$0xff]  ;;  %v3195_v22 = vld [vmem:[#allocation3 + $0xe0] sm:$0xff] }
 0x31e   : > { %v3243_v19 = vld [vmem:[#allocation3 + $0x171] sm:$0xff] }
 0x31f   : > { %v3242_v29 = vld [vmem:[#allocation3 + $0x169] sm:$0xff] }
 0x320   : > { %8680 = vmatprep.mubr.msk.f32.mxu0 %vm677_vm3, %v3242_v29  ;;  %v3182_v29 = vld [vmem:[#allocation3 + $0x48] sm:$0xff] }
 0x321   : > { %8681 = vmatmul.mubr.msk.f32.gmra.mrb[62].mxu0 %vm677_vm3, %v3243_v19  ;;  %v3184_v19 = vld [vmem:[#allocation3 + $0x60] sm:$0xff] }
 0x322   : > { %8691 = vmatprep.mubr.msk.f32.mxu0 %vm677_vm3, %v3176_v45  ;;  %v3187_v45 = vld [vmem:[#allocation3 + $0x80] sm:$0xff] }
 0x325   : > { %8692 = vmatmul.mubr.msk.f32.vlgmr.msra.gmra.mrb[32].mxu0 %vm677_vm3, %v3177_v31  ;;  %v3194_v31 = vld [vmem:[#allocation3 + $0xd8] sm:$0xff] }
 0x326   : > { %9174 = vmatpush3.bf16.msra.mxu0 %v10764_v40  ;;  %8694 = vmatprep.mubr.msk.f32.mxu0 %vm677_vm3, %v3178_v55  ;;  %v3183_v40 = vld [vmem:[#allocation3 + $0x50] sm:$0xff] }
 0x327   : > { %9176 = vmatprep.subr.bf16.mxu0 %v9175_v3  ;;  %v3196_v55 = vld [vmem:[#allocation3 + $0xf0] sm:$0xff] }
 0x329   : > { %8695 = vmatmul.mubr.msk.f32.gmra.mrb[34].mxu0 %vm677_vm3, %v3179_v14  ;;  %v3197_v14 = vld [vmem:[#allocation3 + $0xf8] sm:$0xff] }
 0x32a   : > { %8697 = vmatprep.mubr.msk.f32.mxu0 %vm677_vm3, %v3180_v12  ;;  %9178 = vmatpush3.bf16.msra.mxu0 %v9175_v3  ;;  %v3191_v3 = vld [vmem:[#allocation3 + $0xb0] sm:$0xff]  ;;  %v3198_v12 = vld [vmem:[#allocation3 + $0x108] sm:$0xff] }
 0x32d   : > { %8698 = vmatmul.mubr.msk.f32.gmra.mrb[36].mxu0 %vm677_vm3, %v3181_v37  ;;  %v3199_v37 = vld [vmem:[#allocation3 + $0x110] sm:$0xff] }
 0x32e   : > { %8700 = vmatprep.mubr.msk.f32.mxu0 %vm677_vm3, %v3182_v29  ;;  %v3200_v29 = vld [vmem:[#allocation3 + $0x120] sm:$0xff] }
 0x331   : > { %8701 = vmatmul.mubr.msk.f32.gmra.mrb[38].mxu0 %vm677_vm3, %v3183_v40  ;;  %v3201_v40 = vld [vmem:[#allocation3 + $0x128] sm:$0xff] }
 0x332   : > { %8703 = vmatprep.mubr.msk.f32.mxu0 %vm677_vm3, %v3184_v19  ;;  %v3202_v19 = vld [vmem:[#allocation3 + $0x138] sm:$0xff] }
 0x335   : > { %8704 = vmatmul.mubr.msk.f32.gmra.mrb[40].mxu0 %vm677_vm3, %v3185_v42  ;;  %v3203_v42 = vld [vmem:[#allocation3 + $0x140] sm:$0xff] }
 0x336   : > { %8706 = vmatprep.mubr.msk.f32.mxu0 %vm677_vm3, %v3186_v24  ;;  %v3204_v24 = vld [vmem:[#allocation3 + $0x150] sm:$0xff] }
 0x339   : > { %8707 = vmatmul.mubr.msk.f32.gmra.mrb[42].mxu0 %vm677_vm3, %v3187_v45  ;;  %v3205_v45 = vld [vmem:[#allocation3 + $0x158] sm:$0xff] }
 0x33a   : > { %8709 = vmatprep.mubr.msk.f32.mxu0 %vm677_vm3, %v3188_v13  ;;  %v3206_v13 = vld [vmem:[#allocation3 + $0x168] sm:$0xff] }
 0x33d   : > { %8710 = vmatmul.mubr.msk.f32.gmra.mrb[44].mxu0 %vm677_vm3, %v3189_v60  ;;  %v3207_v60 = vld [vmem:[#allocation3 + $0x170] sm:$0xff] }
 0x33e   : > { %8712 = vmatprep.mubr.msk.f32.mxu0 %vm677_vm3, %v3190_v18  ;;  %v3891_v18 = vld [vmem:[#allocation3 + $0x2] sm:$0xff] }
 0x341   : > { %8713 = vmatmul.mubr.msk.f32.gmra.mrb[46].mxu0 %vm677_vm3, %v3191_v3  ;;  %v3892_v3 = vld [vmem:[#allocation3 + $0xa] sm:$0xff] }
 0x342   : > { %8715 = vmatprep.mubr.msk.f32.mxu0 %vm677_vm3, %v3192_v16  ;;  %v3893_v16 = vld [vmem:[#allocation3 + $0x1a] sm:$0xff] }
 0x345   : > { %8716 = vmatmul.mubr.msk.f32.gmra.mrb[48].mxu0 %vm677_vm3, %v3193_v7  ;;  %v3894_v7 = vld [vmem:[#allocation3 + $0x22] sm:$0xff] }
 0x346   : > { %8718 = vmatprep.mubr.msk.f32.mxu0 %vm677_vm3, %v3194_v31  ;;  %v3895_v31 = vld [vmem:[#allocation3 + $0x32] sm:$0xff] }
 0x349   : > { %8719 = vmatmul.mubr.msk.f32.gmra.mrb[50].mxu0 %vm677_vm3, %v3195_v22  ;;  %v3896_v22 = vld [vmem:[#allocation3 + $0x3a] sm:$0xff] }
 0x34a   : > { %8721 = vmatprep.mubr.msk.f32.mxu0 %vm677_vm3, %v3196_v55  ;;  %v3897_v55 = vld [vmem:[#allocation3 + $0x4a] sm:$0xff] }
 0x34d   : > { %8722 = vmatmul.mubr.msk.f32.gmra.mrb[52].mxu0 %vm677_vm3, %v3197_v14  ;;  %v3898_v14 = vld [vmem:[#allocation3 + $0x52] sm:$0xff] }
 0x34e   : > { %8724 = vmatprep.mubr.msk.f32.mxu0 %vm677_vm3, %v3198_v12  ;;  %v3899_v12 = vld [vmem:[#allocation3 + $0x62] sm:$0xff] }
 0x351   : > { %8725 = vmatmul.mubr.msk.f32.gmra.mrb[54].mxu0 %vm677_vm3, %v3199_v37  ;;  %v3900_v37 = vld [vmem:[#allocation3 + $0x6a] sm:$0xff] }
 0x352   : > { %8727 = vmatprep.mubr.msk.f32.mxu0 %vm677_vm3, %v3200_v29  ;;  %v3901_v29 = vld [vmem:[#allocation3 + $0x7a] sm:$0xff] }
 0x355   : > { %8728 = vmatmul.mubr.msk.f32.gmra.mrb[56].mxu0 %vm677_vm3, %v3201_v40  ;;  %v3902_v40 = vld [vmem:[#allocation3 + $0x82] sm:$0xff] }
 0x356   : > { %8730 = vmatprep.mubr.msk.f32.mxu0 %vm677_vm3, %v3202_v19  ;;  %v3903_v19 = vld [vmem:[#allocation3 + $0x92] sm:$0xff] }
 0x359   : > { %8731 = vmatmul.mubr.msk.f32.gmra.mrb[58].mxu0 %vm677_vm3, %v3203_v42  ;;  %v3904_v42 = vld [vmem:[#allocation3 + $0x9a] sm:$0xff] }
 0x35a   : > { %8733 = vmatprep.mubr.msk.f32.mxu0 %vm677_vm3, %v3204_v24  ;;  %v3905_v24 = vld [vmem:[#allocation3 + $0xaa] sm:$0xff] }
 0x35d   : > { %8734 = vmatmul.mubr.msk.f32.gmra.mrb[60].mxu0 %vm677_vm3, %v3205_v45  ;;  %v3906_v45 = vld [vmem:[#allocation3 + $0xb2] sm:$0xff] }
 0x35e   : > { %8736 = vmatprep.mubr.msk.f32.mxu0 %vm677_vm3, %v3206_v13  ;;  %v3907_v13 = vld [vmem:[#allocation3 + $0xc2] sm:$0xff] }
 0x361   : > { %8737 = vmatmul.mubr.msk.f32.gmra.mrb[62].mxu0 %vm677_vm3, %v3207_v60  ;;  %v3908_v60 = vld [vmem:[#allocation3 + $0xca] sm:$0xff] }
 0x362   : > { %8747 = vmatprep.mubr.msk.f32.mxu0 %vm677_vm3, %v3891_v18  ;;  %v3909_v18 = vld [vmem:[#allocation3 + $0xda] sm:$0xff] }
 0x365   : > { %8748 = vmatmul.mubr.msk.f32.vlgmr.msra.gmra.mrb[32].mxu0 %vm677_vm3, %v3892_v3  ;;  %v3910_v3 = vld [vmem:[#allocation3 + $0xe2] sm:$0xff] }
 0x366   : > { %8750 = vmatprep.mubr.msk.f32.mxu0 %vm677_vm3, %v3893_v16  ;;  %v3911_v16 = vld [vmem:[#allocation3 + $0xf2] sm:$0xff] }
 0x369   : > { %8751 = vmatmul.mubr.msk.f32.gmra.mrb[34].mxu0 %vm677_vm3, %v3894_v7  ;;  %v3912_v7 = vld [vmem:[#allocation3 + $0xfa] sm:$0xff] }
 0x36a   : > { %8753 = vmatprep.mubr.msk.f32.mxu0 %vm677_vm3, %v3895_v31  ;;  %v3913_v31 = vld [vmem:[#allocation3 + $0x10a] sm:$0xff] }
 0x36d   : > { %8754 = vmatmul.mubr.msk.f32.gmra.mrb[36].mxu0 %vm677_vm3, %v3896_v22  ;;  %v3914_v22 = vld [vmem:[#allocation3 + $0x112] sm:$0xff] }
 0x36e   : > { %8756 = vmatprep.mubr.msk.f32.mxu0 %vm677_vm3, %v3897_v55  ;;  %v3915_v55 = vld [vmem:[#allocation3 + $0x122] sm:$0xff] }
 0x371   : > { %8757 = vmatmul.mubr.msk.f32.gmra.mrb[38].mxu0 %vm677_vm3, %v3898_v14  ;;  %v3916_v14 = vld [vmem:[#allocation3 + $0x12a] sm:$0xff] }
 0x372   : > { %8759 = vmatprep.mubr.msk.f32.mxu0 %vm677_vm3, %v3899_v12  ;;  %v3917_v12 = vld [vmem:[#allocation3 + $0x13a] sm:$0xff] }
 0x375   : > { %8760 = vmatmul.mubr.msk.f32.gmra.mrb[40].mxu0 %vm677_vm3, %v3900_v37  ;;  %v3918_v37 = vld [vmem:[#allocation3 + $0x142] sm:$0xff] }
 0x376   : > { %8762 = vmatprep.mubr.msk.f32.mxu0 %vm677_vm3, %v3901_v29  ;;  %v3919_v29 = vld [vmem:[#allocation3 + $0x152] sm:$0xff] }
 0x379   : > { %8763 = vmatmul.mubr.msk.f32.gmra.mrb[42].mxu0 %vm677_vm3, %v3902_v40  ;;  %v3920_v40 = vld [vmem:[#allocation3 + $0x15a] sm:$0xff] }
 0x37a   : > { %8765 = vmatprep.mubr.msk.f32.mxu0 %vm677_vm3, %v3903_v19  ;;  %v3921_v19 = vld [vmem:[#allocation3 + $0x16a] sm:$0xff] }
 0x37d   : > { %8766 = vmatmul.mubr.msk.f32.gmra.mrb[44].mxu0 %vm677_vm3, %v3904_v42  ;;  %v3922_v42 = vld [vmem:[#allocation3 + $0x172] sm:$0xff] }
 0x37e   : > { %8768 = vmatprep.mubr.msk.f32.mxu0 %vm677_vm3, %v3905_v24  ;;  %v4448_v24 = vld [vmem:[%s10851_s19] sm:$0xff] }
 0x381   : > { %8769 = vmatmul.mubr.msk.f32.gmra.mrb[46].mxu0 %vm677_vm3, %v3906_v45  ;;  %v4449_v45 = vld [vmem:[%s10851_s19 + $0x8] sm:$0xff] }
 0x382   : > { %8771 = vmatprep.mubr.msk.f32.mxu0 %vm677_vm3, %v3907_v13  ;;  %v9187_v13 = vpack.c.bf16 %v4449_v45, %v4448_v24  ;;  %v4450_v45 = vld [vmem:[%s10851_s19 + $0x10] sm:$0xff] }
 0x384   : > { %9188 = vmatprep.subr.bf16.mxu1 %v9187_v13 }
 0x385   : > { %8772 = vmatmul.mubr.msk.f32.gmra.mrb[48].mxu0 %vm677_vm3, %v3908_v60  ;;  %v10928_v60 = vld [vmem:[%s583_s24] ss:$0 sm:$0xff]  ;;  %s9674_s24 = scalar_lea.vmem %s11665_s25, 256 }
 0x386   : > { %8774 = vmatprep.mubr.msk.f32.mxu0 %vm677_vm3, %v3909_v18  ;;  %p9675_p1 = scmp.ne.s32.totalorder %s11665_s25, %s9674_s24  ;;  %p9682_p9 = scmp.lt.s32.totalorder %s9680_s17, %s9674_s24 }
 0x388   : > { %p9676_p10 = pnand %p9675_p1, %p11816_p11  ;;  %p9683_p3 = por %p9682_p9, %p9681_p7 }
 0x389   : > { %8775 = vmatmul.mubr.msk.f32.gmra.mrb[50].mxu0 %vm677_vm3, %v3910_v3 }
 0x38a   : > { %8777 = vmatprep.mubr.msk.f32.mxu0 %vm677_vm3, %v3911_v16  ;;  %p9677_p5 = pneg %p9676_p10 }
 0x38c   : > { %p9684_p12 = pnand %p9683_p3, %p9677_p5 }
 0x38d   : > { %8778 = vmatmul.mubr.msk.f32.gmra.mrb[52].mxu0 %vm677_vm3, %v3912_v7 }
 0x38e   : > { %8780 = vmatprep.mubr.msk.f32.mxu0 %vm677_vm3, %v3913_v31 }
 0x391   : > { %8781 = vmatmul.mubr.msk.f32.gmra.mrb[54].mxu0 %vm677_vm3, %v3914_v22 }
 0x392   : > { %8783 = vmatprep.mubr.msk.f32.mxu0 %vm677_vm3, %v3915_v55 }
 0x395   : > { %8784 = vmatmul.mubr.msk.f32.gmra.mrb[56].mxu0 %vm677_vm3, %v3916_v14 }
 0x396   : > { %8786 = vmatprep.mubr.msk.f32.mxu0 %vm677_vm3, %v3917_v12 }
 0x399   : > { %8787 = vmatmul.mubr.msk.f32.gmra.mrb[58].mxu0 %vm677_vm3, %v3918_v37 }
 0x39a   : > { %8789 = vmatprep.mubr.msk.f32.mxu0 %vm677_vm3, %v3919_v29 }
 0x39d   : > { %8790 = vmatmul.mubr.msk.f32.gmra.mrb[60].mxu0 %vm677_vm3, %v3920_v40 }
 0x39e   : > { %8792 = vmatprep.mubr.msk.f32.mxu0 %vm677_vm3, %v3921_v19 }
 0x3a1   : > { %8793 = vmatmul.mubr.msk.f32.gmra.mrb[62].mxu0 %vm677_vm3, %v3922_v42 }
 0x438   : > { %v8749_v18 = vpop.f32.mrb[32].mxu0 }
 0x439   : > { %v4289_v3 = vadd.f32 %v8749_v18, %v10928_v60  ;;  %v4090_v16 = vpop.f32.mrb[33].mxu0  ;;  %v4451_v18 = vld [vmem:[%s10851_s19 + $0x18] sm:$0xff] }
 0x43a   : > { %v4288_v7 = vadd.f32 %v10928_v60, %v4090_v16 }
 0x43b   : > { %v10934_v31 = vadd.f32 %v4289_v3, %v1905_v38 }
 0x43c   : > { %v10938_v22 = vadd.f32 %v4288_v7, %v1904_v41  ;;  %v8752_v55 = vpop.f32.mrb[34].mxu0 }
 0x43d   : > { %v4353_v14 = vmax.f32 %v10934_v31, 0.0  ;;  %v4291_v12 = vadd.f32 %v8752_v55, %v10928_v60  ;;  %v4100_v37 = vpop.f32.mrb[35].mxu0  ;;  %v9191_v55 = vpack.c.bf16 %v4451_v18, %v4450_v45 }
 0x43e   : > { %v4352_v29 = vmax.f32 %v10938_v22, 0.0  ;;  %v4290_v40 = vadd.f32 %v10928_v60, %v4100_v37 }
 0x43f   : > { %4385 = vst.msk [vmem:[#allocation3 + $0x9] sm:$0xff] %vm677_vm3, %v4353_v14  ;;  %v10949_v35 = vadd.f32 %v4291_v12, %v1907_v46 }
 0x440   : > { %4384 = vst.msk [vmem:[#allocation3 + $0x1] sm:$0xff] %vm677_vm3, %v4352_v29  ;;  %v10956_v36 = vadd.f32 %v4290_v40, %v1906_v49  ;;  %v8755_v38 = vpop.f32.mrb[36].mxu0 }
 0x441   : > { %v4355_v41 = vmax.f32 %v10949_v35, 0.0  ;;  %v4293_v19 = vadd.f32 %v8755_v38, %v10928_v60  ;;  %v4110_v42 = vpop.f32.mrb[37].mxu0  ;;  %v7629_v38 = vld [vmem:[%s10851_s19 + $0x40] sm:$0xff] }
 0x442   : > { %v4354_v24 = vmax.f32 %v10956_v36, 0.0  ;;  %v4292_v43 = vadd.f32 %v10928_v60, %v4110_v42 }
 0x443   : > { %4387 = vst.msk [vmem:[#allocation3 + $0x21] sm:$0xff] %vm677_vm3, %v4355_v41  ;;  %v10967_v46 = vadd.f32 %v4293_v19, %v1909_v56  ;;  %v7630_v19 = vld [vmem:[%s10851_s19 + $0x48] sm:$0xff] }
 0x444   : > { %4386 = vst.msk [vmem:[#allocation3 + $0x19] sm:$0xff] %vm677_vm3, %v4354_v24  ;;  %v10974_v44 = vadd.f32 %v4292_v43, %v1908_v59  ;;  %v8758_v49 = vpop.f32.mrb[38].mxu0  ;;  %v11011_v45 = vpack.c.bf16 %v7630_v19, %v7629_v38 }
 0x445   : > { %v4357_v3 = vmax.f32 %v10967_v46, 0.0  ;;  %v4295_v16 = vadd.f32 %v8758_v49, %v10928_v60  ;;  %v4120_v51 = vpop.f32.mrb[39].mxu0 }
 0x446   : > { %v4356_v56 = vmax.f32 %v10974_v44, 0.0  ;;  %v4294_v7 = vadd.f32 %v10928_v60, %v4120_v51  ;;  %v4453_v40 = vld [vmem:[#allocation3 + $0x9] sm:$0xff] }
 0x447   : > { %4389 = vst.msk [vmem:[#allocation3 + $0x39] sm:$0xff] %vm677_vm3, %v4357_v3  ;;  %v10987_v52 = vadd.f32 %v4295_v16, %v1911_v6  ;;  %v4452_v59 = vld [vmem:[#allocation3 + $0x1] sm:$0xff] }
 0x448   : > { %4388 = vst.msk [vmem:[#allocation3 + $0x31] sm:$0xff] %vm677_vm3, %v4356_v56  ;;  %v10994_v12 = vadd.f32 %v4294_v7, %v1910_v9  ;;  %v8761_v37 = vpop.f32.mrb[40].mxu0  ;;  %8803 = vmatprep.mubr.msk.f32.mxu1 %vm677_vm3, %v4452_v59 }
 0x449   : > { %v4359_v61 = vmax.f32 %v10987_v52, 0.0  ;;  %v4297_v6 = vadd.f32 %v8761_v37, %v10928_v60  ;;  %v4130_v42 = vpop.f32.mrb[41].mxu0  ;;  %8804 = vmatmul.mubr.msk.f32.vlgmr.msra.gmra.mrb[64].mxu1 %vm677_vm3, %v4453_v40 }
 0x44a   : > { %v4358_v43 = vmax.f32 %v10994_v12, 0.0  ;;  %v4296_v49 = vadd.f32 %v10928_v60, %v4130_v42  ;;  %9190 = vmatpush3.bf16.msra.mxu1 %v9187_v13  ;;  %v4455_v16 = vld [vmem:[#allocation3 + $0x21] sm:$0xff] }
 0x44b   : > { %4391 = vst.msk [vmem:[#allocation3 + $0x51] sm:$0xff] %vm677_vm3, %v4359_v61  ;;  %v11009_v1 = vadd.f32 %v4297_v6, %v1913_v17  ;;  %v4454_v9 = vld [vmem:[#allocation3 + $0x19] sm:$0xff]  ;;  %9192 = vmatprep.subr.bf16.mxu1 %v9191_v55 }
 0x44c   : > { %4390 = vst.msk [vmem:[#allocation3 + $0x49] sm:$0xff] %vm677_vm3, %v4358_v43  ;;  %v11018_v18 = vadd.f32 %v4296_v49, %v1912_v20  ;;  %v8764_v13 = vpop.f32.mrb[42].mxu0  ;;  %8806 = vmatprep.mubr.msk.f32.mxu1 %vm677_vm3, %v4454_v9 }
 0x44d   : > { %v4361_v11 = vmax.f32 %v11009_v1, 0.0  ;;  %v4299_v17 = vadd.f32 %v8764_v13, %v10928_v60  ;;  %v4140_v51 = vpop.f32.mrb[43].mxu0  ;;  %8807 = vmatmul.mubr.msk.f32.gmra.mrb[66].mxu1 %vm677_vm3, %v4455_v16 }
 0x44e   : > { %v4360_v7 = vmax.f32 %v11018_v18, 0.0  ;;  %v4298_v59 = vadd.f32 %v10928_v60, %v4140_v51  ;;  %9194 = vmatpush3.bf16.msra.mxu1 %v9191_v55  ;;  %v4457_v40 = vld [vmem:[#allocation3 + $0x39] sm:$0xff] }
 0x44f   : > { %4393 = vst.msk [vmem:[#allocation3 + $0x69] sm:$0xff] %vm677_vm3, %v4361_v11  ;;  %v11031_v15 = vadd.f32 %v4299_v17, %v1915_v30  ;;  %v4456_v20 = vld [vmem:[#allocation3 + $0x31] sm:$0xff]  ;;  %9196 = vmatprep.subr.bf16.mxu1 %v11011_v45 }
 0x450   : > { %4392 = vst.msk [vmem:[#allocation3 + $0x61] sm:$0xff] %vm677_vm3, %v4360_v7  ;;  %v11039_v37 = vadd.f32 %v4298_v59, %v1914_v34  ;;  %v8767_v55 = vpop.f32.mrb[44].mxu0  ;;  %8809 = vmatprep.mubr.msk.f32.mxu1 %vm677_vm3, %v4456_v20  ;;  %v11781_v59 = vmax.f32 %v10511_v28, 0.0  ;;  %v11782_v28 = vmax.f32 %v10521_v5, 0.0 }
 0x451   : > { %v4363_v38 = vmax.f32 %v11031_v15, 0.0  ;;  %v4301_v0 = vadd.f32 %v8767_v55, %v10928_v60  ;;  %v4150_v30 = vpop.f32.mrb[45].mxu0  ;;  %8810 = vmatmul.mubr.msk.f32.gmra.mrb[68].mxu1 %vm677_vm3, %v4457_v40 }
 0x452   : > { %v4362_v19 = vmax.f32 %v11039_v37, 0.0  ;;  %v4300_v6 = vadd.f32 %v10928_v60, %v4150_v30  ;;  %v4459_v9 = vld [vmem:[#allocation3 + $0x51] sm:$0xff] }
 0x453   : > { %4395 = vst.msk [vmem:[#allocation3 + $0x81] sm:$0xff] %vm677_vm3, %v4363_v38  ;;  %v11052_v23 = vadd.f32 %v4301_v0, %v1917_v27  ;;  %v4458_v34 = vld [vmem:[#allocation3 + $0x49] sm:$0xff] }
 0x454   : > { %4394 = vst.msk [vmem:[#allocation3 + $0x79] sm:$0xff] %vm677_vm3, %v4362_v19  ;;  %v11059_v42 = vadd.f32 %v4300_v6, %v1916_v50  ;;  %v8770_v49 = vpop.f32.mrb[46].mxu0  ;;  %8812 = vmatprep.mubr.msk.f32.mxu1 %vm677_vm3, %v4458_v34 }
 0x455   : > { %v4365_v13 = vmax.f32 %v11052_v23, 0.0  ;;  %v4303_v16 = vadd.f32 %v8770_v49, %v10928_v60  ;;  %v4160_v39 = vpop.f32.mrb[47].mxu0  ;;  %8813 = vmatmul.mubr.msk.f32.gmra.mrb[70].mxu1 %vm677_vm3, %v4459_v9 }
 0x456   : > { %v4364_v27 = vmax.f32 %v11059_v42, 0.0  ;;  %v4302_v17 = vadd.f32 %v10928_v60, %v4160_v39  ;;  %v4461_v40 = vld [vmem:[#allocation3 + $0x69] sm:$0xff] }
 0x457   : > { %4397 = vst.msk [vmem:[#allocation3 + $0x99] sm:$0xff] %vm677_vm3, %v4365_v13  ;;  %v11072_v50 = vadd.f32 %v4303_v16, %v11780_v26  ;;  %v4460_v51 = vld [vmem:[#allocation3 + $0x61] sm:$0xff]  ;;  %v11783_v16 = vmax.f32 %v10527_v8, 0.0  ;;  %v11784_v8 = vmax.f32 %v10537_v25, 0.0 }
 0x458   : > { %4396 = vst.msk [vmem:[#allocation3 + $0x91] sm:$0xff] %vm677_vm3, %v4364_v27  ;;  %v11079_v20 = vadd.f32 %v4302_v17, %v11781_v59  ;;  %v8773_v55 = vpop.f32.mrb[48].mxu0  ;;  %8815 = vmatprep.mubr.msk.f32.mxu1 %vm677_vm3, %v4460_v51 }
 0x459   : > { %v11766_v0 = vmax.f32 %v11072_v50, 0.0  ;;  %v4305_v30 = vadd.f32 %v8773_v55, %v10928_v60  ;;  %v4170_v54 = vpop.f32.mrb[49].mxu0  ;;  %8816 = vmatmul.mubr.msk.f32.gmra.mrb[72].mxu1 %vm677_vm3, %v4461_v40 }
 0x45a   : > { %v11765_v6 = vmax.f32 %v11079_v20, 0.0  ;;  %v4304_v34 = vadd.f32 %v10928_v60, %v4170_v54  ;;  %v4463_v26 = vld [vmem:[#allocation3 + $0x81] sm:$0xff] }
 0x45b   : > { %4399 = vst.msk [vmem:[#allocation3 + $0xb1] sm:$0xff] %vm677_vm3, %v11766_v0  ;;  %v11092_v49 = vadd.f32 %v4305_v30, %v11782_v28  ;;  %v4462_v9 = vld [vmem:[#allocation3 + $0x79] sm:$0xff] }
 0x45c   : > { %4398 = vst.msk [vmem:[#allocation3 + $0xa9] sm:$0xff] %vm677_vm3, %v11765_v6  ;;  %v11099_v39 = vadd.f32 %v4304_v34, %v11783_v16  ;;  %v8776_v17 = vpop.f32.mrb[50].mxu0  ;;  %8818 = vmatprep.mubr.msk.f32.mxu1 %vm677_vm3, %v4462_v9  ;;  %v11785_v34 = vmax.f32 %v10543_v33, 0.0  ;;  %v11786_v33 = vmax.f32 %v10553_v58, 0.0  ;;  %v7735_v6 = vld [vmem:[%s9970_s22 + $0x48] sm:$0xff] }
 0x45d   : > { %v11764_v51 = vmax.f32 %v11092_v49, 0.0  ;;  %v4307_v59 = vadd.f32 %v8776_v17, %v10928_v60  ;;  %v4180_v5 = vpop.f32.mrb[51].mxu0  ;;  %8819 = vmatmul.mubr.msk.f32.gmra.mrb[74].mxu1 %vm677_vm3, %v4463_v26 }
 0x45e   : > { %v11763_v55 = vmax.f32 %v11099_v39, 0.0  ;;  %v4306_v40 = vadd.f32 %v10928_v60, %v4180_v5  ;;  %v4465_v16 = vld [vmem:[#allocation3 + $0x99] sm:$0xff] }
 0x45f   : > { %4401 = vst.msk [vmem:[#allocation3 + $0xc9] sm:$0xff] %vm677_vm3, %v11764_v51  ;;  %v11112_v30 = vadd.f32 %v4307_v59, %v11784_v8  ;;  %v4464_v54 = vld [vmem:[#allocation3 + $0x91] sm:$0xff] }
 0x460   : > { %4400 = vst.msk [vmem:[#allocation3 + $0xc1] sm:$0xff] %vm677_vm3, %v11763_v55  ;;  %v11119_v28 = vadd.f32 %v4306_v40, %v11785_v34  ;;  %v8779_v9 = vpop.f32.mrb[52].mxu0  ;;  %8821 = vmatprep.mubr.msk.f32.mxu1 %vm677_vm3, %v4464_v54  ;;  %v11787_v54 = vmax.f32 %v10559_v62, 0.0  ;;  %v11788_v62 = vmax.f32 %v10569_v21, 0.0  ;;  %v4417_v55 = vld [vmem:[#allocation3 + $0x8] sm:$0xff] }
 0x461   : > { %v11749_v17 = vmax.f32 %v11112_v30, 0.0  ;;  %v4309_v26 = vadd.f32 %v8779_v9, %v10928_v60  ;;  %v4190_v25 = vpop.f32.mrb[53].mxu0  ;;  %8822 = vmatmul.mubr.msk.f32.gmra.mrb[76].mxu1 %vm677_vm3, %v4465_v16 }
 0x462   : > { %v11750_v59 = vmax.f32 %v11119_v28, 0.0  ;;  %v4308_v5 = vadd.f32 %v10928_v60, %v4190_v25  ;;  %v4467_v16 = vld [vmem:[#allocation3 + $0xb1] sm:$0xff] }
 0x463   : > { %4403 = vst.msk [vmem:[#allocation3 + $0xe1] sm:$0xff] %vm677_vm3, %v11749_v17  ;;  %v11132_v40 = vadd.f32 %v4309_v26, %v11786_v33  ;;  %v4466_v8 = vld [vmem:[#allocation3 + $0xa9] sm:$0xff] }
 0x464   : > { %4402 = vst.msk [vmem:[#allocation3 + $0xd9] sm:$0xff] %vm677_vm3, %v11750_v59  ;;  %v11139_v34 = vadd.f32 %v4308_v5, %v11787_v54  ;;  %v8782_v9 = vpop.f32.mrb[54].mxu0  ;;  %8824 = vmatprep.mubr.msk.f32.mxu1 %vm677_vm3, %v4466_v8  ;;  %v11789_v54 = vmax.f32 %v10575_v32, 0.0  ;;  %v11790_v32 = vmax.f32 %v10585_v2, 0.0 }
 0x465   : > { %v11751_v25 = vmax.f32 %v11132_v40, 0.0  ;;  %v4311_v17 = vadd.f32 %v8782_v9, %v10928_v60  ;;  %v4200_v58 = vpop.f32.mrb[55].mxu0  ;;  %8825 = vmatmul.mubr.msk.f32.gmra.mrb[78].mxu1 %vm677_vm3, %v4467_v16 }
 0x466   : > { %v11752_v26 = vmax.f32 %v11139_v34, 0.0  ;;  %v4310_v33 = vadd.f32 %v10928_v60, %v4200_v58  ;;  %v4469_v58 = vld [vmem:[#allocation3 + $0xc9] sm:$0xff] }
 0x467   : > { %4405 = vst.msk [vmem:[#allocation3 + $0xf9] sm:$0xff] %vm677_vm3, %v11751_v25  ;;  %v11152_v5 = vadd.f32 %v4311_v17, %v11788_v62  ;;  %v4468_v8 = vld [vmem:[#allocation3 + $0xc1] sm:$0xff] }
 0x468   : > { %4404 = vst.msk [vmem:[#allocation3 + $0xf1] sm:$0xff] %vm677_vm3, %v11752_v26  ;;  %v11159_v9 = vadd.f32 %v4310_v33, %v11789_v54  ;;  %v8785_v16 = vpop.f32.mrb[56].mxu0  ;;  %8827 = vmatprep.mubr.msk.f32.mxu1 %vm677_vm3, %v4468_v8  ;;  %v11791_v54 = vmax.f32 %v10591_v10, 0.0  ;;  %v11792_v10 = vmax.f32 %v10601_v57, 0.0 }
 0x469   : > { %v11753_v59 = vmax.f32 %v11152_v5, 0.0  ;;  %v4313_v25 = vadd.f32 %v8785_v16, %v10928_v60  ;;  %v4210_v21 = vpop.f32.mrb[57].mxu0  ;;  %8828 = vmatmul.mubr.msk.f32.gmra.mrb[80].mxu1 %vm677_vm3, %v4469_v58 }
 0x46a   : > { %v11754_v17 = vmax.f32 %v11159_v9, 0.0  ;;  %v4312_v62 = vadd.f32 %v10928_v60, %v4210_v21  ;;  %v4471_v21 = vld [vmem:[#allocation3 + $0xe1] sm:$0xff] }
 0x46b   : > { %4407 = vst.msk [vmem:[#allocation3 + $0x111] sm:$0xff] %vm677_vm3, %v11753_v59  ;;  %v11172_v33 = vadd.f32 %v4313_v25, %v11790_v32  ;;  %v4470_v8 = vld [vmem:[#allocation3 + $0xd9] sm:$0xff] }
 0x46c   : > { %4406 = vst.msk [vmem:[#allocation3 + $0x109] sm:$0xff] %vm677_vm3, %v11754_v17  ;;  %v11179_v16 = vadd.f32 %v4312_v62, %v11791_v54  ;;  %v8788_v58 = vpop.f32.mrb[58].mxu0  ;;  %8830 = vmatprep.mubr.msk.f32.mxu1 %vm677_vm3, %v4470_v8  ;;  %v11793_v54 = vmax.f32 %v10607_v4, 0.0  ;;  %v11794_v4 = vmax.f32 %v10617_v53, 0.0 }
 0x46d   : > { %v11755_v26 = vmax.f32 %v11172_v33, 0.0  ;;  %v4315_v59 = vadd.f32 %v8788_v58, %v10928_v60  ;;  %v4220_v2 = vpop.f32.mrb[59].mxu0  ;;  %8831 = vmatmul.mubr.msk.f32.gmra.mrb[82].mxu1 %vm677_vm3, %v4471_v21 }
 0x46e   : > { %v11756_v25 = vmax.f32 %v11179_v16, 0.0  ;;  %v4314_v32 = vadd.f32 %v10928_v60, %v4220_v2  ;;  %v4473_v2 = vld [vmem:[#allocation3 + $0xf9] sm:$0xff] }
 0x46f   : > { %4409 = vst.msk [vmem:[#allocation3 + $0x129] sm:$0xff] %vm677_vm3, %v11755_v26  ;;  %v11192_v62 = vadd.f32 %v4315_v59, %v11792_v10  ;;  %v4472_v8 = vld [vmem:[#allocation3 + $0xf1] sm:$0xff] }
 0x470   : > { %4408 = vst.msk [vmem:[#allocation3 + $0x121] sm:$0xff] %vm677_vm3, %v11756_v25  ;;  %v11199_v58 = vadd.f32 %v4314_v32, %v11793_v54  ;;  %v8791_v21 = vpop.f32.mrb[60].mxu0  ;;  %8833 = vmatprep.mubr.msk.f32.mxu1 %vm677_vm3, %v4472_v8  ;;  %v11795_v54 = vmax.f32 %v10623_v63, 0.0  ;;  %v11796_v63 = vmax.f32 %v10633_v47, 0.0 }
 0x471   : > { %v11757_v17 = vmax.f32 %v11192_v62, 0.0  ;;  %v4317_v26 = vadd.f32 %v8791_v21, %v10928_v60  ;;  %v4230_v57 = vpop.f32.mrb[61].mxu0  ;;  %8834 = vmatmul.mubr.msk.f32.gmra.mrb[84].mxu1 %vm677_vm3, %v4473_v2 }
 0x472   : > { %v11762_v59 = vmax.f32 %v11199_v58, 0.0  ;;  %v4316_v10 = vadd.f32 %v10928_v60, %v4230_v57  ;;  %v4475_v57 = vld [vmem:[#allocation3 + $0x111] sm:$0xff] }
 0x473   : > { %4411 = vst.msk [vmem:[#allocation3 + $0x141] sm:$0xff] %vm677_vm3, %v11757_v17  ;;  %v11212_v32 = vadd.f32 %v4317_v26, %v11794_v4  ;;  %v4474_v8 = vld [vmem:[#allocation3 + $0x109] sm:$0xff] }
 0x474   : > { %4410 = vst.msk [vmem:[#allocation3 + $0x139] sm:$0xff] %vm677_vm3, %v11762_v59  ;;  %v11219_v21 = vadd.f32 %v4316_v10, %v11795_v54  ;;  %v8794_v2 = vpop.f32.mrb[62].mxu0  ;;  %8836 = vmatprep.mubr.msk.f32.mxu1 %vm677_vm3, %v4474_v8  ;;  %v11797_v54 = vmax.f32 %v10639_v48, 0.0 }
 0x475   : > { %v11761_v25 = vmax.f32 %v11212_v32, 0.0  ;;  %v4319_v17 = vadd.f32 %v8794_v2, %v10928_v60  ;;  %v4240_v53 = vpop.f32.mrb[63].mxu0  ;;  %8837 = vmatmul.mubr.msk.f32.gmra.mrb[86].mxu1 %vm677_vm3, %v4475_v57 }
 0x476   : > { %v11760_v26 = vmax.f32 %v11219_v21, 0.0  ;;  %v4318_v4 = vadd.f32 %v10928_v60, %v4240_v53  ;;  %v4477_v60 = vld [vmem:[#allocation3 + $0x129] sm:$0xff] }
 0x477   : > { %4413 = vst.msk [vmem:[#allocation3 + $0x159] sm:$0xff] %vm677_vm3, %v11761_v25  ;;  %v11232_v10 = vadd.f32 %v4319_v17, %v11796_v63  ;;  %v4476_v8 = vld [vmem:[#allocation3 + $0x121] sm:$0xff] }
 0x478   : > { %4412 = vst.msk [vmem:[#allocation3 + $0x151] sm:$0xff] %vm677_vm3, %v11760_v26  ;;  %v11239_v2 = vadd.f32 %v4318_v4, %v11797_v54  ;;  %8839 = vmatprep.mubr.msk.f32.mxu1 %vm677_vm3, %v4476_v8  ;;  %v7631_v8 = vld [vmem:[%s10851_s19 + $0x50] sm:$0xff]  ;;  %v7668_v26 = vld [vmem:[%s9970_s22 + $0x30] sm:$0xff]  ;;  %v7669_v25 = vld [vmem:[%s9970_s22 + $0x38] sm:$0xff] }
 0x479   : > { %v11759_v57 = vmax.f32 %v11232_v10, 0.0  ;;  %8840 = vmatmul.mubr.msk.f32.gmra.mrb[88].mxu1 %vm677_vm3, %v4477_v60  ;;  %v4416_v60 = vld [vmem:[#allocation3] sm:$0xff]  ;;  %v9207_v59 = vpack.c.bf16 %v7669_v25, %v7668_v26  ;;  %v4421_v25 = vld [vmem:[#allocation3 + $0x38] sm:$0xff]  ;;  %v4423_v26 = vld [vmem:[#allocation3 + $0x50] sm:$0xff] }
 0x47a   : > { %v11758_v47 = vmax.f32 %v11239_v2, 0.0  ;;  %v4479_v48 = vld [vmem:[#allocation3 + $0x141] sm:$0xff] }
 0x47b   : > { %4415 = vst.msk [vmem:[#allocation3 + $0x171] sm:$0xff] %vm677_vm3, %v11759_v57  ;;  %v4478_v17 = vld [vmem:[#allocation3 + $0x139] sm:$0xff] }
 0x47c   : > { %4414 = vst.msk [vmem:[#allocation3 + $0x169] sm:$0xff] %vm677_vm3, %v11758_v47  ;;  %8842 = vmatprep.mubr.msk.f32.mxu1 %vm677_vm3, %v4478_v17  ;;  %v7632_v47 = vld [vmem:[%s10851_s19 + $0x58] sm:$0xff]  ;;  %v7666_v17 = vld [vmem:[%s9970_s22 + $0x20] sm:$0xff] }
 0x47d   : > { %8843 = vmatmul.mubr.msk.f32.gmra.mrb[90].mxu1 %vm677_vm3, %v4479_v48  ;;  %v7667_v57 = vld [vmem:[%s9970_s22 + $0x28] sm:$0xff] }
 0x47e   : > { %v4481_v4 = vld [vmem:[#allocation3 + $0x159] sm:$0xff]  ;;  %v9203_v48 = vpack.c.bf16 %v7667_v57, %v7666_v17  ;;  %v4425_v57 = vld [vmem:[#allocation3 + $0x68] sm:$0xff] }
 0x47f   : > { %v4480_v53 = vld [vmem:[#allocation3 + $0x151] sm:$0xff]  ;;  %v4430_v17 = vld [vmem:[#allocation3 + $0xa8] sm:$0xff] }
 0x480   : > { %8845 = vmatprep.mubr.msk.f32.mxu1 %vm677_vm3, %v4480_v53  ;;  %v9199_v53 = vpack.c.bf16 %v7632_v47, %v7631_v8  ;;  %9204 = vmatprep.subr.bf16.mxu0 %v9203_v48  ;;  %v4426_v47 = vld [vmem:[#allocation3 + $0x78] sm:$0xff]  ;;  %v4428_v8 = vld [vmem:[#allocation3 + $0x90] sm:$0xff] }
 0x481   : > { %8846 = vmatmul.mubr.msk.f32.gmra.mrb[92].mxu1 %vm677_vm3, %v4481_v4  ;;  %v4418_v4 = vld [vmem:[#allocation3 + $0x18] sm:$0xff]  ;;  %9206 = vmatpush3.bf16.msra.mxu0 %v9203_v48  ;;  %v4431_v48 = vld [vmem:[#allocation3 + $0xb0] sm:$0xff] }
 0x482   : > { %v4483_v54 = vld [vmem:[#allocation3 + $0x171] sm:$0xff]  ;;  %9208 = vmatprep.subr.bf16.mxu0 %v9207_v59 }
 0x483   : > { %v4482_v63 = vld [vmem:[#allocation3 + $0x169] sm:$0xff] }
 0x484   : > { %8848 = vmatprep.mubr.msk.f32.mxu1 %vm677_vm3, %v4482_v63  ;;  %v4419_v63 = vld [vmem:[#allocation3 + $0x20] sm:$0xff] }
 0x485   : > { %8849 = vmatmul.mubr.msk.f32.gmra.mrb[94].mxu1 %vm677_vm3, %v4483_v54  ;;  %v4420_v54 = vld [vmem:[#allocation3 + $0x30] sm:$0xff]  ;;  %9210 = vmatpush3.bf16.msra.mxu0 %v9207_v59  ;;  %v4427_v59 = vld [vmem:[#allocation3 + $0x80] sm:$0xff] }
 0x486   : > { %8859 = vmatprep.mubr.msk.f32.mxu1 %vm677_vm3, %v4416_v60  ;;  %v4429_v60 = vld [vmem:[#allocation3 + $0x98] sm:$0xff] }
 0x489   : > { %8860 = vmatmul.mubr.msk.f32.vlgmr.msra.gmra.mrb[64].mxu1 %vm677_vm3, %v4417_v55  ;;  %v4422_v55 = vld [vmem:[#allocation3 + $0x48] sm:$0xff] }
 0x48a   : > { %9198 = vmatpush3.bf16.msra.mxu1 %v11011_v45  ;;  %8862 = vmatprep.mubr.msk.f32.mxu1 %vm677_vm3, %v4418_v4  ;;  %v4424_v45 = vld [vmem:[#allocation3 + $0x60] sm:$0xff]  ;;  %v4433_v4 = vld [vmem:[#allocation3 + $0xc8] sm:$0xff] }
 0x48b   : > { %9200 = vmatprep.subr.bf16.mxu1 %v9199_v53 }
 0x48d   : > { %8863 = vmatmul.mubr.msk.f32.gmra.mrb[66].mxu1 %vm677_vm3, %v4419_v63  ;;  %v4434_v63 = vld [vmem:[#allocation3 + $0xd8] sm:$0xff] }
 0x48e   : > { %8865 = vmatprep.mubr.msk.f32.mxu1 %vm677_vm3, %v4420_v54  ;;  %9202 = vmatpush3.bf16.msra.mxu1 %v9199_v53  ;;  %v4432_v53 = vld [vmem:[#allocation3 + $0xc0] sm:$0xff] }
 0x48f   : > { %v4435_v54 = vld [vmem:[#allocation3 + $0xe0] sm:$0xff] }
 0x491   : > { %8866 = vmatmul.mubr.msk.f32.gmra.mrb[68].mxu1 %vm677_vm3, %v4421_v25  ;;  %v4436_v25 = vld [vmem:[#allocation3 + $0xf0] sm:$0xff] }
 0x492   : > { %8868 = vmatprep.mubr.msk.f32.mxu1 %vm677_vm3, %v4422_v55  ;;  %v4437_v55 = vld [vmem:[#allocation3 + $0xf8] sm:$0xff] }
 0x495   : > { %8869 = vmatmul.mubr.msk.f32.gmra.mrb[70].mxu1 %vm677_vm3, %v4423_v26  ;;  %v4438_v26 = vld [vmem:[#allocation3 + $0x108] sm:$0xff] }
 0x496   : > { %8871 = vmatprep.mubr.msk.f32.mxu1 %vm677_vm3, %v4424_v45  ;;  %v4439_v45 = vld [vmem:[#allocation3 + $0x110] sm:$0xff] }
 0x499   : > { %8872 = vmatmul.mubr.msk.f32.gmra.mrb[72].mxu1 %vm677_vm3, %v4425_v57  ;;  %v4440_v57 = vld [vmem:[#allocation3 + $0x120] sm:$0xff] }
 0x49a   : > { %8874 = vmatprep.mubr.msk.f32.mxu1 %vm677_vm3, %v4426_v47  ;;  %v4441_v47 = vld [vmem:[#allocation3 + $0x128] sm:$0xff] }
 0x49d   : > { %8875 = vmatmul.mubr.msk.f32.gmra.mrb[74].mxu1 %vm677_vm3, %v4427_v59  ;;  %v4442_v59 = vld [vmem:[#allocation3 + $0x138] sm:$0xff] }
 0x49e   : > { %8877 = vmatprep.mubr.msk.f32.mxu1 %vm677_vm3, %v4428_v8  ;;  %v4443_v8 = vld [vmem:[#allocation3 + $0x140] sm:$0xff] }
 0x4a1   : > { %8878 = vmatmul.mubr.msk.f32.gmra.mrb[76].mxu1 %vm677_vm3, %v4429_v60  ;;  %v4444_v60 = vld [vmem:[#allocation3 + $0x150] sm:$0xff] }
 0x4a2   : > { %8880 = vmatprep.mubr.msk.f32.mxu1 %vm677_vm3, %v4430_v17  ;;  %v4445_v17 = vld [vmem:[#allocation3 + $0x158] sm:$0xff] }
 0x4a5   : > { %8881 = vmatmul.mubr.msk.f32.gmra.mrb[78].mxu1 %vm677_vm3, %v4431_v48  ;;  %v4446_v48 = vld [vmem:[#allocation3 + $0x168] sm:$0xff] }
 0x4a6   : > { %8883 = vmatprep.mubr.msk.f32.mxu1 %vm677_vm3, %v4432_v53  ;;  %v4447_v53 = vld [vmem:[#allocation3 + $0x170] sm:$0xff] }
 0x4a9   : > { %8884 = vmatmul.mubr.msk.f32.gmra.mrb[80].mxu1 %vm677_vm3, %v4433_v4  ;;  %v5131_v4 = vld [vmem:[#allocation3 + $0x2] sm:$0xff] }
 0x4aa   : > { %8886 = vmatprep.mubr.msk.f32.mxu1 %vm677_vm3, %v4434_v63  ;;  %v5132_v63 = vld [vmem:[#allocation3 + $0xa] sm:$0xff] }
 0x4ad   : > { %8887 = vmatmul.mubr.msk.f32.gmra.mrb[82].mxu1 %vm677_vm3, %v4435_v54  ;;  %v5133_v54 = vld [vmem:[#allocation3 + $0x1a] sm:$0xff] }
 0x4ae   : > { %8889 = vmatprep.mubr.msk.f32.mxu1 %vm677_vm3, %v4436_v25  ;;  %v5134_v25 = vld [vmem:[#allocation3 + $0x22] sm:$0xff] }
 0x4b1   : > { %8890 = vmatmul.mubr.msk.f32.gmra.mrb[84].mxu1 %vm677_vm3, %v4437_v55  ;;  %v5135_v55 = vld [vmem:[#allocation3 + $0x32] sm:$0xff] }
 0x4b2   : > { %8892 = vmatprep.mubr.msk.f32.mxu1 %vm677_vm3, %v4438_v26  ;;  %v5136_v26 = vld [vmem:[#allocation3 + $0x3a] sm:$0xff] }
 0x4b5   : > { %8893 = vmatmul.mubr.msk.f32.gmra.mrb[86].mxu1 %vm677_vm3, %v4439_v45  ;;  %v5137_v45 = vld [vmem:[#allocation3 + $0x4a] sm:$0xff] }
 0x4b6   : > { %8895 = vmatprep.mubr.msk.f32.mxu1 %vm677_vm3, %v4440_v57  ;;  %v5138_v57 = vld [vmem:[#allocation3 + $0x52] sm:$0xff] }
 0x4b9   : > { %8896 = vmatmul.mubr.msk.f32.gmra.mrb[88].mxu1 %vm677_vm3, %v4441_v47  ;;  %v5139_v47 = vld [vmem:[#allocation3 + $0x62] sm:$0xff] }
 0x4ba   : > { %8898 = vmatprep.mubr.msk.f32.mxu1 %vm677_vm3, %v4442_v59  ;;  %v5140_v59 = vld [vmem:[#allocation3 + $0x6a] sm:$0xff] }
 0x4bd   : > { %8899 = vmatmul.mubr.msk.f32.gmra.mrb[90].mxu1 %vm677_vm3, %v4443_v8  ;;  %v5141_v8 = vld [vmem:[#allocation3 + $0x7a] sm:$0xff] }
 0x4be   : > { %8901 = vmatprep.mubr.msk.f32.mxu1 %vm677_vm3, %v4444_v60  ;;  %v5142_v60 = vld [vmem:[#allocation3 + $0x82] sm:$0xff] }
 0x4c1   : > { %8902 = vmatmul.mubr.msk.f32.gmra.mrb[92].mxu1 %vm677_vm3, %v4445_v17  ;;  %v5143_v17 = vld [vmem:[#allocation3 + $0x92] sm:$0xff] }
 0x4c2   : > { %8904 = vmatprep.mubr.msk.f32.mxu1 %vm677_vm3, %v4446_v48  ;;  %v5144_v48 = vld [vmem:[#allocation3 + $0x9a] sm:$0xff] }
 0x4c5   : > { %8905 = vmatmul.mubr.msk.f32.gmra.mrb[94].mxu1 %vm677_vm3, %v4447_v53  ;;  %v5145_v53 = vld [vmem:[#allocation3 + $0xaa] sm:$0xff] }
 0x4c6   : > { %8915 = vmatprep.mubr.msk.f32.mxu1 %vm677_vm3, %v5131_v4  ;;  %v5146_v4 = vld [vmem:[#allocation3 + $0xb2] sm:$0xff] }
 0x4c9   : > { %8916 = vmatmul.mubr.msk.f32.vlgmr.msra.gmra.mrb[64].mxu1 %vm677_vm3, %v5132_v63  ;;  %v5147_v63 = vld [vmem:[#allocation3 + $0xc2] sm:$0xff] }
 0x4ca   : > { %8918 = vmatprep.mubr.msk.f32.mxu1 %vm677_vm3, %v5133_v54  ;;  %v5148_v54 = vld [vmem:[#allocation3 + $0xca] sm:$0xff] }
 0x4cd   : > { %8919 = vmatmul.mubr.msk.f32.gmra.mrb[66].mxu1 %vm677_vm3, %v5134_v25  ;;  %v5149_v25 = vld [vmem:[#allocation3 + $0xda] sm:$0xff] }
 0x4ce   : > { %8921 = vmatprep.mubr.msk.f32.mxu1 %vm677_vm3, %v5135_v55  ;;  %v5150_v55 = vld [vmem:[#allocation3 + $0xe2] sm:$0xff] }
 0x4d1   : > { %8922 = vmatmul.mubr.msk.f32.gmra.mrb[68].mxu1 %vm677_vm3, %v5136_v26  ;;  %v5151_v26 = vld [vmem:[#allocation3 + $0xf2] sm:$0xff] }
 0x4d2   : > { %8924 = vmatprep.mubr.msk.f32.mxu1 %vm677_vm3, %v5137_v45  ;;  %v5152_v45 = vld [vmem:[#allocation3 + $0xfa] sm:$0xff] }
 0x4d5   : > { %8925 = vmatmul.mubr.msk.f32.gmra.mrb[70].mxu1 %vm677_vm3, %v5138_v57  ;;  %v5153_v57 = vld [vmem:[#allocation3 + $0x10a] sm:$0xff] }
 0x4d6   : > { %8927 = vmatprep.mubr.msk.f32.mxu1 %vm677_vm3, %v5139_v47  ;;  %v5154_v47 = vld [vmem:[#allocation3 + $0x112] sm:$0xff] }
 0x4d9   : > { %8928 = vmatmul.mubr.msk.f32.gmra.mrb[72].mxu1 %vm677_vm3, %v5140_v59  ;;  %v5155_v59 = vld [vmem:[#allocation3 + $0x122] sm:$0xff] }
 0x4da   : > { %8930 = vmatprep.mubr.msk.f32.mxu1 %vm677_vm3, %v5141_v8  ;;  %v5156_v8 = vld [vmem:[#allocation3 + $0x12a] sm:$0xff] }
 0x4dd   : > { %8931 = vmatmul.mubr.msk.f32.gmra.mrb[74].mxu1 %vm677_vm3, %v5142_v60  ;;  %v5157_v60 = vld [vmem:[#allocation3 + $0x13a] sm:$0xff] }
 0x4de   : > { %8933 = vmatprep.mubr.msk.f32.mxu1 %vm677_vm3, %v5143_v17  ;;  %v5158_v17 = vld [vmem:[#allocation3 + $0x142] sm:$0xff] }
 0x4e1   : > { %8934 = vmatmul.mubr.msk.f32.gmra.mrb[76].mxu1 %vm677_vm3, %v5144_v48  ;;  %v5159_v48 = vld [vmem:[#allocation3 + $0x152] sm:$0xff] }
 0x4e2   : > { %8936 = vmatprep.mubr.msk.f32.mxu1 %vm677_vm3, %v5145_v53  ;;  %v5160_v53 = vld [vmem:[#allocation3 + $0x15a] sm:$0xff] }
 0x4e5   : > { %8937 = vmatmul.mubr.msk.f32.gmra.mrb[78].mxu1 %vm677_vm3, %v5146_v4  ;;  %v5161_v4 = vld [vmem:[#allocation3 + $0x16a] sm:$0xff] }
 0x4e6   : > { %8939 = vmatprep.mubr.msk.f32.mxu1 %vm677_vm3, %v5147_v63  ;;  %v5162_v63 = vld [vmem:[#allocation3 + $0x172] sm:$0xff] }
 0x4e9   : > { %8940 = vmatmul.mubr.msk.f32.gmra.mrb[80].mxu1 %vm677_vm3, %v5148_v54  ;;  %v5656_v54 = vld [vmem:[%s9970_s22] sm:$0xff] }
 0x4ea   : > { %8942 = vmatprep.mubr.msk.f32.mxu1 %vm677_vm3, %v5149_v25  ;;  %v5657_v25 = vld [vmem:[%s9970_s22 + $0x8] sm:$0xff] }
 0x4ed   : > { %8943 = vmatmul.mubr.msk.f32.gmra.mrb[82].mxu1 %vm677_vm3, %v5150_v55  ;;  %v9211_v55 = vpack.c.bf16 %v5657_v25, %v5656_v54 }
 0x4ee   : > { %8945 = vmatprep.mubr.msk.f32.mxu1 %vm677_vm3, %v5151_v26  ;;  %v11334_v26 = vld [vmem:[%s591_s30] ss:$0 sm:$0xff] }
 0x4ef   : > { %9212 = vmatprep.subr.bf16.mxu0 %v9211_v55 }
 0x4f1   : > { %8946 = vmatmul.mubr.msk.f32.gmra.mrb[84].mxu1 %vm677_vm3, %v5152_v45 }
 0x4f2   : > { %8948 = vmatprep.mubr.msk.f32.mxu1 %vm677_vm3, %v5153_v57 }
 0x4f5   : > { %8949 = vmatmul.mubr.msk.f32.gmra.mrb[86].mxu1 %vm677_vm3, %v5154_v47 }
 0x4f6   : > { %8951 = vmatprep.mubr.msk.f32.mxu1 %vm677_vm3, %v5155_v59 }
 0x4f9   : > { %8952 = vmatmul.mubr.msk.f32.gmra.mrb[88].mxu1 %vm677_vm3, %v5156_v8 }
 0x4fa   : > { %8954 = vmatprep.mubr.msk.f32.mxu1 %vm677_vm3, %v5157_v60 }
 0x4fd   : > { %8955 = vmatmul.mubr.msk.f32.gmra.mrb[90].mxu1 %vm677_vm3, %v5158_v17 }
 0x4fe   : > { %8957 = vmatprep.mubr.msk.f32.mxu1 %vm677_vm3, %v5159_v48 }
 0x501   : > { %8958 = vmatmul.mubr.msk.f32.gmra.mrb[92].mxu1 %vm677_vm3, %v5160_v53 }
 0x502   : > { %8960 = vmatprep.mubr.msk.f32.mxu1 %vm677_vm3, %v5161_v4 }
 0x505   : > { %8961 = vmatmul.mubr.msk.f32.gmra.mrb[94].mxu1 %vm677_vm3, %v5162_v63 }
 0x59c   : > { %v8917_v45 = vpop.f32.mrb[64].mxu1 }
 0x59d   : > { %v5529_v57 = vadd.f32 %v8917_v45, %v11334_v26  ;;  %v5330_v47 = vpop.f32.mrb[65].mxu1 }
 0x59e   : > { %v5528_v59 = vadd.f32 %v11334_v26, %v5330_v47 }
 0x59f   : > { %v5561_v8 = vmax.f32 %v5529_v57, 0.0 }
 0x5a0   : > { %v5560_v60 = vmax.f32 %v5528_v59, 0.0  ;;  %v8920_v17 = vpop.f32.mrb[66].mxu1  ;;  %v5658_v59 = vld [vmem:[%s9970_s22 + $0x10] sm:$0xff] }
 0x5a1   : > { %5593 = vst.msk [vmem:[#allocation3 + $0x9] sm:$0xff] %vm677_vm3, %v5561_v8  ;;  %v5531_v48 = vadd.f32 %v8920_v17, %v11334_v26  ;;  %v5340_v53 = vpop.f32.mrb[67].mxu1  ;;  %v5659_v8 = vld [vmem:[%s9970_s22 + $0x18] sm:$0xff] }
 0x5a2   : > { %5592 = vst.msk [vmem:[#allocation3 + $0x1] sm:$0xff] %vm677_vm3, %v5560_v60  ;;  %v5530_v4 = vadd.f32 %v11334_v26, %v5340_v53 }
 0x5a3   : > { %v5563_v63 = vmax.f32 %v5531_v48, 0.0 }
 0x5a4   : > { %v5562_v54 = vmax.f32 %v5530_v4, 0.0  ;;  %v8923_v25 = vpop.f32.mrb[68].mxu1 }
 0x5a5   : > { %5595 = vst.msk [vmem:[#allocation3 + $0x21] sm:$0xff] %vm677_vm3, %v5563_v63  ;;  %v5533_v45 = vadd.f32 %v8923_v25, %v11334_v26  ;;  %v5350_v57 = vpop.f32.mrb[69].mxu1  ;;  %v9215_v63 = vpack.c.bf16 %v5659_v8, %v5658_v59 }
 0x5a6   : > { %5594 = vst.msk [vmem:[#allocation3 + $0x19] sm:$0xff] %vm677_vm3, %v5562_v54  ;;  %v5532_v47 = vadd.f32 %v11334_v26, %v5350_v57  ;;  %v7734_v57 = vld [vmem:[%s9970_s22 + $0x40] sm:$0xff] }
 0x5a7   : > { %v5565_v17 = vmax.f32 %v5533_v45, 0.0 }
 0x5a8   : > { %v5564_v60 = vmax.f32 %v5532_v47, 0.0  ;;  %v8926_v51 = vpop.f32.mrb[70].mxu1  ;;  %v5661_v25 = vld [vmem:[#allocation3 + $0x9] sm:$0xff] }
 0x5a9   : > { %5597 = vst.msk [vmem:[#allocation3 + $0x39] sm:$0xff] %vm677_vm3, %v5565_v17  ;;  %v5535_v48 = vadd.f32 %v8926_v51, %v11334_v26  ;;  %v5360_v53 = vpop.f32.mrb[71].mxu1  ;;  %v5660_v4 = vld [vmem:[#allocation3 + $0x1] sm:$0xff]  ;;  %v11358_v17 = vpack.c.bf16 %v7735_v6, %v7734_v57 }
 0x5aa   : > { %5596 = vst.msk [vmem:[#allocation3 + $0x31] sm:$0xff] %vm677_vm3, %v5564_v60  ;;  %v5534_v54 = vadd.f32 %v11334_v26, %v5360_v53  ;;  %8971 = vmatprep.mubr.msk.f32.mxu0 %vm677_vm3, %v5660_v4 }
 0x5ab   : > { %v5567_v0 = vmax.f32 %v5535_v48, 0.0  ;;  %8972 = vmatmul.mubr.msk.f32.vlgmr.msra.gmra.mrb[64].mxu0 %vm677_vm3, %v5661_v25 }
 0x5ac   : > { %v5566_v45 = vmax.f32 %v5534_v54, 0.0  ;;  %9214 = vmatpush3.bf16.msra.mxu0 %v9211_v55  ;;  %v8929_v47 = vpop.f32.mrb[72].mxu1  ;;  %v5663_v48 = vld [vmem:[#allocation3 + $0x21] sm:$0xff] }
 0x5ad   : > { %5599 = vst.msk [vmem:[#allocation3 + $0x51] sm:$0xff] %vm677_vm3, %v5567_v0  ;;  %v5537_v51 = vadd.f32 %v8929_v47, %v11334_v26  ;;  %v5370_v59 = vpop.f32.mrb[73].mxu1  ;;  %v5662_v8 = vld [vmem:[#allocation3 + $0x19] sm:$0xff]  ;;  %9216 = vmatprep.subr.bf16.mxu0 %v9215_v63 }
 0x5ae   : > { %5598 = vst.msk [vmem:[#allocation3 + $0x49] sm:$0xff] %vm677_vm3, %v5566_v45  ;;  %v5536_v60 = vadd.f32 %v11334_v26, %v5370_v59  ;;  %8974 = vmatprep.mubr.msk.f32.mxu0 %vm677_vm3, %v5662_v8 }
 0x5af   : > { %v5569_v53 = vmax.f32 %v5537_v51, 0.0  ;;  %8975 = vmatmul.mubr.msk.f32.gmra.mrb[66].mxu0 %vm677_vm3, %v5663_v48 }
 0x5b0   : > { %v5568_v55 = vmax.f32 %v5536_v60, 0.0  ;;  %v8932_v4 = vpop.f32.mrb[74].mxu1  ;;  %9218 = vmatpush3.bf16.msra.mxu0 %v9215_v63  ;;  %v5665_v57 = vld [vmem:[#allocation3 + $0x39] sm:$0xff] }
 0x5b1   : > { %5601 = vst.msk [vmem:[#allocation3 + $0x69] sm:$0xff] %vm677_vm3, %v5569_v53  ;;  %v5539_v0 = vadd.f32 %v8932_v4, %v11334_v26  ;;  %v5380_v54 = vpop.f32.mrb[75].mxu1  ;;  %v5664_v6 = vld [vmem:[#allocation3 + $0x31] sm:$0xff]  ;;  %9220 = vmatprep.subr.bf16.mxu0 %v11358_v17 }
 0x5b2   : > { %5600 = vst.msk [vmem:[#allocation3 + $0x61] sm:$0xff] %vm677_vm3, %v5568_v55  ;;  %v5538_v25 = vadd.f32 %v11334_v26, %v5380_v54  ;;  %8977 = vmatprep.mubr.msk.f32.mxu0 %vm677_vm3, %v5664_v6 }
 0x5b3   : > { %v5571_v45 = vmax.f32 %v5539_v0, 0.0  ;;  %8978 = vmatmul.mubr.msk.f32.gmra.mrb[68].mxu0 %vm677_vm3, %v5665_v57 }
 0x5b4   : > { %v5570_v47 = vmax.f32 %v5538_v25, 0.0  ;;  %v8935_v63 = vpop.f32.mrb[76].mxu1  ;;  %v5667_v48 = vld [vmem:[#allocation3 + $0x51] sm:$0xff] }
 0x5b5   : > { %5603 = vst.msk [vmem:[#allocation3 + $0x81] sm:$0xff] %vm677_vm3, %v5571_v45  ;;  %v5541_v51 = vadd.f32 %v8935_v63, %v11334_v26  ;;  %v5390_v59 = vpop.f32.mrb[77].mxu1  ;;  %v5666_v8 = vld [vmem:[#allocation3 + $0x49] sm:$0xff] }
 0x5b6   : > { %5602 = vst.msk [vmem:[#allocation3 + $0x79] sm:$0xff] %vm677_vm3, %v5570_v47  ;;  %v5540_v60 = vadd.f32 %v11334_v26, %v5390_v59  ;;  %8980 = vmatprep.mubr.msk.f32.mxu0 %vm677_vm3, %v5666_v8 }
 0x5b7   : > { %v5573_v53 = vmax.f32 %v5541_v51, 0.0  ;;  %8981 = vmatmul.mubr.msk.f32.gmra.mrb[70].mxu0 %vm677_vm3, %v5667_v48 }
 0x5b8   : > { %v5572_v55 = vmax.f32 %v5540_v60, 0.0  ;;  %v8938_v4 = vpop.f32.mrb[78].mxu1  ;;  %v5669_v57 = vld [vmem:[#allocation3 + $0x69] sm:$0xff] }
 0x5b9   : > { %5605 = vst.msk [vmem:[#allocation3 + $0x99] sm:$0xff] %vm677_vm3, %v5573_v53  ;;  %v5543_v0 = vadd.f32 %v8938_v4, %v11334_v26  ;;  %v5400_v54 = vpop.f32.mrb[79].mxu1  ;;  %v5668_v6 = vld [vmem:[#allocation3 + $0x61] sm:$0xff] }
 0x5ba   : > { %5604 = vst.msk [vmem:[#allocation3 + $0x91] sm:$0xff] %vm677_vm3, %v5572_v55  ;;  %v5542_v25 = vadd.f32 %v11334_v26, %v5400_v54  ;;  %8983 = vmatprep.mubr.msk.f32.mxu0 %vm677_vm3, %v5668_v6 }
 0x5bb   : > { %v5575_v45 = vmax.f32 %v5543_v0, 0.0  ;;  %8984 = vmatmul.mubr.msk.f32.gmra.mrb[72].mxu0 %vm677_vm3, %v5669_v57 }
 0x5bc   : > { %v5574_v47 = vmax.f32 %v5542_v25, 0.0  ;;  %v8941_v63 = vpop.f32.mrb[80].mxu1  ;;  %v5671_v48 = vld [vmem:[#allocation3 + $0x81] sm:$0xff] }
 0x5bd   : > { %5607 = vst.msk [vmem:[#allocation3 + $0xb1] sm:$0xff] %vm677_vm3, %v5575_v45  ;;  %v5545_v51 = vadd.f32 %v8941_v63, %v11334_v26  ;;  %v5410_v59 = vpop.f32.mrb[81].mxu1  ;;  %v5670_v8 = vld [vmem:[#allocation3 + $0x79] sm:$0xff] }
 0x5be   : > { %5606 = vst.msk [vmem:[#allocation3 + $0xa9] sm:$0xff] %vm677_vm3, %v5574_v47  ;;  %v5544_v60 = vadd.f32 %v11334_v26, %v5410_v59  ;;  %8986 = vmatprep.mubr.msk.f32.mxu0 %vm677_vm3, %v5670_v8 }
 0x5bf   : > { %v5577_v53 = vmax.f32 %v5545_v51, 0.0  ;;  %8987 = vmatmul.mubr.msk.f32.gmra.mrb[74].mxu0 %vm677_vm3, %v5671_v48 }
 0x5c0   : > { %v5576_v55 = vmax.f32 %v5544_v60, 0.0  ;;  %v8944_v4 = vpop.f32.mrb[82].mxu1  ;;  %v5673_v57 = vld [vmem:[#allocation3 + $0x99] sm:$0xff] }
 0x5c1   : > { %5609 = vst.msk [vmem:[#allocation3 + $0xc9] sm:$0xff] %vm677_vm3, %v5577_v53  ;;  %v5547_v0 = vadd.f32 %v8944_v4, %v11334_v26  ;;  %v5420_v54 = vpop.f32.mrb[83].mxu1  ;;  %v5672_v6 = vld [vmem:[#allocation3 + $0x91] sm:$0xff] }
 0x5c2   : > { %5608 = vst.msk [vmem:[#allocation3 + $0xc1] sm:$0xff] %vm677_vm3, %v5576_v55  ;;  %v5546_v25 = vadd.f32 %v11334_v26, %v5420_v54  ;;  %8989 = vmatprep.mubr.msk.f32.mxu0 %vm677_vm3, %v5672_v6 }
 0x5c3   : > { %v5579_v45 = vmax.f32 %v5547_v0, 0.0  ;;  %8990 = vmatmul.mubr.msk.f32.gmra.mrb[76].mxu0 %vm677_vm3, %v5673_v57 }
 0x5c4   : > { %v5578_v47 = vmax.f32 %v5546_v25, 0.0  ;;  %v8947_v63 = vpop.f32.mrb[84].mxu1  ;;  %v5675_v48 = vld [vmem:[#allocation3 + $0xb1] sm:$0xff] }
 0x5c5   : > { %5611 = vst.msk [vmem:[#allocation3 + $0xe1] sm:$0xff] %vm677_vm3, %v5579_v45  ;;  %v5549_v51 = vadd.f32 %v8947_v63, %v11334_v26  ;;  %v5430_v59 = vpop.f32.mrb[85].mxu1  ;;  %v5674_v8 = vld [vmem:[#allocation3 + $0xa9] sm:$0xff] }
 0x5c6   : > { %5610 = vst.msk [vmem:[#allocation3 + $0xd9] sm:$0xff] %vm677_vm3, %v5578_v47  ;;  %v5548_v60 = vadd.f32 %v11334_v26, %v5430_v59  ;;  %8992 = vmatprep.mubr.msk.f32.mxu0 %vm677_vm3, %v5674_v8 }
 0x5c7   : > { %v5581_v53 = vmax.f32 %v5549_v51, 0.0  ;;  %8993 = vmatmul.mubr.msk.f32.gmra.mrb[78].mxu0 %vm677_vm3, %v5675_v48 }
 0x5c8   : > { %v5580_v55 = vmax.f32 %v5548_v60, 0.0  ;;  %v8950_v4 = vpop.f32.mrb[86].mxu1  ;;  %v5677_v57 = vld [vmem:[#allocation3 + $0xc9] sm:$0xff] }
 0x5c9   : > { %5613 = vst.msk [vmem:[#allocation3 + $0xf9] sm:$0xff] %vm677_vm3, %v5581_v53  ;;  %v5551_v0 = vadd.f32 %v8950_v4, %v11334_v26  ;;  %v5440_v54 = vpop.f32.mrb[87].mxu1  ;;  %v5676_v6 = vld [vmem:[#allocation3 + $0xc1] sm:$0xff] }
 0x5ca   : > { %5612 = vst.msk [vmem:[#allocation3 + $0xf1] sm:$0xff] %vm677_vm3, %v5580_v55  ;;  %v5550_v25 = vadd.f32 %v11334_v26, %v5440_v54  ;;  %8995 = vmatprep.mubr.msk.f32.mxu0 %vm677_vm3, %v5676_v6 }
 0x5cb   : > { %v5583_v45 = vmax.f32 %v5551_v0, 0.0  ;;  %8996 = vmatmul.mubr.msk.f32.gmra.mrb[80].mxu0 %vm677_vm3, %v5677_v57 }
 0x5cc   : > { %v5582_v47 = vmax.f32 %v5550_v25, 0.0  ;;  %v8953_v63 = vpop.f32.mrb[88].mxu1  ;;  %v5679_v48 = vld [vmem:[#allocation3 + $0xe1] sm:$0xff] }
 0x5cd   : > { %5615 = vst.msk [vmem:[#allocation3 + $0x111] sm:$0xff] %vm677_vm3, %v5583_v45  ;;  %v5553_v51 = vadd.f32 %v8953_v63, %v11334_v26  ;;  %v5450_v59 = vpop.f32.mrb[89].mxu1  ;;  %v5678_v8 = vld [vmem:[#allocation3 + $0xd9] sm:$0xff] }
 0x5ce   : > { %5614 = vst.msk [vmem:[#allocation3 + $0x109] sm:$0xff] %vm677_vm3, %v5582_v47  ;;  %v5552_v60 = vadd.f32 %v11334_v26, %v5450_v59  ;;  %8998 = vmatprep.mubr.msk.f32.mxu0 %vm677_vm3, %v5678_v8 }
 0x5cf   : > { %v5585_v53 = vmax.f32 %v5553_v51, 0.0  ;;  %8999 = vmatmul.mubr.msk.f32.gmra.mrb[82].mxu0 %vm677_vm3, %v5679_v48 }
 0x5d0   : > { %v5584_v55 = vmax.f32 %v5552_v60, 0.0  ;;  %v8956_v4 = vpop.f32.mrb[90].mxu1  ;;  %v5681_v57 = vld [vmem:[#allocation3 + $0xf9] sm:$0xff] }
 0x5d1   : > { %5617 = vst.msk [vmem:[#allocation3 + $0x129] sm:$0xff] %vm677_vm3, %v5585_v53  ;;  %v5555_v0 = vadd.f32 %v8956_v4, %v11334_v26  ;;  %v5460_v54 = vpop.f32.mrb[91].mxu1  ;;  %v5680_v6 = vld [vmem:[#allocation3 + $0xf1] sm:$0xff] }
 0x5d2   : > { %5616 = vst.msk [vmem:[#allocation3 + $0x121] sm:$0xff] %vm677_vm3, %v5584_v55  ;;  %v5554_v25 = vadd.f32 %v11334_v26, %v5460_v54  ;;  %9001 = vmatprep.mubr.msk.f32.mxu0 %vm677_vm3, %v5680_v6 }
 0x5d3   : > { %v5587_v45 = vmax.f32 %v5555_v0, 0.0  ;;  %9002 = vmatmul.mubr.msk.f32.gmra.mrb[84].mxu0 %vm677_vm3, %v5681_v57 }
 0x5d4   : > { %v5586_v47 = vmax.f32 %v5554_v25, 0.0  ;;  %v8959_v63 = vpop.f32.mrb[92].mxu1  ;;  %v5683_v48 = vld [vmem:[#allocation3 + $0x111] sm:$0xff] }
 0x5d5   : > { %5619 = vst.msk [vmem:[#allocation3 + $0x141] sm:$0xff] %vm677_vm3, %v5587_v45  ;;  %v5557_v51 = vadd.f32 %v8959_v63, %v11334_v26  ;;  %v5470_v59 = vpop.f32.mrb[93].mxu1  ;;  %v5682_v8 = vld [vmem:[#allocation3 + $0x109] sm:$0xff] }
 0x5d6   : > { %5618 = vst.msk [vmem:[#allocation3 + $0x139] sm:$0xff] %vm677_vm3, %v5586_v47  ;;  %v5556_v60 = vadd.f32 %v11334_v26, %v5470_v59  ;;  %9004 = vmatprep.mubr.msk.f32.mxu0 %vm677_vm3, %v5682_v8 }
 0x5d7   : > { %v5589_v53 = vmax.f32 %v5557_v51, 0.0  ;;  %9005 = vmatmul.mubr.msk.f32.gmra.mrb[86].mxu0 %vm677_vm3, %v5683_v48  ;;  %v7736_v48 = vld [vmem:[%s9970_s22 + $0x50] sm:$0xff] }
 0x5d8   : > { %v5588_v55 = vmax.f32 %v5556_v60, 0.0  ;;  %v8962_v4 = vpop.f32.mrb[94].mxu1  ;;  %v5685_v57 = vld [vmem:[#allocation3 + $0x129] sm:$0xff] }
 0x5d9   : > { %5621 = vst.msk [vmem:[#allocation3 + $0x159] sm:$0xff] %vm677_vm3, %v5589_v53  ;;  %v5559_v0 = vadd.f32 %v8962_v4, %v11334_v26  ;;  %v5480_v54 = vpop.f32.mrb[95].mxu1  ;;  %v5684_v6 = vld [vmem:[#allocation3 + $0x121] sm:$0xff] }
 0x5da   : > { %5620 = vst.msk [vmem:[#allocation3 + $0x151] sm:$0xff] %vm677_vm3, %v5588_v55  ;;  %v5558_v25 = vadd.f32 %v11334_v26, %v5480_v54  ;;  %9007 = vmatprep.mubr.msk.f32.mxu0 %vm677_vm3, %v5684_v6  ;;  %v7737_v53 = vld [vmem:[%s9970_s22 + $0x58] sm:$0xff]  ;;  %v5626_v54 = vld [vmem:[#allocation3 + $0x18] sm:$0xff] }
 0x5db   : > { %v5591_v45 = vmax.f32 %v5559_v0, 0.0  ;;  %9008 = vmatmul.mubr.msk.f32.gmra.mrb[88].mxu0 %vm677_vm3, %v5685_v57  ;;  %v5624_v55 = vld [vmem:[#allocation3] sm:$0xff]  ;;  %v9223_v4 = vpack.c.bf16 %v7737_v53, %v7736_v48  ;;  %v5625_v0 = vld [vmem:[#allocation3 + $0x8] sm:$0xff]  ;;  %v5629_v57 = vld [vmem:[#allocation3 + $0x38] sm:$0xff] }
 0x5dc   : > { %v5590_v47 = vmax.f32 %v5558_v25, 0.0  ;;  %v5687_v51 = vld [vmem:[#allocation3 + $0x141] sm:$0xff]  ;;  %v5628_v25 = vld [vmem:[#allocation3 + $0x30] sm:$0xff] }
 0x5dd   : > { %5623 = vst.msk [vmem:[#allocation3 + $0x171] sm:$0xff] %vm677_vm3, %v5591_v45  ;;  %v5686_v63 = vld [vmem:[#allocation3 + $0x139] sm:$0xff]  ;;  %v5630_v45 = vld [vmem:[#allocation3 + $0x48] sm:$0xff]  ;;  %v5639_v48 = vld [vmem:[#allocation3 + $0xb0] sm:$0xff] }
 0x5de   : > { %5622 = vst.msk [vmem:[#allocation3 + $0x169] sm:$0xff] %vm677_vm3, %v5590_v47  ;;  %9010 = vmatprep.mubr.msk.f32.mxu0 %vm677_vm3, %v5686_v63  ;;  %v5627_v6 = vld [vmem:[#allocation3 + $0x20] sm:$0xff]  ;;  %v5631_v47 = vld [vmem:[#allocation3 + $0x50] sm:$0xff]  ;;  %v5633_v63 = vld [vmem:[#allocation3 + $0x68] sm:$0xff] }
 0x5df   : > { %9011 = vmatmul.mubr.msk.f32.gmra.mrb[90].mxu0 %vm677_vm3, %v5687_v51  ;;  %v5634_v51 = vld [vmem:[#allocation3 + $0x78] sm:$0xff]  ;;  %v5640_v53 = vld [vmem:[#allocation3 + $0xc0] sm:$0xff] }
 0x5e0   : > { %v5689_v59 = vld [vmem:[#allocation3 + $0x159] sm:$0xff] }
 0x5e1   : > { %v5688_v26 = vld [vmem:[#allocation3 + $0x151] sm:$0xff] }
 0x5e2   : > { %9013 = vmatprep.mubr.msk.f32.mxu0 %vm677_vm3, %v5688_v26  ;;  %v5635_v26 = vld [vmem:[#allocation3 + $0x80] sm:$0xff] }
 0x5e3   : > { %9014 = vmatmul.mubr.msk.f32.gmra.mrb[92].mxu0 %vm677_vm3, %v5689_v59  ;;  %v5636_v59 = vld [vmem:[#allocation3 + $0x90] sm:$0xff] }
 0x5e4   : > { %v5691_v60 = vld [vmem:[#allocation3 + $0x171] sm:$0xff] }
 0x5e5   : > { %v5690_v8 = vld [vmem:[#allocation3 + $0x169] sm:$0xff] }
 0x5e6   : > { %9016 = vmatprep.mubr.msk.f32.mxu0 %vm677_vm3, %v5690_v8  ;;  %v5637_v8 = vld [vmem:[#allocation3 + $0x98] sm:$0xff] }
 0x5e7   : > { %9017 = vmatmul.mubr.msk.f32.gmra.mrb[94].mxu0 %vm677_vm3, %v5691_v60  ;;  %v5638_v60 = vld [vmem:[#allocation3 + $0xa8] sm:$0xff] }
 0x5e8   : > { %9027 = vmatprep.mubr.msk.f32.mxu0 %vm677_vm3, %v5624_v55  ;;  %v5641_v55 = vld [vmem:[#allocation3 + $0xc8] sm:$0xff] }
 0x5eb   : > { %9028 = vmatmul.mubr.msk.f32.vlgmr.msra.gmra.mrb[64].mxu0 %vm677_vm3, %v5625_v0  ;;  %v5643_v0 = vld [vmem:[#allocation3 + $0xe0] sm:$0xff] }
 0x5ec   : > { %9222 = vmatpush3.bf16.msra.mxu0 %v11358_v17  ;;  %9030 = vmatprep.mubr.msk.f32.mxu0 %vm677_vm3, %v5626_v54  ;;  %v5632_v17 = vld [vmem:[#allocation3 + $0x60] sm:$0xff]  ;;  %v5644_v54 = vld [vmem:[#allocation3 + $0xf0] sm:$0xff] }
 0x5ed   : > { %9224 = vmatprep.subr.bf16.mxu0 %v9223_v4 }
 0x5ef   : > { %9031 = vmatmul.mubr.msk.f32.gmra.mrb[66].mxu0 %vm677_vm3, %v5627_v6  ;;  %v5645_v6 = vld [vmem:[#allocation3 + $0xf8] sm:$0xff] }
 0x5f0   : > { %9033 = vmatprep.mubr.msk.f32.mxu0 %vm677_vm3, %v5628_v25  ;;  %9226 = vmatpush3.bf16.msra.mxu0 %v9223_v4  ;;  %v5642_v4 = vld [vmem:[#allocation3 + $0xd8] sm:$0xff]  ;;  %v5646_v25 = vld [vmem:[#allocation3 + $0x108] sm:$0xff] }
 0x5f3   : > { %9034 = vmatmul.mubr.msk.f32.gmra.mrb[68].mxu0 %vm677_vm3, %v5629_v57  ;;  %v5647_v57 = vld [vmem:[#allocation3 + $0x110] sm:$0xff] }
 0x5f4   : > { %9036 = vmatprep.mubr.msk.f32.mxu0 %vm677_vm3, %v5630_v45  ;;  %v5648_v45 = vld [vmem:[#allocation3 + $0x120] sm:$0xff] }
 0x5f7   : > { %9037 = vmatmul.mubr.msk.f32.gmra.mrb[70].mxu0 %vm677_vm3, %v5631_v47  ;;  %v5649_v47 = vld [vmem:[#allocation3 + $0x128] sm:$0xff] }
 0x5f8   : > { %9039 = vmatprep.mubr.msk.f32.mxu0 %vm677_vm3, %v5632_v17  ;;  %v5650_v17 = vld [vmem:[#allocation3 + $0x138] sm:$0xff] }
 0x5fb   : > { %9040 = vmatmul.mubr.msk.f32.gmra.mrb[72].mxu0 %vm677_vm3, %v5633_v63  ;;  %v5651_v63 = vld [vmem:[#allocation3 + $0x140] sm:$0xff] }
 0x5fc   : > { %9042 = vmatprep.mubr.msk.f32.mxu0 %vm677_vm3, %v5634_v51  ;;  %v5652_v51 = vld [vmem:[#allocation3 + $0x150] sm:$0xff] }
 0x5ff   : > { %9043 = vmatmul.mubr.msk.f32.gmra.mrb[74].mxu0 %vm677_vm3, %v5635_v26  ;;  %v5653_v26 = vld [vmem:[#allocation3 + $0x158] sm:$0xff] }
 0x600   : > { %9045 = vmatprep.mubr.msk.f32.mxu0 %vm677_vm3, %v5636_v59  ;;  %v5654_v59 = vld [vmem:[#allocation3 + $0x168] sm:$0xff] }
 0x603   : > { %9046 = vmatmul.mubr.msk.f32.gmra.mrb[76].mxu0 %vm677_vm3, %v5637_v8  ;;  %v5655_v8 = vld [vmem:[#allocation3 + $0x170] sm:$0xff] }
 0x604   : > { %9048 = vmatprep.mubr.msk.f32.mxu0 %vm677_vm3, %v5638_v60  ;;  %v6339_v60 = vld [vmem:[#allocation3 + $0x2] sm:$0xff] }
 0x607   : > { %9049 = vmatmul.mubr.msk.f32.gmra.mrb[78].mxu0 %vm677_vm3, %v5639_v48  ;;  %v6340_v48 = vld [vmem:[#allocation3 + $0xa] sm:$0xff] }
 0x608   : > { %9051 = vmatprep.mubr.msk.f32.mxu0 %vm677_vm3, %v5640_v53  ;;  %v6341_v53 = vld [vmem:[#allocation3 + $0x1a] sm:$0xff] }
 0x60b   : > { %9052 = vmatmul.mubr.msk.f32.gmra.mrb[80].mxu0 %vm677_vm3, %v5641_v55  ;;  %v6342_v55 = vld [vmem:[#allocation3 + $0x22] sm:$0xff] }
 0x60c   : > { %9054 = vmatprep.mubr.msk.f32.mxu0 %vm677_vm3, %v5642_v4  ;;  %v6343_v4 = vld [vmem:[#allocation3 + $0x32] sm:$0xff] }
 0x60f   : > { %9055 = vmatmul.mubr.msk.f32.gmra.mrb[82].mxu0 %vm677_vm3, %v5643_v0  ;;  %v6344_v0 = vld [vmem:[#allocation3 + $0x3a] sm:$0xff] }
 0x610   : > { %9057 = vmatprep.mubr.msk.f32.mxu0 %vm677_vm3, %v5644_v54  ;;  %v6345_v54 = vld [vmem:[#allocation3 + $0x4a] sm:$0xff] }
 0x613   : > { %9058 = vmatmul.mubr.msk.f32.gmra.mrb[84].mxu0 %vm677_vm3, %v5645_v6  ;;  %v6346_v6 = vld [vmem:[#allocation3 + $0x52] sm:$0xff] }
 0x614   : > { %9060 = vmatprep.mubr.msk.f32.mxu0 %vm677_vm3, %v5646_v25  ;;  %v6347_v25 = vld [vmem:[#allocation3 + $0x62] sm:$0xff] }
 0x617   : > { %9061 = vmatmul.mubr.msk.f32.gmra.mrb[86].mxu0 %vm677_vm3, %v5647_v57  ;;  %v6348_v57 = vld [vmem:[#allocation3 + $0x6a] sm:$0xff] }
 0x618   : > { %9063 = vmatprep.mubr.msk.f32.mxu0 %vm677_vm3, %v5648_v45  ;;  %v6349_v45 = vld [vmem:[#allocation3 + $0x7a] sm:$0xff] }
 0x61b   : > { %9064 = vmatmul.mubr.msk.f32.gmra.mrb[88].mxu0 %vm677_vm3, %v5649_v47  ;;  %v6350_v47 = vld [vmem:[#allocation3 + $0x82] sm:$0xff] }
 0x61c   : > { %9066 = vmatprep.mubr.msk.f32.mxu0 %vm677_vm3, %v5650_v17  ;;  %v6351_v17 = vld [vmem:[#allocation3 + $0x92] sm:$0xff] }
 0x61f   : > { %9067 = vmatmul.mubr.msk.f32.gmra.mrb[90].mxu0 %vm677_vm3, %v5651_v63  ;;  %v6352_v63 = vld [vmem:[#allocation3 + $0x9a] sm:$0xff] }
 0x620   : > { %9069 = vmatprep.mubr.msk.f32.mxu0 %vm677_vm3, %v5652_v51  ;;  %v6353_v51 = vld [vmem:[#allocation3 + $0xaa] sm:$0xff] }
 0x623   : > { %9070 = vmatmul.mubr.msk.f32.gmra.mrb[92].mxu0 %vm677_vm3, %v5653_v26  ;;  %v6354_v26 = vld [vmem:[#allocation3 + $0xb2] sm:$0xff] }
 0x624   : > { %9072 = vmatprep.mubr.msk.f32.mxu0 %vm677_vm3, %v5654_v59  ;;  %v6355_v59 = vld [vmem:[#allocation3 + $0xc2] sm:$0xff] }
 0x627   : > { %9073 = vmatmul.mubr.msk.f32.gmra.mrb[94].mxu0 %vm677_vm3, %v5655_v8  ;;  %v6356_v8 = vld [vmem:[#allocation3 + $0xca] sm:$0xff] }
 0x628   : > { %9083 = vmatprep.mubr.msk.f32.mxu0 %vm677_vm3, %v6339_v60  ;;  %v6357_v60 = vld [vmem:[#allocation3 + $0xda] sm:$0xff] }
 0x62b   : > { %9084 = vmatmul.mubr.msk.f32.vlgmr.msra.gmra.mrb[64].mxu0 %vm677_vm3, %v6340_v48  ;;  %v6358_v48 = vld [vmem:[#allocation3 + $0xe2] sm:$0xff] }
 0x62c   : > { %9086 = vmatprep.mubr.msk.f32.mxu0 %vm677_vm3, %v6341_v53  ;;  %v6359_v53 = vld [vmem:[#allocation3 + $0xf2] sm:$0xff] }
 0x62f   : > { %9087 = vmatmul.mubr.msk.f32.gmra.mrb[66].mxu0 %vm677_vm3, %v6342_v55  ;;  %v6360_v55 = vld [vmem:[#allocation3 + $0xfa] sm:$0xff] }
 0x630   : > { %9089 = vmatprep.mubr.msk.f32.mxu0 %vm677_vm3, %v6343_v4  ;;  %v6361_v4 = vld [vmem:[#allocation3 + $0x10a] sm:$0xff] }
 0x633   : > { %9090 = vmatmul.mubr.msk.f32.gmra.mrb[68].mxu0 %vm677_vm3, %v6344_v0  ;;  %v6362_v0 = vld [vmem:[#allocation3 + $0x112] sm:$0xff] }
 0x634   : > { %9092 = vmatprep.mubr.msk.f32.mxu0 %vm677_vm3, %v6345_v54  ;;  %v6363_v54 = vld [vmem:[#allocation3 + $0x122] sm:$0xff] }
 0x637   : > { %9093 = vmatmul.mubr.msk.f32.gmra.mrb[70].mxu0 %vm677_vm3, %v6346_v6  ;;  %v6364_v6 = vld [vmem:[#allocation3 + $0x12a] sm:$0xff] }
 0x638   : > { %9095 = vmatprep.mubr.msk.f32.mxu0 %vm677_vm3, %v6347_v25  ;;  %v6365_v25 = vld [vmem:[#allocation3 + $0x13a] sm:$0xff] }
 0x63b   : > { %9096 = vmatmul.mubr.msk.f32.gmra.mrb[72].mxu0 %vm677_vm3, %v6348_v57  ;;  %v6366_v57 = vld [vmem:[#allocation3 + $0x142] sm:$0xff] }
 0x63c   : > { %9098 = vmatprep.mubr.msk.f32.mxu0 %vm677_vm3, %v6349_v45  ;;  %v6367_v45 = vld [vmem:[#allocation3 + $0x152] sm:$0xff] }
 0x63f   : > { %9099 = vmatmul.mubr.msk.f32.gmra.mrb[74].mxu0 %vm677_vm3, %v6350_v47  ;;  %v6368_v47 = vld [vmem:[#allocation3 + $0x15a] sm:$0xff] }
 0x640   : > { %9101 = vmatprep.mubr.msk.f32.mxu0 %vm677_vm3, %v6351_v17  ;;  %v6369_v17 = vld [vmem:[#allocation3 + $0x16a] sm:$0xff] }
 0x643   : > { %9102 = vmatmul.mubr.msk.f32.gmra.mrb[76].mxu0 %vm677_vm3, %v6352_v63  ;;  %v6370_v63 = vld [vmem:[#allocation3 + $0x172] sm:$0xff] }
 0x644   : > { %9104 = vmatprep.mubr.msk.f32.mxu0 %vm677_vm3, %v6353_v51  ;;  %v11510_v51 = vld [vmem:[%s594_s23] ss:$0 sm:$0xff] }
 0x647   : > { %9105 = vmatmul.mubr.msk.f32.gmra.mrb[78].mxu0 %vm677_vm3, %v6354_v26 }
 0x648   : > { %9107 = vmatprep.mubr.msk.f32.mxu0 %vm677_vm3, %v6355_v59 }
 0x64b   : > { %9108 = vmatmul.mubr.msk.f32.gmra.mrb[80].mxu0 %vm677_vm3, %v6356_v8 }
 0x64c   : > { %9110 = vmatprep.mubr.msk.f32.mxu0 %vm677_vm3, %v6357_v60 }
 0x64f   : > { %9111 = vmatmul.mubr.msk.f32.gmra.mrb[82].mxu0 %vm677_vm3, %v6358_v48 }
 0x650   : > { %9113 = vmatprep.mubr.msk.f32.mxu0 %vm677_vm3, %v6359_v53 }
 0x653   : > { %9114 = vmatmul.mubr.msk.f32.gmra.mrb[84].mxu0 %vm677_vm3, %v6360_v55 }
 0x654   : > { %9116 = vmatprep.mubr.msk.f32.mxu0 %vm677_vm3, %v6361_v4 }
 0x657   : > { %9117 = vmatmul.mubr.msk.f32.gmra.mrb[86].mxu0 %vm677_vm3, %v6362_v0 }
 0x658   : > { %9119 = vmatprep.mubr.msk.f32.mxu0 %vm677_vm3, %v6363_v54 }
 0x65b   : > { %9120 = vmatmul.mubr.msk.f32.gmra.mrb[88].mxu0 %vm677_vm3, %v6364_v6 }
 0x65c   : > { %9122 = vmatprep.mubr.msk.f32.mxu0 %vm677_vm3, %v6365_v25 }
 0x65f   : > { %9123 = vmatmul.mubr.msk.f32.gmra.mrb[90].mxu0 %vm677_vm3, %v6366_v57 }
 0x660   : > { %9125 = vmatprep.mubr.msk.f32.mxu0 %vm677_vm3, %v6367_v45 }
 0x663   : > { %9126 = vmatmul.mubr.msk.f32.gmra.mrb[92].mxu0 %vm677_vm3, %v6368_v47 }
 0x664   : > { %9128 = vmatprep.mubr.msk.f32.mxu0 %vm677_vm3, %v6369_v17 }
 0x667   : > { %9129 = vmatmul.mubr.msk.f32.gmra.mrb[94].mxu0 %vm677_vm3, %v6370_v63 }
 0x6fe   : > { %v9085_v26 = vpop.f32.mrb[64].mxu0 }
 0x6ff   : > { %v6737_v59 = vadd.f32 %v9085_v26, %v11510_v51  ;;  %v6538_v8 = vpop.f32.mrb[65].mxu0 }
 0x700   : > { %v6736_v60 = vadd.f32 %v11510_v51, %v6538_v8 }
 0x701   : > { %v6769_v48 = vadd.f32 %v6737_v59, %v4353_v14 }
 0x702   : > { %v6768_v53 = vadd.f32 %v6736_v60, %v4352_v29  ;;  %v9088_v55 = vpop.f32.mrb[66].mxu0 }
 0x703   : > { %v6801_v4 = vmax.f32 %v6769_v48, 0.0  ;;  %v6739_v0 = vadd.f32 %v9088_v55, %v11510_v51  ;;  %v6548_v54 = vpop.f32.mrb[67].mxu0 }
 0x704   : > { %v6800_v6 = vmax.f32 %v6768_v53, 0.0  ;;  %v6738_v25 = vadd.f32 %v11510_v51, %v6548_v54 }
 0x705   : > { %v6833_v57 = vsel %vm677_vm3, %v6801_v4, 0.0  ;;  %v6771_v45 = vadd.f32 %v6739_v0, %v4355_v41 }
 0x706   : > { %v6832_v47 = vsel %vm677_vm3, %v6800_v6, 0.0  ;;  %v6770_v31 = vadd.f32 %v6738_v25, %v4354_v24  ;;  %v9091_v22 = vpop.f32.mrb[68].mxu0 }
 0x707   : > { %v6834_v14 = vadd.f32 %v6833_v57, %v6832_v47  ;;  %v6803_v29 = vmax.f32 %v6771_v45, 0.0  ;;  %v6741_v17 = vadd.f32 %v9091_v22, %v11510_v51  ;;  %v6558_v63 = vpop.f32.mrb[69].mxu0 }
 0x708   : > { %v6802_v26 = vmax.f32 %v6770_v31, 0.0  ;;  %v6740_v59 = vadd.f32 %v11510_v51, %v6558_v63 }
 0x709   : > { %v6835_v8 = vrot.slane %v6834_v14, 4  ;;  %v6842_v60 = vsel %vm677_vm3, %v6803_v29, 0.0  ;;  %v6773_v35 = vadd.f32 %v6741_v17, %v4357_v3 }
 0x70a   : > { %v6841_v41 = vsel %vm677_vm3, %v6802_v26, 0.0  ;;  %v6772_v36 = vadd.f32 %v6740_v59, %v4356_v56  ;;  %v9094_v24 = vpop.f32.mrb[70].mxu0 }
 0x70b   : > { %v6836_v48 = vadd.f32 %v6835_v8, %v6834_v14  ;;  %v6843_v53 = vadd.f32 %v6842_v60, %v6841_v41  ;;  %v6805_v55 = vmax.f32 %v6773_v35, 0.0  ;;  %v6743_v4 = vadd.f32 %v9094_v24, %v11510_v51  ;;  %v6568_v0 = vpop.f32.mrb[71].mxu0 }
 0x70c   : > { %v6804_v54 = vmax.f32 %v6772_v36, 0.0  ;;  %v6742_v6 = vadd.f32 %v11510_v51, %v6568_v0 }
 0x70d   : > { %v6837_v25 = vrot.slane %v6836_v48, 2  ;;  %v6844_v57 = vrot.slane %v6843_v53, 4  ;;  %v6851_v46 = vsel %vm677_vm3, %v6805_v55, 0.0  ;;  %v6775_v3 = vadd.f32 %v6743_v4, %v4359_v61 }
 0x70e   : > { %v6850_v44 = vsel %vm677_vm3, %v6804_v54, 0.0  ;;  %v6774_v56 = vadd.f32 %v6742_v6, %v4358_v43  ;;  %v9097_v45 = vpop.f32.mrb[72].mxu0 }
 0x70f   : > { %v6838_v47 = vadd.f32 %v6837_v25, %v6836_v48  ;;  %v6845_v31 = vadd.f32 %v6844_v57, %v6843_v53  ;;  %v6852_v22 = vadd.f32 %v6851_v46, %v6850_v44  ;;  %v6807_v14 = vmax.f32 %v6775_v3, 0.0  ;;  %v6578_v29 = vpop.f32.mrb[73].mxu0 }
 0x710   : > { %v6806_v17 = vmax.f32 %v6774_v56, 0.0  ;;  %v6745_v63 = vadd.f32 %v9097_v45, %v11510_v51  ;;  %v6744_v26 = vadd.f32 %v11510_v51, %v6578_v29 }
 0x711   : > { %v6839_v59 = vrot.slane %v6838_v47, 1  ;;  %v6846_v8 = vrot.slane %v6845_v31, 2  ;;  %v6853_v52 = vrot.slane %v6852_v22, 4  ;;  %v6860_v61 = vsel %vm677_vm3, %v6807_v14, 0.0 }
 0x712   : > { %v6859_v12 = vsel %vm677_vm3, %v6806_v17, 0.0  ;;  %v6777_v43 = vadd.f32 %v6745_v63, %v4361_v11  ;;  %v6776_v60 = vadd.f32 %v6744_v26, %v4360_v7  ;;  %v9100_v35 = vpop.f32.mrb[74].mxu0 }
 0x713   : > { %v6840_v41 = vadd.f32 %v6839_v59, %v6838_v47  ;;  %v6847_v36 = vadd.f32 %v6846_v8, %v6845_v31  ;;  %v6854_v24 = vadd.f32 %v6853_v52, %v6852_v22  ;;  %v6861_v48 = vadd.f32 %v6860_v61, %v6859_v12  ;;  %v6588_v53 = vpop.f32.mrb[75].mxu0 }
 0x714   : > { %v6809_v55 = vmax.f32 %v6777_v43, 0.0  ;;  %v6808_v4 = vmax.f32 %v6776_v60, 0.0  ;;  %v6747_v0 = vadd.f32 %v9100_v35, %v11510_v51  ;;  %v6746_v54 = vadd.f32 %v11510_v51, %v6588_v53 }
 0x715   : > { %v6977_v6 = vmul.f32 0.0625, %v6840_v41  ;;  %v6848_v25 = vrot.slane %v6847_v36, 1  ;;  %v6855_v1 = vrot.slane %v6854_v24, 2  ;;  %v6862_v11 = vrot.slane %v6861_v48, 4 }
 0x716   : > { %v6869_v18 = vsel %vm677_vm3, %v6809_v55, 0.0  ;;  %v6868_v7 = vsel %vm677_vm3, %v6808_v4, 0.0  ;;  %v6779_v57 = vadd.f32 %v6747_v0, %v4363_v38  ;;  %v6778_v46 = vadd.f32 %v6746_v54, %v4362_v19  ;;  %v9103_v3 = vpop.f32.mrb[76].mxu0 }
 0x717   : > { %v6849_v44 = vadd.f32 %v6848_v25, %v6847_v36  ;;  %v6856_v56 = vadd.f32 %v6855_v1, %v6854_v24  ;;  %v6863_v45 = vadd.f32 %v6862_v11, %v6861_v48  ;;  %v6870_v47 = vadd.f32 %v6869_v18, %v6868_v7  ;;  %v6598_v31 = vpop.f32.mrb[77].mxu0 }
 0x718   : > { %v6811_v22 = vmax.f32 %v6779_v57, 0.0  ;;  %v6810_v14 = vmax.f32 %v6778_v46, 0.0  ;;  %v6749_v29 = vadd.f32 %v9103_v3, %v11510_v51  ;;  %v6748_v17 = vadd.f32 %v11510_v51, %v6598_v31 }
 0x719   : > { %v6978_v63 = vmul.f32 0.0625, %v6849_v44  ;;  %v6857_v26 = vrot.slane %v6856_v56, 1  ;;  %v6864_v15 = vrot.slane %v6863_v45, 2  ;;  %v6871_v38 = vrot.slane %v6870_v47, 4 }
 0x71a   : > { %v6878_v37 = vsel %vm677_vm3, %v6811_v22, 0.0  ;;  %v6877_v19 = vsel %vm677_vm3, %v6810_v14, 0.0  ;;  %v6781_v59 = vadd.f32 %v6749_v29, %v4365_v13  ;;  %v6780_v8 = vadd.f32 %v6748_v17, %v4364_v27  ;;  %v9106_v52 = vpop.f32.mrb[78].mxu0 }
 0x71b   : > { %v7010_v61 = vsel %vm7009_vm5, %v6978_v63, %v6977_v6  ;;  %v6858_v12 = vadd.f32 %v6857_v26, %v6856_v56  ;;  %v6865_v43 = vadd.f32 %v6864_v15, %v6863_v45  ;;  %v6872_v60 = vadd.f32 %v6871_v38, %v6870_v47  ;;  %v6608_v35 = vpop.f32.mrb[79].mxu0 }
 0x71c   : > { %v6879_v41 = vadd.f32 %v6878_v37, %v6877_v19  ;;  %v6813_v36 = vmax.f32 %v6781_v59, 0.0  ;;  %v6812_v24 = vmax.f32 %v6780_v8, 0.0  ;;  %v6751_v48 = vadd.f32 %v9106_v52, %v11510_v51 }
 0x71d   : > { %v6979_v53 = vmul.f32 0.0625, %v6858_v12  ;;  %v6866_v55 = vrot.slane %v6865_v43, 1  ;;  %v6873_v23 = vrot.slane %v6872_v60, 2  ;;  %v6750_v13 = vadd.f32 %v11510_v51, %v6608_v35 }
 0x71e   : > { %v6880_v42 = vrot.slane %v6879_v41, 4  ;;  %v6887_v27 = vsel %vm677_vm3, %v6813_v36, 0.0  ;;  %v6886_v4 = vsel %vm677_vm3, %v6812_v24, 0.0  ;;  %v11798_v0 = vmax.f32 %v11072_v50, 0.0  ;;  %v9109_v6 = vpop.f32.mrb[80].mxu0 }
 0x71f   : > { %v7012_v25 = vsel %vm7011_vm6, %v6979_v53, %v7010_v61  ;;  %v6867_v1 = vadd.f32 %v6866_v55, %v6865_v43  ;;  %v6874_v11 = vadd.f32 %v6873_v23, %v6872_v60  ;;  %v6888_v18 = vadd.f32 %v6887_v27, %v6886_v4  ;;  %v6618_v7 = vpop.f32.mrb[81].mxu0 }
 0x720   : > { %v6783_v54 = vadd.f32 %v6751_v48, %v11798_v0  ;;  %v6881_v57 = vadd.f32 %v6880_v42, %v6879_v41  ;;  %v11799_v3 = vmax.f32 %v11079_v20, 0.0  ;;  %v6753_v56 = vadd.f32 %v9109_v6, %v11510_v51 }
 0x721   : > { %v6980_v45 = vmul.f32 0.0625, %v6867_v1  ;;  %v6875_v47 = vrot.slane %v6874_v11, 1  ;;  %v6889_v31 = vrot.slane %v6888_v18, 4  ;;  %v6752_v50 = vadd.f32 %v11510_v51, %v6618_v7 }
 0x722   : > { %v6815_v46 = vmax.f32 %v6783_v54, 0.0  ;;  %v6782_v44 = vadd.f32 %v6750_v13, %v11799_v3  ;;  %v6882_v22 = vrot.slane %v6881_v57, 2  ;;  %v11800_v17 = vmax.f32 %v11092_v49, 0.0  ;;  %v9112_v26 = vpop.f32.mrb[82].mxu0 }
 0x723   : > { %v7014_v15 = vsel %vm7013_vm7, %v6980_v45, %v7012_v25  ;;  %v6876_v20 = vadd.f32 %v6875_v47, %v6874_v11  ;;  %v6890_v38 = vadd.f32 %v6889_v31, %v6888_v18  ;;  %v11801_v37 = vmax.f32 %v11099_v39, 0.0  ;;  %v6628_v59 = vpop.f32.mrb[83].mxu0 }
 0x724   : > { %v6896_v14 = vsel %vm677_vm3, %v6815_v46, 0.0  ;;  %v6814_v29 = vmax.f32 %v6782_v44, 0.0  ;;  %v6785_v63 = vadd.f32 %v6753_v56, %v11800_v17  ;;  %v6883_v8 = vadd.f32 %v6882_v22, %v6881_v57 }
 0x725   : > { %v6784_v19 = vadd.f32 %v6752_v50, %v11801_v37  ;;  %v6755_v12 = vadd.f32 %v9112_v26, %v11510_v51  ;;  %v6981_v43 = vmul.f32 0.0625, %v6876_v20  ;;  %v6891_v60 = vrot.slane %v6890_v38, 2 }
 0x726   : > { %v6895_v52 = vsel %vm677_vm3, %v6814_v29, 0.0  ;;  %v6817_v61 = vmax.f32 %v6785_v63, 0.0  ;;  %v6884_v41 = vrot.slane %v6883_v8, 1  ;;  %v11802_v24 = vmax.f32 %v11112_v30, 0.0  ;;  %v9115_v53 = vpop.f32.mrb[84].mxu0 }
 0x727   : > { %v6897_v49 = vadd.f32 %v6896_v14, %v6895_v52  ;;  %v6816_v35 = vmax.f32 %v6784_v19, 0.0  ;;  %v6754_v39 = vadd.f32 %v11510_v51, %v6628_v59  ;;  %v7016_v55 = vsel %vm7015_vm8, %v6981_v43, %v7014_v15  ;;  %v6638_v27 = vpop.f32.mrb[85].mxu0 }
 0x728   : > { %v6905_v36 = vsel %vm677_vm3, %v6817_v61, 0.0  ;;  %v6787_v48 = vadd.f32 %v6755_v12, %v11802_v24  ;;  %v6892_v23 = vadd.f32 %v6891_v60, %v6890_v38  ;;  %v6885_v4 = vadd.f32 %v6884_v41, %v6883_v8 }
 0x729   : > { %v6898_v13 = vrot.slane %v6897_v49, 4  ;;  %v6904_v42 = vsel %vm677_vm3, %v6816_v35, 0.0  ;;  %v11803_v6 = vmax.f32 %v11119_v28, 0.0  ;;  %v6757_v30 = vadd.f32 %v9115_v53, %v11510_v51 }
 0x72a   : > { %v6906_v0 = vadd.f32 %v6905_v36, %v6904_v42  ;;  %v6819_v54 = vmax.f32 %v6787_v48, 0.0  ;;  %v6893_v1 = vrot.slane %v6892_v23, 1  ;;  %v6756_v18 = vadd.f32 %v11510_v51, %v6638_v27  ;;  %v9118_v44 = vpop.f32.mrb[86].mxu0 }
 0x72b   : > { %v6786_v25 = vadd.f32 %v6754_v39, %v11803_v6  ;;  %v6899_v11 = vadd.f32 %v6898_v13, %v6897_v49  ;;  %v6982_v7 = vmul.f32 0.0625, %v6885_v4  ;;  %v11804_v47 = vmax.f32 %v11132_v40, 0.0  ;;  %v6648_v22 = vpop.f32.mrb[87].mxu0 }
 0x72c   : > { %v6907_v57 = vrot.slane %v6906_v0, 4  ;;  %v6914_v46 = vsel %vm677_vm3, %v6819_v54, 0.0  ;;  %v6894_v56 = vadd.f32 %v6893_v1, %v6892_v23  ;;  %v11805_v28 = vmax.f32 %v11139_v34, 0.0 }
 0x72d   : > { %v6818_v3 = vmax.f32 %v6786_v25, 0.0  ;;  %v6900_v45 = vrot.slane %v6899_v11, 2  ;;  %v6789_v31 = vadd.f32 %v6757_v30, %v11804_v47  ;;  %v7018_v14 = vsel %vm7017_vm9, %v6982_v7, %v7016_v55 }
 0x72e   : > { %v6788_v50 = vadd.f32 %v6756_v18, %v11805_v28  ;;  %v6908_v29 = vadd.f32 %v6907_v57, %v6906_v0  ;;  %v6759_v63 = vadd.f32 %v9118_v44, %v11510_v51  ;;  %v6983_v26 = vmul.f32 0.0625, %v6894_v56  ;;  %v9121_v8 = vpop.f32.mrb[88].mxu0 }
 0x72f   : > { %v6913_v17 = vsel %vm677_vm3, %v6818_v3, 0.0  ;;  %v6901_v15 = vadd.f32 %v6900_v45, %v6899_v11  ;;  %v6821_v38 = vmax.f32 %v6789_v31, 0.0  ;;  %v11806_v40 = vmax.f32 %v11152_v5, 0.0  ;;  %v6658_v60 = vpop.f32.mrb[89].mxu0 }
 0x730   : > { %v6915_v20 = vadd.f32 %v6914_v46, %v6913_v17  ;;  %v6909_v37 = vrot.slane %v6908_v29, 2  ;;  %v6820_v19 = vmax.f32 %v6788_v50, 0.0  ;;  %v6758_v34 = vadd.f32 %v11510_v51, %v6648_v22 }
 0x731   : > { %v6791_v59 = vadd.f32 %v6759_v63, %v11806_v40  ;;  %v7020_v52 = vsel %vm7019_vm10, %v6983_v26, %v7018_v14  ;;  %v6902_v61 = vrot.slane %v6901_v15, 1  ;;  %v6923_v43 = vsel %vm677_vm3, %v6821_v38, 0.0 }
 0x732   : > { %v6916_v12 = vrot.slane %v6915_v20, 4  ;;  %v6910_v49 = vadd.f32 %v6909_v37, %v6908_v29  ;;  %v6922_v35 = vsel %vm677_vm3, %v6820_v19, 0.0  ;;  %v11807_v36 = vmax.f32 %v11159_v9, 0.0  ;;  %v9124_v27 = vpop.f32.mrb[90].mxu0 }
 0x733   : > { %v6823_v41 = vmax.f32 %v6791_v59, 0.0  ;;  %v6903_v5 = vadd.f32 %v6902_v61, %v6901_v15  ;;  %v6924_v39 = vadd.f32 %v6923_v43, %v6922_v35  ;;  %v6761_v53 = vadd.f32 %v9121_v8, %v11510_v51  ;;  %v6668_v25 = vpop.f32.mrb[91].mxu0 }
 0x734   : > { %v6790_v24 = vadd.f32 %v6758_v34, %v11807_v36  ;;  %v6917_v48 = vadd.f32 %v6916_v12, %v6915_v20  ;;  %v6911_v55 = vrot.slane %v6910_v49, 1  ;;  %v6760_v42 = vadd.f32 %v11510_v51, %v6658_v60 }
 0x735   : > { %v6932_v23 = vsel %vm677_vm3, %v6823_v41, 0.0  ;;  %v6984_v4 = vmul.f32 0.0625, %v6903_v5  ;;  %v6925_v54 = vrot.slane %v6924_v39, 4  ;;  %v11808_v6 = vmax.f32 %v11172_v33, 0.0 }
 0x736   : > { %v6822_v13 = vmax.f32 %v6790_v24, 0.0  ;;  %v6918_v0 = vrot.slane %v6917_v48, 2  ;;  %v6912_v1 = vadd.f32 %v6911_v55, %v6910_v49  ;;  %v11809_v30 = vmax.f32 %v11179_v16, 0.0  ;;  %v9127_v28 = vpop.f32.mrb[92].mxu0 }
 0x737   : > { %v6793_v9 = vadd.f32 %v6761_v53, %v11808_v6  ;;  %v6763_v7 = vadd.f32 %v9124_v27, %v11510_v51  ;;  %v7022_v57 = vsel %vm7021_vm11, %v6984_v4, %v7020_v52  ;;  %v6926_v3 = vadd.f32 %v6925_v54, %v6924_v39  ;;  %v6678_v29 = vpop.f32.mrb[93].mxu0 }
 0x738   : > { %v6931_v11 = vsel %vm677_vm3, %v6822_v13, 0.0  ;;  %v6792_v18 = vadd.f32 %v6760_v42, %v11809_v30  ;;  %v6919_v46 = vadd.f32 %v6918_v0, %v6917_v48  ;;  %v6985_v56 = vmul.f32 0.0625, %v6912_v1  ;;  %7032 = vst.msk [vmem:[%s11625_s26] sm:$0xff] %vm677_vm3, %v7022_v57 }
 0x739   : > { %v6933_v44 = vadd.f32 %v6932_v23, %v6931_v11  ;;  %v6825_v45 = vmax.f32 %v6793_v9, 0.0  ;;  %v11810_v33 = vmax.f32 %v11192_v62, 0.0  ;;  %v6927_v50 = vrot.slane %v6926_v3, 2 }
 0x73a   : > { %v6824_v47 = vmax.f32 %v6792_v18, 0.0  ;;  %v6920_v16 = vrot.slane %v6919_v46, 1  ;;  %v6762_v14 = vadd.f32 %v11510_v51, %v6668_v25  ;;  %v6765_v62 = vadd.f32 %v9127_v28, %v11510_v51  ;;  %v9130_v61 = vpop.f32.mrb[94].mxu0 }
 0x73b   : > { %v6795_v31 = vadd.f32 %v6763_v7, %v11810_v33  ;;  %v6934_v22 = vrot.slane %v6933_v44, 4  ;;  %v6941_v17 = vsel %vm677_vm3, %v6825_v45, 0.0  ;;  %v6928_v20 = vadd.f32 %v6927_v50, %v6926_v3  ;;  %v6688_v35 = vpop.f32.mrb[95].mxu0 }
 0x73c   : > { %v6940_v63 = vsel %vm677_vm3, %v6824_v47, 0.0  ;;  %v6921_v15 = vadd.f32 %v6920_v16, %v6919_v46  ;;  %v11811_v40 = vmax.f32 %v11199_v58, 0.0  ;;  %v11812_v34 = vmax.f32 %v11212_v32, 0.0 }
 0x73d   : > { %v6827_v26 = vmax.f32 %v6795_v31, 0.0  ;;  %v6935_v38 = vadd.f32 %v6934_v22, %v6933_v44  ;;  %v6942_v37 = vadd.f32 %v6941_v17, %v6940_v63  ;;  %v6764_v52 = vadd.f32 %v11510_v51, %v6678_v29 }
 0x73e   : > { %v6794_v59 = vadd.f32 %v6762_v14, %v11811_v40  ;;  %v6797_v8 = vadd.f32 %v6765_v62, %v11812_v34  ;;  %v6986_v12 = vmul.f32 0.0625, %v6921_v15  ;;  %v6929_v43 = vrot.slane %v6928_v20, 1 }
 0x73f   : > { %v6950_v19 = vsel %vm677_vm3, %v6827_v26, 0.0  ;;  %v6936_v60 = vrot.slane %v6935_v38, 2  ;;  %v6943_v49 = vrot.slane %v6942_v37, 4  ;;  %v11813_v24 = vmax.f32 %v11219_v21, 0.0 }
 0x740   : > { %v6826_v41 = vmax.f32 %v6794_v59, 0.0  ;;  %v6829_v36 = vmax.f32 %v6797_v8, 0.0  ;;  %v6767_v48 = vadd.f32 %v9130_v61, %v11510_v51  ;;  %v7023_v58 = vsel %vm7009_vm5, %v6986_v12, %v6985_v56 }
 0x741   : > { %v6796_v5 = vadd.f32 %v6764_v52, %v11813_v24  ;;  %v6930_v39 = vadd.f32 %v6929_v43, %v6928_v20  ;;  %v6937_v32 = vadd.f32 %v6936_v60, %v6935_v38  ;;  %v6944_v53 = vadd.f32 %v6943_v49, %v6942_v37 }
 0x742   : > { %v6949_v55 = vsel %vm677_vm3, %v6826_v41, 0.0  ;;  %v6959_v23 = vsel %vm677_vm3, %v6829_v36, 0.0  ;;  %v11814_v42 = vmax.f32 %v11232_v10, 0.0  ;;  %v6766_v25 = vadd.f32 %v11510_v51, %v6688_v35 }
 0x743   : > { %v6828_v13 = vmax.f32 %v6796_v5, 0.0  ;;  %v6987_v4 = vmul.f32 0.0625, %v6930_v39  ;;  %v6938_v0 = vrot.slane %v6937_v32, 1  ;;  %v6945_v54 = vrot.slane %v6944_v53, 2 }
 0x744   : > { %v6799_v27 = vadd.f32 %v6767_v48, %v11814_v42  ;;  %v6951_v21 = vadd.f32 %v6950_v19, %v6949_v55  ;;  %v11815_v57 = vmax.f32 %v11239_v2, 0.0 }
 0x745   : > { %v6958_v6 = vsel %vm677_vm3, %v6828_v13, 0.0  ;;  %v7024_v1 = vsel %vm7011_vm6, %v6987_v4, %v7023_v58  ;;  %v6939_v11 = vadd.f32 %v6938_v0, %v6937_v32  ;;  %v6946_v30 = vadd.f32 %v6945_v54, %v6944_v53 }
 0x746   : > { %v6831_v9 = vmax.f32 %v6799_v27, 0.0  ;;  %v6952_v18 = vrot.slane %v6951_v21, 4  ;;  %v6960_v7 = vadd.f32 %v6959_v23, %v6958_v6  ;;  %v6798_v46 = vadd.f32 %v6766_v25, %v11815_v57 }
 0x747   : > { %v6988_v10 = vmul.f32 0.0625, %v6939_v11  ;;  %v6947_v3 = vrot.slane %v6946_v30, 1 }
 0x748   : > { %v6953_v44 = vadd.f32 %v6952_v18, %v6951_v21  ;;  %v6961_v56 = vrot.slane %v6960_v7, 4  ;;  %v6968_v45 = vsel %vm677_vm3, %v6831_v9, 0.0  ;;  %v6830_v47 = vmax.f32 %v6798_v46, 0.0 }
 0x749   : > { %v7025_v33 = vsel %vm7013_vm7, %v6988_v10, %v7024_v1  ;;  %v6948_v31 = vadd.f32 %v6947_v3, %v6946_v30 }
 0x74a   : > { %v6954_v51 = vrot.slane %v6953_v44, 2  ;;  %v6962_v28 = vadd.f32 %v6961_v56, %v6960_v7  ;;  %v6967_v16 = vsel %vm677_vm3, %v6830_v47, 0.0 }
 0x74b   : > { %v6989_v50 = vmul.f32 0.0625, %v6948_v31  ;;  %v6969_v14 = vadd.f32 %v6968_v45, %v6967_v16 }
 0x74c   : > { %v6955_v22 = vadd.f32 %v6954_v51, %v6953_v44  ;;  %v6963_v29 = vrot.slane %v6962_v28, 2 }
 0x74d   : > { %v7026_v2 = vsel %vm7015_vm8, %v6989_v50, %v7025_v33  ;;  %v6970_v63 = vrot.slane %v6969_v14, 4 }
 0x74e   : > { %v6956_v17 = vrot.slane %v6955_v22, 1  ;;  %v6964_v26 = vadd.f32 %v6963_v29, %v6962_v28 }
 0x74f   : > { %v6971_v15 = vadd.f32 %v6970_v63, %v6969_v14 }
 0x750   : > { %v6957_v62 = vadd.f32 %v6956_v17, %v6955_v22  ;;  %v6965_v20 = vrot.slane %v6964_v26, 1 }
 0x751   : > { %v6972_v37 = vrot.slane %v6971_v15, 2 }
 0x752   : > { %v6990_v38 = vmul.f32 0.0625, %v6957_v62  ;;  %v6966_v19 = vadd.f32 %v6965_v20, %v6964_v26 }
 0x753   : > { %v6973_v59 = vadd.f32 %v6972_v37, %v6971_v15 }
 0x754   : > { %v7027_v40 = vsel %vm7017_vm9, %v6990_v38, %v7026_v2  ;;  %v6991_v34 = vmul.f32 0.0625, %v6966_v19 }
 0x755   : > { %v6974_v8 = vrot.slane %v6973_v59, 1 }
 0x756   : > { %v7028_v52 = vsel %vm7019_vm10, %v6991_v34, %v7027_v40 }
 0x757   : > { %v6975_v61 = vadd.f32 %v6974_v8, %v6973_v59 }
 0x759   : > { %v6992_v12 = vmul.f32 0.0625, %v6975_v61 }
 0x75b   : > { %v7029_v43 = vsel %vm7021_vm11, %v6992_v12, %v7028_v52 }
 0x75c   : > { %7033 = vst.msk [vmem:[%s11625_s26 + $0x8] sm:$0xff] %vm677_vm3, %v7029_v43 }
 0x75d   : > { %9687 = shalt.err (!%p9684_p12)
}
 0x75e   : > { %s9688_s30 = scalar_lea.hbm %s11663_s12, 256  ;;  %s9692_s23 = scalar_lea.hbm %s11723_s11, 512 }
 0x75f   : > { %p9689_p8 = scmp.ne.s32.totalorder %s11663_s12, %s9688_s30  ;;  %p9693_p4 = scmp.lt.u32.totalorder %s11663_s12, %s11723_s11 }
 0x760   : > { %p9694_p6 = scmp.lt.u32.totalorder %s9692_s23, %s9688_s30  ;;  %p9696_p1 = scmp.lt.u32.totalorder %s9688_s30, %s11663_s12 }
 0x761   : > { %p9690_p0 = pnand %p9689_p8, %p11816_p11 }
 0x762   : > { %p9695_p13 = por %p9694_p6, %p9693_p4 }
 0x763   : > { %p9691_p2 = pneg %p9690_p0 }
 0x764   : > { %p9697_p10 = por %p9696_p1, %p9695_p13 }
 0x766   : > { %p9698_p5 = pnand %p9697_p10, %p9691_p2 }
 0x768   : > { %9701 = shalt.err (!%p9698_p5)
}
 0x769   : > { %s9754_s14 = smov 128   ;;  %s9755_s16 = smov 8  }
 0x76a   : > { %9560 = dma.vmem_to_hbm [thread:$0]  (%p11816_p11), %s11665_s25, 256, %s11663_s12, %s7035_s13, %s9754_s14, %s9754_s14, %s9755_s16  }
 0x76b PF: > { %s11817_s19 = sld [smem:[#allocation13_spill]]  ;;  %s11818_s24 = sld [smem:[#allocation17_spill]] }
 0x76c   : > { %p11820_p9 = scmp.ge.s32.totalorder %s9744_s20, 2 }
 0x771   : > { %s7063_s21 = sand.u32 1, %s11817_s19   ;;  %p11819_p7 = scmp.ne.s32.totalorder %s11818_s24, 0 }
 0x772   : > { %s7064_s1 = scalar_lea.sflag [#allocation6], %s7063_s21 }
 0x773   : > { %p9570_p3 = pnand %p11820_p9, %p11819_p7 }
 0x775   : > { %9727 = dma.done.wait (!%p9570_p3), %s7064_s1, 256  }
 0x776   : > { %9729 = vsyncadd (!%p9570_p3), %s7064_s1, 4294967040  ;;  %s11821_s20 = sld [smem:[#allocation15_spill]]  ;;  %s11822_s30 = sld [smem:[#allocation14_spill]] }
 0x777   : > { %s11823_s19 = sld [smem:[#allocation16_spill]]  ;;  %s11824_s17 = smov %s9736_s18 }
 0x77c   : > { %p27_p12 = scmp.ge.s32.totalorder %s11821_s20, 4   ;;  %s11825_s18 = smov %s11822_s30 }
 0x77e   :  { %29 = sbr.rel (!%p27_p12) target bundleno = 9 (0x9), region = 159 }
 0x785   :  { %7069 = vsyncpa [#allocation5], 1 }
 0x786   :  { %7071 = vsyncpa [#allocation5 + $0x1], 1 }
 0x787   :  { %7072 = vsyncpa [#allocation8], 1 }
 0x788   :  { %7074 = vsyncpa [#allocation8 + $0x1], 1 }
 0x789   :  { %7075 = vsyncpa [#allocation6], 1 }
 0x78a   :  { %7077 = vsyncpa [#allocation6 + $0x1], 1 }

</bundles_post_ra>
